<compile_context>
chip_gen: v7x
topology: tpu7x:2x2x1
jax: 0.10.0
libtpu: 0.0.40
codegen_flags: <defaults>
</compile_context>

<pallas_src>
import functools
import math

import numpy as np
import jax
import jax.numpy as jnp
from jax import lax
from jax.experimental import pallas as pl
from jax.experimental.pallas import tpu as pltpu


# ----------------------------------------------------------------------------
# Fused kernel: one grid step per patch size, residual resident in VMEM.
# ----------------------------------------------------------------------------
def coda_fused_kernel(x_ref, dmat_ref, umat_ref, cb_ref, cbt_ref, cbn_ref,
                      wm_ref, fhat_ref, idx_ref, stats_ref, fres_ref,
                      *, inv_temp, scale, sqrt_c, codebook_size, beta,
                      smw, bmw, eps):
    """One patch-size stage.

    x_ref    : (C, B*HW)        f32   input, channel-major, batch on lanes
    dmat_ref : (1, B*HW, T)     bf16  block-diag area-downsample matrix (padded)
    umat_ref : (1, T, B*HW)     bf16  block-diag bicubic-upsample matrix (padded)
    cb_ref   : (K, C)           bf16  codebook
    cbt_ref  : (C, K)           bf16  pre-transposed codebook
    cbn_ref  : (K, 1)           f32   exact squared code norms
    wm_ref   : (1, 2, T)        f32   [mask/N, mask/(N*C)] statistic weights
    fhat_ref : (C, B*HW)        f32   f_hat accumulator (resident across grid)
    idx_ref  : (1, 1, T)        i32   lane-dense hard indices for this patch
    stats_ref: (1, 1, 128)      f32   [entropy_loss, quant_loss, sample_H, avg_H]
    fres_ref : (C, B*HW)        f32   VMEM scratch: running residual
    """
    p = pl.program_id(0)

    @pl.when(p == 0)
    def _init():
        fres_ref[...] = x_ref[...]
        fhat_ref[...] = jnp.zeros_like(fhat_ref)

    fres = fres_ref[...]                                         # (C, B*HW)

    # ---- area downsample (bf16 MXU, f32 acc); padded token columns are 0 ---
    f = jnp.dot(fres.astype(jnp.bfloat16), dmat_ref[0],
                preferred_element_type=jnp.float32)              # (C, T)

    # ---- cross-attention logits to the codebook ----------------------------
    logits = jnp.dot(cb_ref[...], f.astype(jnp.bfloat16),
                     preferred_element_type=jnp.float32) * scale  # (K, T)

    # ---- soft assignment: softmax over codes (sublane axis), exact divide --
    m = jnp.max(logits, axis=0, keepdims=True)                   # (1, T)
    centered = logits - m
    e = jnp.exp(centered)
    s = jnp.sum(e, axis=0, keepdims=True)
    attn = e / s                                                 # (K, T)

    # ---- hard assignment: lowest-index argmax, produced lane-major ---------
    code_iota = lax.broadcasted_iota(jnp.int32, logits.shape, 0)
    idx_f = jnp.min(jnp.where(logits >= m,
                              code_iota.astype(jnp.float32),
                              float(codebook_size)),
                    axis=0, keepdims=True)                       # (1, T)
    idx_i = idx_f.astype(jnp.int32)
    idx_ref[0] = idx_i

    # ---- soft reconstruction ------------------------------------------------
    zq = jnp.dot(cbt_ref[...], attn.astype(jnp.bfloat16),
                 preferred_element_type=jnp.float32)             # (C, T)

    # ---- quantization-loss columns ------------------------------------------
    ds = zq - f
    soft_col = jnp.sum(ds * ds, axis=0, keepdims=True)           # (1, T)
    # hard term without a second matmul:
    #   ||cb_idx - f||^2 = ||cb_idx||^2 - 2*sqrt(C)*max_logit + ||f||^2
    cn_tok = jnp.sum(jnp.where(code_iota == idx_i, cbn_ref[...], 0.0),
                     axis=0, keepdims=True)                      # (1, T)
    fnorm = jnp.sum(f * f, axis=0, keepdims=True)                # (1, T)
    hard_col = cn_tok - (2.0 * sqrt_c) * m + fnorm               # (1, T)

    # ---- tempered-softmax statistics (reuse T=1 max: max(l/T) == m/T) ------
    lt = centered * inv_temp
    et = jnp.exp(lt)
    st = jnp.sum(et, axis=0, keepdims=True)
    probs_t = et / st                                            # (K, T)
    # log_softmax(l/T + eps) == log_softmax(l/T)  (shift invariance)
    log_probs = lt - jnp.log(st)
    ent_col = -jnp.sum(probs_t * log_probs, axis=0, keepdims=True)  # (1, T)

    # ---- masked, weighted reductions -> final per-patch scalars ------------
    wm = wm_ref[0]                                               # (2, T)
    w_ent = wm[0:1, :]        # valid_mask / N
    w_q = wm[1:2, :]          # valid_mask / (N * C)
    sample_entropy = jnp.sum(ent_col * w_ent, axis=1, keepdims=True)     # (1,1)
    avg_probs = jnp.sum(probs_t * w_ent, axis=1, keepdims=True)          # (K,1)
    avg_entropy = -jnp.sum(avg_probs * jnp.log(avg_probs + eps),
                           axis=0, keepdims=True)                        # (1,1)
    entropy_loss = smw * sample_entropy - bmw * avg_entropy
    # mean((zq-f)^2) + (1+beta)*mean((cb_idx-f)^2)
    quant_loss = jnp.sum((soft_col + (1.0 + beta) * hard_col) * w_q,
                         axis=1, keepdims=True)                           # (1,1)

    lane = lax.broadcasted_iota(jnp.int32, (1, 128), 1)
    stats_ref[0] = (jnp.where(lane == 0, entropy_loss, 0.0)
                    + jnp.where(lane == 1, quant_loss, 0.0)
                    + jnp.where(lane == 2, sample_entropy, 0.0)
                    + jnp.where(lane == 3, avg_entropy, 0.0))    # (1, 128)

    # ---- bicubic upsample (padded token rows of U are zero) + updates ------
    h = jnp.dot(zq.astype(jnp.bfloat16), umat_ref[0],
                preferred_element_type=jnp.float32)              # (C, B*HW)
    fres_ref[...] = fres - h
    fhat_ref[...] = fhat_ref[...] + h


def coda_fused_call(x_cm, d_all, u_all, cb_bf, cbt_bf, cbn, wmask,
                    *, beta, entropy_temperature, smw, bmw, eps):
    """Single fused pallas_call covering every patch size."""
    C, BHW = x_cm.shape
    n_patch, _, T = d_all.shape
    K = cb_bf.shape[0]

    kernel = functools.partial(
        coda_fused_kernel,
        inv_temp=1.0 / float(entropy_temperature),
        scale=1.0 / math.sqrt(C),
        sqrt_c=math.sqrt(C),
        codebook_size=K,
        beta=float(beta), smw=float(smw), bmw=float(bmw), eps=float(eps))

    out_shape = (
        jax.ShapeDtypeStruct((C, BHW), jnp.float32),      # f_hat (channel-major)
        jax.ShapeDtypeStruct((n_patch, 1, T), jnp.int32),   # packed hard indices
        jax.ShapeDtypeStruct((n_patch, 1, 128), jnp.float32),  # per-patch scalars
    )
    grid_spec = pltpu.PrefetchScalarGridSpec(
        num_scalar_prefetch=0,
        grid=(n_patch,),
        in_specs=[
            pl.BlockSpec((C, BHW), lambda i: (0, 0)),        # x (resident)
            pl.BlockSpec((1, BHW, T), lambda i: (i, 0, 0)),  # downsample matrix
            pl.BlockSpec((1, T, BHW), lambda i: (i, 0, 0)),  # upsample matrix
            pl.BlockSpec((K, C), lambda i: (0, 0)),          # codebook
            pl.BlockSpec((C, K), lambda i: (0, 0)),          # codebook^T
            pl.BlockSpec((K, 1), lambda i: (0, 0)),          # ||cb||^2 (f32)
            pl.BlockSpec((1, 2, T), lambda i: (i, 0, 0)),    # statistic weights
        ],
        out_specs=(
            pl.BlockSpec((C, BHW), lambda i: (0, 0)),        # f_hat accumulator
            pl.BlockSpec((1, 1, T), lambda i: (i, 0, 0)),
            pl.BlockSpec((1, 1, 128), lambda i: (i, 0, 0)),
        ),
        scratch_shapes=[pltpu.VMEM((C, BHW), jnp.float32)],  # running residual
    )
    return pl.pallas_call(
        kernel,
        grid_spec=grid_spec,
        out_shape=out_shape,
        # Patch axis carries the residual dependency -> "arbitrary".
        # TODO(synk): for multi-TensorCore parts (v7x) add a leading "parallel"
        # batch-tile grid axis (same kernel, per-tile block-diag matrices).
        compiler_params=pltpu.CompilerParams(
            dimension_semantics=("arbitrary",)),
    )(x_cm, d_all, u_all, cb_bf, cbt_bf, cbn, wmask)


# ----------------------------------------------------------------------------
# Interpolation matrices (built once at trace time, plain numpy)
# ----------------------------------------------------------------------------
def area_matrix(out_size, in_size):
    # F.interpolate(mode='area') == average pooling when in_size % out_size == 0.
    # TODO(synk): non-divisible adaptive-average case not needed for these shapes.
    assert in_size % out_size == 0
    r = in_size // out_size
    M = np.zeros((out_size, in_size), dtype=np.float32)
    for o in range(out_size):
        M[o, o * r:(o + 1) * r] = 1.0 / r
    return M


def bicubic_matrix(out_size, in_size):
    # PyTorch bicubic (align_corners=False, antialias=False), A = -0.75.
    A = -0.75

    def cubic1(t):   # |t| <= 1
        return ((A + 2.0) * t - (A + 3.0)) * t * t + 1.0

    def cubic2(t):   # 1 < |t| < 2
        return ((A * t - 5.0 * A) * t + 8.0 * A) * t - 4.0 * A

    M = np.zeros((out_size, in_size), dtype=np.float32)
    scale = in_size / out_size
    for o in range(out_size):
        real = (o + 0.5) * scale - 0.5
        in_f = int(np.floor(real))
        t = real - in_f
        ws = (cubic2(t + 1.0), cubic1(t), cubic1(1.0 - t), cubic2(2.0 - t))
        for k, w in enumerate(ws):
            src = min(max(in_f - 1 + k, 0), in_size - 1)   # border replication
            M[o, src] += w
    return M


def _round_up(v, m):
    return ((v + m - 1) // m) * m


# ----------------------------------------------------------------------------
# CODAQuantizer forward
# ----------------------------------------------------------------------------
def coda_quantizer_forward(x, codebook, patch_size_list,
                           beta=0.25, entropy_temperature=0.01,
                           sample_minimization_weight=1.0,
                           batch_maximization_weight=1.0,
                           eps=1e-5):
    B, C, H, W = x.shape
    HW = H * W
    n_patch = len(patch_size_list)
    p2_list = [p * p for p in patch_size_list]
    # Lane-packed token slab width (batch folded onto lanes, 128-aligned).
    T = max(128, _round_up(B * max(p2_list), 128))

    # --- host-side constants: padded batch-block-diagonal resize matrices ---
    d_all = np.zeros((n_patch, B * HW, T), dtype=np.float32)
    u_all = np.zeros((n_patch, T, B * HW), dtype=np.float32)
    wmask = np.zeros((n_patch, 2, T), dtype=np.float32)
    eye_b = np.eye(B, dtype=np.float32)
    for i, p in enumerate(patch_size_list):
        d_t = np.kron(area_matrix(p, H), area_matrix(p, W)).T        # (HW, p2)
        u_t = np.kron(bicubic_matrix(H, p), bicubic_matrix(W, p)).T  # (p2, HW)
        n = B * p * p
        d_all[i, :, :n] = np.kron(eye_b, d_t)                        # (B*HW, n)
        u_all[i, :n, :] = np.kron(eye_b, u_t)                        # (n, B*HW)
        wmask[i, 0, :n] = 1.0 / n                                    # mask / N
        wmask[i, 1, :n] = 1.0 / (n * C)                              # mask / (N*C)
    # bf16 resize matrices: single-pass MXU + half the VMEM/DMA footprint.
    # (flip both to jnp.float32 for bit-closer numerics if needed)
    d_all = jnp.asarray(d_all, dtype=jnp.bfloat16)
    u_all = jnp.asarray(u_all, dtype=jnp.bfloat16)
    wmask = jnp.asarray(wmask)

    # Channel-major, batch folded on lanes: (C, B*HW), lane = b*HW + hw.
    x_cm = jnp.transpose(x.reshape(B, C, HW), (1, 0, 2)).reshape(C, B * HW)
    cb_bf = codebook.astype(jnp.bfloat16)                            # (K, C)
    cbt_bf = codebook.T.astype(jnp.bfloat16)                         # (C, K)
    cbn = jnp.sum(codebook.astype(jnp.float32) ** 2,
                  axis=1, keepdims=True)                             # (K, 1) f32

    fhat_cm, idx_all, stats = coda_fused_call(
        x_cm, d_all, u_all, cb_bf, cbt_bf, cbn, wmask,
        beta=beta, entropy_temperature=entropy_temperature,
        smw=sample_minimization_weight, bmw=batch_maximization_weight,
        eps=eps)

    f_hat = jnp.transpose(fhat_cm.reshape(C, B, H, W), (1, 0, 2, 3))
    idx_list = [idx_all[i, 0, :B * p * p].reshape(B, p * p)
                for i, p in enumerate(patch_size_list)]
    entropy_loss = jnp.mean(stats[:, 0, 0])
    vq_loss = jnp.mean(stats[:, 0, 1])
    return idx_list, f_hat, vq_loss, entropy_loss


# ----------------------------------------------------------------------------
if __name__ == "__main__":
    key = jax.random.PRNGKey(0)
    kx, kcb = jax.random.split(key)

    hidden_dim = 32
    codebook_size = 64
    patch_size_list = [1, 2, 4, 8, 16]
    B, H, W = 2, 16, 16

    x = jax.random.normal(kx, (B, hidden_dim, H, W), dtype=jnp.float32)
    # nn.Embedding default init is N(0, 1)
    codebook = jax.random.normal(kcb, (codebook_size, hidden_dim),
                                 dtype=jnp.float32)

    idx_list, f_hat, vq_loss, entropy_loss = coda_quantizer_forward(
        x, codebook, patch_size_list,
        beta=0.25, entropy_temperature=0.01,
        sample_minimization_weight=1.0, batch_maximization_weight=1.0)

    jax.block_until_ready((idx_list, f_hat, vq_loss, entropy_loss))
    print("KERNEL_OK")
</pallas_src>

<mosaic_0001>
module attributes {stable_mosaic.version = 11 : i64} {
  func.func @coda_fused_kernel(%arg0: i32, %arg1: memref<32x512xf32, #tpu.memory_space<vmem>>, %arg2: memref<1x512x512xbf16, #tpu.memory_space<vmem>>, %arg3: memref<1x512x512xbf16, #tpu.memory_space<vmem>>, %arg4: memref<64x32xbf16, #tpu.memory_space<vmem>>, %arg5: memref<32x64xbf16, #tpu.memory_space<vmem>>, %arg6: memref<64x1xf32, #tpu.memory_space<vmem>>, %arg7: memref<1x2x512xf32, #tpu.memory_space<vmem>>, %arg8: memref<32x512xf32, #tpu.memory_space<vmem>>, %arg9: memref<1x1x512xi32, #tpu.memory_space<vmem>>, %arg10: memref<1x1x128xf32, #tpu.memory_space<vmem>>, %arg11: memref<32x512xf32, #tpu.memory_space<vmem>>) attributes {dimension_semantics = [#tpu.dimension_semantics<arbitrary>], iteration_bounds = array<i64: 5>, scalar_prefetch = 0 : i64, scratch_operands = 1 : i64, tpu.core_type = #tpu.core_type<tc>, window_params = [{pipeline_mode = #tpu.pipeline_mode<synchronous>, transform_indices = @transform_0, window_bounds = array<i64: 32, 512>}, {transform_indices = @transform_1, window_bounds = array<i64: 1, 512, 512>}, {transform_indices = @transform_2, window_bounds = array<i64: 1, 512, 512>}, {pipeline_mode = #tpu.pipeline_mode<synchronous>, transform_indices = @transform_3, window_bounds = array<i64: 64, 32>}, {pipeline_mode = #tpu.pipeline_mode<synchronous>, transform_indices = @transform_4, window_bounds = array<i64: 32, 64>}, {pipeline_mode = #tpu.pipeline_mode<synchronous>, transform_indices = @transform_5, window_bounds = array<i64: 64, 1>}, {transform_indices = @transform_6, window_bounds = array<i64: 1, 2, 512>}, {pipeline_mode = #tpu.pipeline_mode<synchronous>, transform_indices = @transform_7, window_bounds = array<i64: 32, 512>}, {transform_indices = @transform_8, window_bounds = array<i64: 1, 1, 512>}, {transform_indices = @transform_9, window_bounds = array<i64: 1, 1, 128>}]} {
    %c0_i32 = arith.constant 0 : i32
    %0 = arith.cmpi eq, %arg0, %c0_i32 : i32
    %1 = arith.extui %0 : i1 to i32
    %c0_i32_0 = arith.constant 0 : i32
    %2 = arith.cmpi ne, %1, %c0_i32_0 : i32
    scf.if %2 {
      %c0_60 = arith.constant 0 : index
      %c0_61 = arith.constant 0 : index
      %142 = vector.load %arg1[%c0_60, %c0_61] : memref<32x512xf32, #tpu.memory_space<vmem>>, vector<32x512xf32>
      %c0_62 = arith.constant 0 : index
      %c0_63 = arith.constant 0 : index
      %143 = vector.load %arg11[%c0_62, %c0_63] : memref<32x512xf32, #tpu.memory_space<vmem>>, vector<32x512xf32>
      tpu.vector_store %arg11[%c0_62, %c0_63], %142 {strides = array<i32>} : memref<32x512xf32, #tpu.memory_space<vmem>>, vector<32x512xf32>,
      %cst_64 = arith.constant 0.000000e+00 : f32
      %144 = vector.broadcast %cst_64 : f32 to vector<32x512xf32>
      %c0_65 = arith.constant 0 : index
      %c0_66 = arith.constant 0 : index
      %145 = vector.load %arg8[%c0_65, %c0_66] : memref<32x512xf32, #tpu.memory_space<vmem>>, vector<32x512xf32>
      tpu.vector_store %arg8[%c0_65, %c0_66], %144 {strides = array<i32>} : memref<32x512xf32, #tpu.memory_space<vmem>>, vector<32x512xf32>,
    } else {
    }
    %c0 = arith.constant 0 : index
    %c0_1 = arith.constant 0 : index
    %3 = vector.load %arg11[%c0, %c0_1] : memref<32x512xf32, #tpu.memory_space<vmem>>, vector<32x512xf32>
    %4 = arith.truncf %3 : vector<32x512xf32> to vector<32x512xbf16>
    %c0_2 = arith.constant 0 : index
    %c0_3 = arith.constant 0 : index
    %c0_4 = arith.constant 0 : index
    %5 = vector.load %arg2[%c0_2, %c0_3, %c0_4] : memref<1x512x512xbf16, #tpu.memory_space<vmem>>, vector<1x512x512xbf16>
    %6 = vector.shape_cast %5 : vector<1x512x512xbf16> to vector<512x512xbf16>
    %cst = arith.constant dense<0.000000e+00> : vector<32x512xf32>
    %7 = tpu.matmul %4, %6, %cst {dimension_numbers = #tpu.dot_dimension_numbers<[1], [0], [0], [1], [0, 0, 1, 1], [], []>} : vector<32x512xbf16>, vector<512x512xbf16>, vector<32x512xf32> -> vector<32x512xf32>
    %c0_5 = arith.constant 0 : index
    %c0_6 = arith.constant 0 : index
    %8 = vector.load %arg4[%c0_5, %c0_6] : memref<64x32xbf16, #tpu.memory_space<vmem>>, vector<64x32xbf16>
    %9 = arith.truncf %7 : vector<32x512xf32> to vector<32x512xbf16>
    %cst_7 = arith.constant dense<0.000000e+00> : vector<64x512xf32>
    %10 = tpu.matmul %8, %9, %cst_7 {dimension_numbers = #tpu.dot_dimension_numbers<[1], [0], [0], [1], [0, 0, 1, 1], [], []>} : vector<64x32xbf16>, vector<32x512xbf16>, vector<64x512xf32> -> vector<64x512xf32>
    %cst_8 = arith.constant 0.176776692 : f32
    %11 = vector.broadcast %cst_8 : f32 to vector<64x512xf32>
    %12 = arith.mulf %10, %11 : vector<64x512xf32>
    %cst_9 = arith.constant dense<0xFF800000> : vector<512xf32>
    %13 = vector.multi_reduction <maximumf>, %12, %cst_9 [0] : vector<64x512xf32> to vector<512xf32>
    %14 = vector.shape_cast %13 : vector<512xf32> to vector<1x512xf32>
    %15 = vector.broadcast %14 : vector<1x512xf32> to vector<64x512xf32>
    %16 = arith.subf %12, %15 : vector<64x512xf32>
    %17 = math.exp %16 : vector<64x512xf32>
    %cst_10 = arith.constant dense<0.000000e+00> : vector<512xf32>
    %18 = vector.multi_reduction <add>, %17, %cst_10 [0] : vector<64x512xf32> to vector<512xf32>
    %19 = vector.shape_cast %18 : vector<512xf32> to vector<1x512xf32>
    %20 = vector.broadcast %19 : vector<1x512xf32> to vector<64x512xf32>
    %21 = arith.divf %17, %20 : vector<64x512xf32>
    %22 = tpu.iota {dimensions = array<i32: 0>} : vector<64x512xi32>
    %23 = vector.broadcast %14 : vector<1x512xf32> to vector<64x512xf32>
    %24 = arith.cmpf oge, %12, %23 : vector<64x512xf32>
    %25 = arith.sitofp %22 : vector<64x512xi32> to vector<64x512xf32>
    %cst_11 = arith.constant 6.400000e+01 : f32
    %26 = vector.broadcast %cst_11 : f32 to vector<64x512xf32>
    %27 = arith.select %24, %25, %26 : vector<64x512xi1>, vector<64x512xf32>
    %cst_12 = arith.constant dense<0x7F800000> : vector<512xf32>
    %28 = vector.multi_reduction <minimumf>, %27, %cst_12 [0] : vector<64x512xf32> to vector<512xf32>
    %29 = vector.shape_cast %28 : vector<512xf32> to vector<1x512xf32>
    %30 = arith.fptosi %29 : vector<1x512xf32> to vector<1x512xi32>
    %c0_13 = arith.constant 0 : index
    %c0_14 = arith.constant 0 : index
    %c0_15 = arith.constant 0 : index
    %31 = vector.load %arg9[%c0_13, %c0_14, %c0_15] : memref<1x1x512xi32, #tpu.memory_space<vmem>>, vector<1x1x512xi32>
    %32 = vector.shape_cast %31 : vector<1x1x512xi32> to vector<1x512xi32>
    %33 = vector.shape_cast %30 : vector<1x512xi32> to vector<1x1x512xi32>
    tpu.vector_store %arg9[%c0_13, %c0_14, %c0_15], %33 {strides = array<i32>} : memref<1x1x512xi32, #tpu.memory_space<vmem>>, vector<1x1x512xi32>,
    %c0_16 = arith.constant 0 : index
    %c0_17 = arith.constant 0 : index
    %34 = vector.load %arg5[%c0_16, %c0_17] : memref<32x64xbf16, #tpu.memory_space<vmem>>, vector<32x64xbf16>
    %35 = arith.truncf %21 : vector<64x512xf32> to vector<64x512xbf16>
    %cst_18 = arith.constant dense<0.000000e+00> : vector<32x512xf32>
    %36 = tpu.matmul %34, %35, %cst_18 {dimension_numbers = #tpu.dot_dimension_numbers<[1], [0], [0], [1], [0, 0, 1, 1], [], []>} : vector<32x64xbf16>, vector<64x512xbf16>, vector<32x512xf32> -> vector<32x512xf32>
    %37 = arith.subf %36, %7 : vector<32x512xf32>
    %38 = arith.mulf %37, %37 : vector<32x512xf32>
    %cst_19 = arith.constant dense<0.000000e+00> : vector<512xf32>
    %39 = vector.multi_reduction <add>, %38, %cst_19 [0] : vector<32x512xf32> to vector<512xf32>
    %40 = vector.shape_cast %39 : vector<512xf32> to vector<1x512xf32>
    %41 = vector.broadcast %30 : vector<1x512xi32> to vector<64x512xi32>
    %42 = arith.cmpi eq, %22, %41 : vector<64x512xi32>
    %c0_20 = arith.constant 0 : index
    %c0_21 = arith.constant 0 : index
    %43 = vector.load %arg6[%c0_20, %c0_21] : memref<64x1xf32, #tpu.memory_space<vmem>>, vector<64x1xf32>
    %cst_22 = arith.constant 0.000000e+00 : f32
    %44 = vector.shape_cast %43 : vector<64x1xf32> to vector<64x1xf32>
    %45 = vector.broadcast %44 : vector<64x1xf32> to vector<64x512xf32>
    %46 = vector.broadcast %cst_22 : f32 to vector<64x512xf32>
    %47 = arith.select %42, %45, %46 : vector<64x512xi1>, vector<64x512xf32>
    %cst_23 = arith.constant dense<0.000000e+00> : vector<512xf32>
    %48 = vector.multi_reduction <add>, %47, %cst_23 [0] : vector<64x512xf32> to vector<512xf32>
    %49 = vector.shape_cast %48 : vector<512xf32> to vector<1x512xf32>
    %50 = arith.mulf %7, %7 : vector<32x512xf32>
    %cst_24 = arith.constant dense<0.000000e+00> : vector<512xf32>
    %51 = vector.multi_reduction <add>, %50, %cst_24 [0] : vector<32x512xf32> to vector<512xf32>
    %52 = vector.shape_cast %51 : vector<512xf32> to vector<1x512xf32>
    %cst_25 = arith.constant 11.3137083 : f32
    %53 = vector.broadcast %cst_25 : f32 to vector<1x512xf32>
    %54 = arith.mulf %53, %14 : vector<1x512xf32>
    %55 = arith.subf %49, %54 : vector<1x512xf32>
    %56 = arith.addf %55, %52 : vector<1x512xf32>
    %cst_26 = arith.constant 1.000000e+02 : f32
    %57 = vector.broadcast %cst_26 : f32 to vector<64x512xf32>
    %58 = arith.mulf %16, %57 : vector<64x512xf32>
    %59 = math.exp %58 : vector<64x512xf32>
    %cst_27 = arith.constant dense<0.000000e+00> : vector<512xf32>
    %60 = vector.multi_reduction <add>, %59, %cst_27 [0] : vector<64x512xf32> to vector<512xf32>
    %61 = vector.shape_cast %60 : vector<512xf32> to vector<1x512xf32>
    %62 = vector.broadcast %61 : vector<1x512xf32> to vector<64x512xf32>
    %63 = arith.divf %59, %62 : vector<64x512xf32>
    %64 = math.log %61 : vector<1x512xf32>
    %65 = vector.broadcast %64 : vector<1x512xf32> to vector<64x512xf32>
    %66 = arith.subf %58, %65 : vector<64x512xf32>
    %67 = arith.mulf %63, %66 : vector<64x512xf32>
    %cst_28 = arith.constant dense<0.000000e+00> : vector<512xf32>
    %68 = vector.multi_reduction <add>, %67, %cst_28 [0] : vector<64x512xf32> to vector<512xf32>
    %69 = vector.shape_cast %68 : vector<512xf32> to vector<1x512xf32>
    %cst_29 = arith.constant 0.000000e+00 : f32
    %70 = vector.broadcast %cst_29 : f32 to vector<1x512xf32>
    %71 = arith.subf %70, %69 : vector<1x512xf32>
    %c0_30 = arith.constant 0 : index
    %c0_31 = arith.constant 0 : index
    %c0_32 = arith.constant 0 : index
    %72 = vector.load %arg7[%c0_30, %c0_31, %c0_32] : memref<1x2x512xf32, #tpu.memory_space<vmem>>, vector<1x2x512xf32>
    %73 = vector.shape_cast %72 : vector<1x2x512xf32> to vector<2x512xf32>
    %74 = vector.extract_strided_slice %73 {offsets = [0, 0], sizes = [1, 512], strides = [1, 1]} : vector<2x512xf32> to vector<1x512xf32>
    %75 = vector.extract_strided_slice %73 {offsets = [1, 0], sizes = [1, 512], strides = [1, 1]} : vector<2x512xf32> to vector<1x512xf32>
    %76 = arith.mulf %71, %74 : vector<1x512xf32>
    %cst_33 = arith.constant dense<0.000000e+00> : vector<1xf32>
    %77 = vector.multi_reduction <add>, %76, %cst_33 [1] : vector<1x512xf32> to vector<1xf32>
    %78 = vector.shape_cast %77 : vector<1xf32> to vector<1x1xf32>
    %79 = vector.broadcast %74 : vector<1x512xf32> to vector<64x512xf32>
    %80 = arith.mulf %63, %79 : vector<64x512xf32>
    %cst_34 = arith.constant dense<0.000000e+00> : vector<64xf32>
    %81 = vector.multi_reduction <add>, %80, %cst_34 [1] : vector<64x512xf32> to vector<64xf32>
    %82 = vector.shape_cast %81 : vector<64xf32> to vector<64x1xf32>
    %cst_35 = arith.constant 9.99999974E-6 : f32
    %83 = vector.broadcast %cst_35 : f32 to vector<64x1xf32>
    %84 = arith.addf %82, %83 : vector<64x1xf32>
    %85 = math.log %84 : vector<64x1xf32>
    %86 = arith.mulf %82, %85 : vector<64x1xf32>
    %cst_36 = arith.constant dense<0.000000e+00> : vector<1xf32>
    %87 = vector.multi_reduction <add>, %86, %cst_36 [0] : vector<64x1xf32> to vector<1xf32>
    %88 = vector.shape_cast %87 : vector<1xf32> to vector<1x1xf32>
    %cst_37 = arith.constant 0.000000e+00 : f32
    %89 = vector.broadcast %cst_37 : f32 to vector<1x1xf32>
    %90 = arith.subf %89, %88 : vector<1x1xf32>
    %cst_38 = arith.constant 1.000000e+00 : f32
    %91 = vector.broadcast %cst_38 : f32 to vector<1x1xf32>
    %92 = arith.mulf %91, %78 : vector<1x1xf32>
    %cst_39 = arith.constant 1.000000e+00 : f32
    %93 = vector.broadcast %cst_39 : f32 to vector<1x1xf32>
    %94 = arith.mulf %93, %90 : vector<1x1xf32>
    %95 = arith.subf %92, %94 : vector<1x1xf32>
    %cst_40 = arith.constant 1.250000e+00 : f32
    %96 = vector.broadcast %cst_40 : f32 to vector<1x512xf32>
    %97 = arith.mulf %96, %56 : vector<1x512xf32>
    %98 = arith.addf %40, %97 : vector<1x512xf32>
    %99 = arith.mulf %98, %75 : vector<1x512xf32>
    %cst_41 = arith.constant dense<0.000000e+00> : vector<1xf32>
    %100 = vector.multi_reduction <add>, %99, %cst_41 [1] : vector<1x512xf32> to vector<1xf32>
    %101 = vector.shape_cast %100 : vector<1xf32> to vector<1x1xf32>
    %102 = tpu.iota {dimensions = array<i32: 1>} : vector<1x128xi32>
    %c0_i32_42 = arith.constant 0 : i32
    %103 = vector.broadcast %c0_i32_42 : i32 to vector<1x128xi32>
    %104 = arith.cmpi eq, %102, %103 : vector<1x128xi32>
    %cst_43 = arith.constant 0.000000e+00 : f32
    %105 = vector.shape_cast %95 : vector<1x1xf32> to vector<1x1xf32>
    %106 = vector.broadcast %105 : vector<1x1xf32> to vector<1x128xf32>
    %107 = vector.broadcast %cst_43 : f32 to vector<1x128xf32>
    %108 = arith.select %104, %106, %107 : vector<1x128xi1>, vector<1x128xf32>
    %c1_i32 = arith.constant 1 : i32
    %109 = vector.broadcast %c1_i32 : i32 to vector<1x128xi32>
    %110 = arith.cmpi eq, %102, %109 : vector<1x128xi32>
    %cst_44 = arith.constant 0.000000e+00 : f32
    %111 = vector.shape_cast %101 : vector<1x1xf32> to vector<1x1xf32>
    %112 = vector.broadcast %111 : vector<1x1xf32> to vector<1x128xf32>
    %113 = vector.broadcast %cst_44 : f32 to vector<1x128xf32>
    %114 = arith.select %110, %112, %113 : vector<1x128xi1>, vector<1x128xf32>
    %115 = arith.addf %108, %114 : vector<1x128xf32>
    %c2_i32 = arith.constant 2 : i32
    %116 = vector.broadcast %c2_i32 : i32 to vector<1x128xi32>
    %117 = arith.cmpi eq, %102, %116 : vector<1x128xi32>
    %cst_45 = arith.constant 0.000000e+00 : f32
    %118 = vector.shape_cast %78 : vector<1x1xf32> to vector<1x1xf32>
    %119 = vector.broadcast %118 : vector<1x1xf32> to vector<1x128xf32>
    %120 = vector.broadcast %cst_45 : f32 to vector<1x128xf32>
    %121 = arith.select %117, %119, %120 : vector<1x128xi1>, vector<1x128xf32>
    %122 = arith.addf %115, %121 : vector<1x128xf32>
    %c3_i32 = arith.constant 3 : i32
    %123 = vector.broadcast %c3_i32 : i32 to vector<1x128xi32>
    %124 = arith.cmpi eq, %102, %123 : vector<1x128xi32>
    %cst_46 = arith.constant 0.000000e+00 : f32
    %125 = vector.shape_cast %90 : vector<1x1xf32> to vector<1x1xf32>
    %126 = vector.broadcast %125 : vector<1x1xf32> to vector<1x128xf32>
    %127 = vector.broadcast %cst_46 : f32 to vector<1x128xf32>
    %128 = arith.select %124, %126, %127 : vector<1x128xi1>, vector<1x128xf32>
    %129 = arith.addf %122, %128 : vector<1x128xf32>
    %c0_47 = arith.constant 0 : index
    %c0_48 = arith.constant 0 : index
    %c0_49 = arith.constant 0 : index
    %130 = vector.load %arg10[%c0_47, %c0_48, %c0_49] : memref<1x1x128xf32, #tpu.memory_space<vmem>>, vector<1x1x128xf32>
    %131 = vector.shape_cast %130 : vector<1x1x128xf32> to vector<1x128xf32>
    %132 = vector.shape_cast %129 : vector<1x128xf32> to vector<1x1x128xf32>
    tpu.vector_store %arg10[%c0_47, %c0_48, %c0_49], %132 {strides = array<i32>} : memref<1x1x128xf32, #tpu.memory_space<vmem>>, vector<1x1x128xf32>,
    %133 = arith.truncf %36 : vector<32x512xf32> to vector<32x512xbf16>
    %c0_50 = arith.constant 0 : index
    %c0_51 = arith.constant 0 : index
    %c0_52 = arith.constant 0 : index
    %134 = vector.load %arg3[%c0_50, %c0_51, %c0_52] : memref<1x512x512xbf16, #tpu.memory_space<vmem>>, vector<1x512x512xbf16>
    %135 = vector.shape_cast %134 : vector<1x512x512xbf16> to vector<512x512xbf16>
    %cst_53 = arith.constant dense<0.000000e+00> : vector<32x512xf32>
    %136 = tpu.matmul %133, %135, %cst_53 {dimension_numbers = #tpu.dot_dimension_numbers<[1], [0], [0], [1], [0, 0, 1, 1], [], []>} : vector<32x512xbf16>, vector<512x512xbf16>, vector<32x512xf32> -> vector<32x512xf32>
    %137 = arith.subf %3, %136 : vector<32x512xf32>
    %c0_54 = arith.constant 0 : index
    %c0_55 = arith.constant 0 : index
    %138 = vector.load %arg11[%c0_54, %c0_55] : memref<32x512xf32, #tpu.memory_space<vmem>>, vector<32x512xf32>
    tpu.vector_store %arg11[%c0_54, %c0_55], %137 {strides = array<i32>} : memref<32x512xf32, #tpu.memory_space<vmem>>, vector<32x512xf32>,
    %c0_56 = arith.constant 0 : index
    %c0_57 = arith.constant 0 : index
    %139 = vector.load %arg8[%c0_56, %c0_57] : memref<32x512xf32, #tpu.memory_space<vmem>>, vector<32x512xf32>
    %140 = arith.addf %139, %136 : vector<32x512xf32>
    %c0_58 = arith.constant 0 : index
    %c0_59 = arith.constant 0 : index
    %141 = vector.load %arg8[%c0_58, %c0_59] : memref<32x512xf32, #tpu.memory_space<vmem>>, vector<32x512xf32>
    tpu.vector_store %arg8[%c0_58, %c0_59], %140 {strides = array<i32>} : memref<32x512xf32, #tpu.memory_space<vmem>>, vector<32x512xf32>,
    return
  }
  func.func @transform_0(%arg0: i32) -> (i32, i32) {
    %c0_i32 = arith.constant 0 : i32
    %c0_i32_0 = arith.constant 0 : i32
    %c0_i32_1 = arith.constant 0 : i32
    return %c0_i32, %c0_i32_0 : i32, i32
  }
  func.func @transform_1(%arg0: i32) -> (i32, i32, i32) {
    %c0_i32 = arith.constant 0 : i32
    %c0_i32_0 = arith.constant 0 : i32
    %c0_i32_1 = arith.constant 0 : i32
    return %arg0, %c0_i32, %c0_i32_0 : i32, i32, i32
  }
  func.func @transform_2(%arg0: i32) -> (i32, i32, i32) {
    %c0_i32 = arith.constant 0 : i32
    %c0_i32_0 = arith.constant 0 : i32
    %c0_i32_1 = arith.constant 0 : i32
    return %arg0, %c0_i32, %c0_i32_0 : i32, i32, i32
  }
  func.func @transform_3(%arg0: i32) -> (i32, i32) {
    %c0_i32 = arith.constant 0 : i32
    %c0_i32_0 = arith.constant 0 : i32
    %c0_i32_1 = arith.constant 0 : i32
    return %c0_i32, %c0_i32_0 : i32, i32
  }
  func.func @transform_4(%arg0: i32) -> (i32, i32) {
    %c0_i32 = arith.constant 0 : i32
    %c0_i32_0 = arith.constant 0 : i32
    %c0_i32_1 = arith.constant 0 : i32
    return %c0_i32, %c0_i32_0 : i32, i32
  }
  func.func @transform_5(%arg0: i32) -> (i32, i32) {
    %c0_i32 = arith.constant 0 : i32
    %c0_i32_0 = arith.constant 0 : i32
    %c0_i32_1 = arith.constant 0 : i32
    return %c0_i32, %c0_i32_0 : i32, i32
  }
  func.func @transform_6(%arg0: i32) -> (i32, i32, i32) {
    %c0_i32 = arith.constant 0 : i32
    %c0_i32_0 = arith.constant 0 : i32
    %c0_i32_1 = arith.constant 0 : i32
    return %arg0, %c0_i32, %c0_i32_0 : i32, i32, i32
  }
  func.func @transform_7(%arg0: i32) -> (i32, i32) {
    %c0_i32 = arith.constant 0 : i32
    %c0_i32_0 = arith.constant 0 : i32
    %c0_i32_1 = arith.constant 0 : i32
    return %c0_i32, %c0_i32_0 : i32, i32
  }
  func.func @transform_8(%arg0: i32) -> (i32, i32, i32) {
    %c0_i32 = arith.constant 0 : i32
    %c0_i32_0 = arith.constant 0 : i32
    %c0_i32_1 = arith.constant 0 : i32
    return %arg0, %c0_i32, %c0_i32_0 : i32, i32, i32
  }
  func.func @transform_9(%arg0: i32) -> (i32, i32, i32) {
    %c0_i32 = arith.constant 0 : i32
    %c0_i32_0 = arith.constant 0 : i32
    %c0_i32_1 = arith.constant 0 : i32
    return %arg0, %c0_i32, %c0_i32_0 : i32, i32, i32
  }
}

</mosaic_0001>

<bundles_post_ra>
// kernel: tpu_custom_call.1
= control target key start
LH: loop header
LB: loop body
LE: loop exit
PB: predicated region body
PF: predicated region fallthrough
CT: control target
= control target key end

     0   :  { %s7936_s0 = inlined_call_operand.hbm [shape: f32[32,512], index: 0, kind: input, shape index: {}]   ;;  %s7937_s1 = inlined_call_operand.hbm [shape: bf16[5,512,512], index: 1, kind: input, shape index: {}]   ;;  %s7938_s2 = inlined_call_operand.hbm [shape: bf16[5,512,512], index: 2, kind: input, shape index: {}]   ;;  %s7939_s3 = inlined_call_operand.vmem [shape: bf16[64,32], index: 3, kind: input, shape index: {}]   ;;  %s7940_s4 = inlined_call_operand.hbm [shape: bf16[32,64], index: 4, kind: input, shape index: {}]   ;;  %s7941_s5 = inlined_call_operand.vmem [shape: f32[64,1], index: 5, kind: input, shape index: {}]   ;;  %s7942_s6 = inlined_call_operand.hbm [shape: f32[5,2,512], index: 6, kind: input, shape index: {}]   ;;  %s7943_s7 = inlined_call_operand.hbm [shape: f32[32,512], index: 7, kind: output, shape index: {0}]   ;;  %s7944_s8 = inlined_call_operand.hbm [shape: s32[5,1,512], index: 8, kind: output, shape index: {1}]   ;;  %s7945_s9 = inlined_call_operand.hbm [shape: f32[5,1,128], index: 9, kind: output, shape index: {2}]  }
   0x1   :  { %8108 = sst [smem:[#allocation137_spill]] %s7936_s0 }
   0x2   :  { %8109 = sst [smem:[#allocation138_spill]] %s7937_s1 }
   0x3   :  { %8110 = sst [smem:[#allocation139_spill]] %s7939_s3 }
   0x4   :  { %8111 = sst [smem:[#allocation140_spill]] %s7941_s5 }
   0x5   :  { %8112 = sst [smem:[#allocation141_spill]] %s7943_s7 }
   0x6   :  { %8113 = sst [smem:[#allocation142_spill]] %s7944_s8 }
   0x7   :  { %8114 = sst [smem:[#allocation143_spill]] %s7945_s9 }
   0x8   :  { %15 = vsyncpa [#allocation4], 0 }
   0x9   :  { %16 = vsyncpa [#allocation7], 0 }
   0xa   :  { %18 = vsyncpa [#allocation7 + $0x1], 0 }
   0xb   :  { %19 = vsyncpa [#allocation10], 0 }
   0xc   :  { %20 = vsyncpa [#allocation5], 0 }
   0xd   :  { %21 = vsyncpa [#allocation14], 0 }
   0xe   :  { %23 = vsyncpa [#allocation14 + $0x1], 0  ;;  %s5782_s30 = smov 0   ;;  %s5784_s10 = smov 0  }
   0xf   :  { %s5786_s11 = smov 0   ;;  %s5788_s12 = smov 0  }
  0x10 LB: > { %s5801_s13 = sadd.s32 4294967295, %s5711_s12   ;;  %s7949_s14 = sadd.s32 4294967294, %s5711_s12   ;;  %s5711_s12 = sphi %s5788_s12, %s8427_s12   ;;  %s5707_s11 = sphi %s5786_s11, %s8431_s11   ;;  %s5703_s10 = sphi %s5784_s10, %s8430_s10   ;;  %s5699_s30 = sphi %s5782_s30, %s8429_s30  }
  0x11   : > { %p70_p0 = scmp.ne.s32.totalorder %s5703_s10, %s5699_s30  ;;  %p7946_p1 = scmp.eq.s32.totalorder %s5801_s13, 0 }
  0x12   : > { %p236_p3 = scmp.eq.s32.totalorder %s7949_s14, 4  ;;  %p4405_p5 = scmp.ge.s32.totalorder %s5711_s12, 1 }
  0x13   : > { %p5811_p4 = por %p7946_p1, %p70_p0  ;;  %p269_p7 = scmp.lt.s32.totalorder %s5711_s12, 6 }
  0x14   : > { %p5816_p6 = por %p236_p3, %p70_p0  ;;  %s5713_s18 = smov [#allocation3]  }
  0x15   : > { %s8115_s15 = scalar_select %p5811_p4, 1, 0 }
  0x16   : > { %s8116_s16 = scalar_select %p5816_p6, 1, 0 }
  0x17   : > { %p5822_p9 = pnand %p4405_p5, %p269_p7  ;;  %s281_s19 = sshll.u32 %s5713_s18, 4  ;;  %s282_s19 = int_to_ptr.vmem [resolvable:$true] %s281_s19 }
  0x18   : > { %8117 = sst [smem:[#allocation22_spill]] %s8116_s16  ;;  %s5835_s21 = sadd.s32 1, %s5711_s12  }
  0x19   : > { %s8118_s17 = scalar_select %p5822_p9, 1, 0 }
  0x1a   : > { %p4774_p10 = pneg %p5822_p9  ;;  %8120 = sst [smem:[#allocation23_spill]] %s5835_s21 }
  0x1b   : > { %s57_s22 = sadd.s32 1, %s5707_s11  ;;  %s54_s23 = ssub.s32 %s5711_s12, %s5835_s21 }
  0x1c   : > { %p5830_p11 = pnand %p4774_p10, %p7946_p1  ;;  %s8121_s0 = sld [smem:[#allocation137_spill]] }
  0x1e   : > { %s8119_s20 = scalar_select %p5830_p11, 1, 0 }
  0x1f   : > { %p7955_p13 = pneg %p5830_p11 }
  0x22   : > { %s5429_s26 = scalar_lea.hbm %s8121_s0, 2048 }
  0x23   : > { %p5430_p12 = scmp.ne.s32.totalorder %s8121_s0, %s5429_s26  ;;  %p5436_p5 = scmp.lt.u32.totalorder %s5429_s26, %s8121_s0 }
  0x25   : > { %p5432_p0 = pnand %p7955_p13, %p5430_p12 }
  0x27   : > { %p5433_p3 = pneg %p5432_p0 }
  0x29   : > { %p5438_p7 = pnand %p5436_p5, %p5433_p3 }
  0x2b   : > { %5441 = shalt.err (!%p5438_p7)
}
  0x2c   : > { %s5442_s18 = scalar_lea.vmem %s282_s19, 2048  ;;  %p5450_p2 = scmp.lt.s32.totalorder %s282_s19, %s282_s19 }
  0x2d   : > { %p5443_p10 = scmp.ne.s32.totalorder %s282_s19, %s5442_s18  ;;  %p5451_p6 = scmp.lt.s32.totalorder %s5442_s18, %s5442_s18 }
  0x2f   : > { %p5445_p8 = pnand %p5443_p10, %p7955_p13  ;;  %p5452_p4 = por %p5451_p6, %p5450_p2 }
  0x31   : > { %p5446_p1 = pneg %p5445_p8 }
  0x33   : > { %p5453_p9 = pnand %p5452_p4, %p5446_p1 }
  0x35   : > { %5456 = shalt.err (!%p5453_p9)
}
  0x36   : > { %s5714_s24 = smov 512   ;;  %s5715_s25 = smov 32  }
  0x37   : > { %4777 = dma.hbm_to_vmem [thread:$0]  (!%p5830_p11), %s8121_s0, 2048, %s282_s19, [#allocation4], %s5714_s24, %s5714_s24, %s5715_s25  }
  0x38   : > { %p55_p1 = scmp.eq.s32.totalorder %s54_s23, 0  ;;  %p64_p2 = scmp.ne.s32.totalorder %s5707_s11, %s5703_s10 }
  0x39   : > { %p65_p4 = scmp.eq.s32.totalorder %s5711_s12, 0  ;;  %p4800_p6 = scmp.lt.s32.totalorder %s5711_s12, 5 }
  0x3a   : > { %s5867_s28 = scalar_select %p55_p1, %s5707_s11, %s57_s22  }
  0x3b   : > { %p66_p8 = por %p65_p4, %p64_p2  ;;  %p8123_p9 = scmp.eq.s32.totalorder %s5801_s13, 4 }
  0x3c   : > { %8122 = sst [smem:[#allocation24_spill]] %s5867_s28  ;;  %s7954_s30 = sand.u32 1, %s5711_s12  }
  0x3d   : > { %p5871_p12 = por %p8123_p9, %p64_p2  ;;  %s7950_s18 = sand.u32 1, %s5707_s11  }
  0x3e   : > { %s5879_s14 = sshll.u32 %s7950_s18, 10  ;;  %s7951_s19 = sshll.u32 %s5711_s12, 14 }
  0x3f   : > { %s8124_s29 = scalar_select %p5871_p12, 1, 0 }
  0x40   : > { %s8126_s1 = sld [smem:[#allocation138_spill]]  ;;  %s318_s22 = scalar_lea.vmem [#allocation6], %s5879_s14 }
  0x41   : > { %8125 = sst [smem:[#allocation25_spill]] %s8124_s29  ;;  %s325_s26 = sshll.u32 %s318_s22, 4  ;;  %s5890_s26 = int_to_ptr.vmem [resolvable:$true] %s325_s26 }
  0x42   : > { %p5892_p0 = pnand %p4800_p6, %p66_p8  ;;  %s5898_s18 = scalar_lea.sflag [#allocation7], %s7954_s30 }
  0x44   : > { %s8127_s27 = scalar_select %p5892_p0, 1, 0 }
  0x45   : > { %p5904_p5 = pneg %p5892_p0 }
  0x46   : > { %s5887_s25 = scalar_lea.hbm %s8126_s1, %s7951_s19  ;;  %s5462_s19 = scalar_lea.hbm %s8126_s1, 81920 }
  0x47   : > { %s5457_s0 = scalar_lea.hbm %s5887_s25, 16384  ;;  %p5463_p1 = scmp.lt.u32.totalorder %s5887_s25, %s8126_s1 }
  0x48   : > { %p5458_p3 = scmp.ne.s32.totalorder %s5887_s25, %s5457_s0  ;;  %p5464_p2 = scmp.lt.u32.totalorder %s5462_s19, %s5457_s0 }
  0x49   : > { %s8128_s23 = scalar_select %p5904_p5, 1, 0 }
  0x4a   : > { %p5460_p7 = pnand %p5904_p5, %p5458_p3  ;;  %p5465_p4 = por %p5464_p2, %p5463_p1 }
  0x4b   : > { %p5466_p6 = scmp.lt.u32.totalorder %s5457_s0, %s5887_s25 }
  0x4c   : > { %p5461_p10 = pneg %p5460_p7 }
  0x4d   : > { %p5467_p8 = por %p5466_p6, %p5465_p4 }
  0x4f   : > { %p5468_p9 = pnand %p5467_p8, %p5461_p10 }
  0x51   : > { %5471 = shalt.err (!%p5468_p9)
}
  0x52   : > { %s5472_s30 = scalar_lea.vmem %s5890_s26, 16384  ;;  %s5716_s24 = smov [#allocation6]  }
  0x53   : > { %p5473_p3 = scmp.ne.s32.totalorder %s5890_s26, %s5472_s30  ;;  %s5477_s22 = sshll.u32 %s5716_s24, 4  ;;  %s5478_s22 = int_to_ptr.vmem [resolvable:$false] %s5477_s22 }
  0x54   : > { %s5479_s21 = scalar_lea.vmem %s5478_s22, 32768  ;;  %p5480_p12 = scmp.lt.s32.totalorder %s5890_s26, %s5478_s22 }
  0x55   : > { %p5475_p7 = pnand %p5473_p3, %p5904_p5  ;;  %p5481_p11 = scmp.lt.s32.totalorder %s5479_s21, %s5472_s30 }
  0x57   : > { %p5476_p13 = pneg %p5475_p7  ;;  %p5482_p1 = por %p5481_p11, %p5480_p12 }
  0x59   : > { %p5483_p2 = pnand %p5482_p1, %p5476_p13 }
  0x5b   : > { %5486 = shalt.err (!%p5483_p2)
}
  0x5c   : > { %s5717_s0 = smov 256   ;;  %s5718_s28 = smov 16  }
  0x5d   : > { %4784 = dma.hbm_to_vmem [thread:$0]  (!%p5892_p0), %s5887_s25, 16384, %s5890_s26, %s5898_s18, %s5717_s0, %s5717_s0, %s5718_s28  }
  0x5e   : > { %s8129_s19 = sshll.u32 %s5711_s12, 14  ;;  %s339_s21 = scalar_lea.vmem [#allocation8], %s5879_s14 }
  0x5f   : > { %s5936_s22 = scalar_lea.hbm %s7938_s2, %s8129_s19  ;;  %s346_s1 = sshll.u32 %s339_s21, 4  ;;  %s5939_s1 = int_to_ptr.vmem [resolvable:$true] %s346_s1 }
  0x60   : > { %s5719_s16 = smov [#allocation9]   ;;  %s5487_s29 = scalar_lea.hbm %s7940_s4, 256 }
  0x61   : > { %s297_s7 = sshll.u32 %s5719_s16, 4  ;;  %p5488_p11 = scmp.ne.s32.totalorder %s7940_s4, %s5487_s29  ;;  %s298_s7 = int_to_ptr.vmem [resolvable:$true] %s297_s7 }
  0x62   : > { %p8130_p13 = scmp.ne.s32.totalorder %s8119_s20, 0  ;;  %p5494_p6 = scmp.lt.u32.totalorder %s5487_s29, %s7940_s4 }
  0x64   : > { %p8131_p12 = pneg %p8130_p13 }
  0x66   : > { %p5490_p10 = pnand %p5488_p11, %p8131_p12 }
  0x68   : > { %p5491_p4 = pneg %p5490_p10 }
  0x6a   : > { %p5496_p8 = pnand %p5494_p6, %p5491_p4 }
  0x6c   : > { %5499 = shalt.err (!%p5496_p8)
}
  0x6d   : > { %s5500_s16 = scalar_lea.vmem %s298_s7, 256  ;;  %p8132_p3 = pmov %p8131_p12 }
  0x6e   : > { %p5501_p9 = scmp.ne.s32.totalorder %s298_s7, %s5500_s16  ;;  %p5508_p2 = scmp.lt.s32.totalorder %s298_s7, %s298_s7 }
  0x6f   : > { %p5509_p0 = scmp.lt.s32.totalorder %s5500_s16, %s5500_s16 }
  0x70   : > { %p5503_p7 = pnand %p5501_p9, %p8132_p3 }
  0x71   : > { %p5510_p5 = por %p5509_p0, %p5508_p2 }
  0x72   : > { %p5504_p1 = pneg %p5503_p7 }
  0x74   : > { %p5511_p11 = pnand %p5510_p5, %p5504_p1 }
  0x76   : > { %5514 = shalt.err (!%p5511_p11)
}
  0x77   : > { %s5720_s3 = smov 64   ;;  %s5721_s5 = smov 4  }
  0x78   : > { %4780 = dma.hbm_to_vmem [thread:$0]  (!%p8130_p13), %s7940_s4, 256, %s298_s7, [#allocation10], %s5720_s3, %s5720_s3, %s5721_s5  }
  0x79   : > { %s5515_s29 = scalar_lea.hbm %s5936_s22, 16384  ;;  %p8133_p10 = scmp.ne.s32.totalorder %s8128_s23, 0 }
  0x7a   : > { %p5516_p12 = scmp.ne.s32.totalorder %s5936_s22, %s5515_s29  ;;  %s5520_s24 = scalar_lea.hbm %s7938_s2, 81920 }
  0x7b   : > { %p5521_p5 = scmp.lt.u32.totalorder %s5936_s22, %s7938_s2  ;;  %p5522_p6 = scmp.lt.u32.totalorder %s5520_s24, %s5515_s29 }
  0x7c   : > { %p5518_p4 = pnand %p5516_p12, %p8133_p10  ;;  %p5524_p9 = scmp.lt.u32.totalorder %s5515_s29, %s5936_s22 }
  0x7d   : > { %p5523_p8 = por %p5522_p6, %p5521_p5 }
  0x7e   : > { %p5519_p0 = pneg %p5518_p4 }
  0x7f   : > { %p5525_p3 = por %p5524_p9, %p5523_p8 }
  0x81   : > { %p5526_p7 = pnand %p5525_p3, %p5519_p0 }
  0x83   : > { %5529 = shalt.err (!%p5526_p7)
}
  0x84   : > { %s5530_s7 = scalar_lea.vmem %s5939_s1, 16384  ;;  %s5722_s20 = smov [#allocation8]  }
  0x85   : > { %p5531_p13 = scmp.ne.s32.totalorder %s5939_s1, %s5530_s7  ;;  %s5535_s25 = sshll.u32 %s5722_s20, 4  ;;  %s5536_s25 = int_to_ptr.vmem [resolvable:$false] %s5535_s25 }
  0x86   : > { %s5537_s14 = scalar_lea.vmem %s5536_s25, 32768  ;;  %p5538_p11 = scmp.lt.s32.totalorder %s5939_s1, %s5536_s25 }
  0x87   : > { %p5533_p1 = pnand %p5531_p13, %p8133_p10  ;;  %p5539_p12 = scmp.lt.s32.totalorder %s5537_s14, %s5530_s7 }
  0x89   : > { %p5534_p2 = pneg %p5533_p1  ;;  %p5540_p4 = por %p5539_p12, %p5538_p11 }
  0x8b   : > { %p5541_p5 = pnand %p5540_p4, %p5534_p2 }
  0x8d   : > { %5544 = shalt.err (!%p5541_p5)
}
  0x8e   : > { %p8134_p0 = scmp.ne.s32.totalorder %s8127_s27, 0  ;;  %s8135_s16 = sand.u32 1, %s5707_s11  }
  0x8f   : > { %s4415_s3 = sshll.u32 %s8135_s16, 3  ;;  %s4710_s5 = sshll.u32 %s5711_s12, 7 }
  0x90   : > { %4787 = dma.hbm_to_vmem [thread:$0]  (!%p8134_p0), %s5936_s22, 16384, %s5939_s1, %s5898_s18, %s5717_s0, %s5717_s0, %s5718_s28  }
  0x91   : > { %s5992_s29 = scalar_lea.hbm %s7942_s6, %s4710_s5  ;;  %s360_s26 = scalar_lea.vmem [#allocation11], %s4415_s3 }
  0x92   : > { %s368_s19 = sshll.u32 %s360_s26, 4  ;;  %s8136_s24 = sand.u32 1, %s5711_s12   ;;  %s369_s19 = int_to_ptr.vmem [resolvable:$true] %s368_s19 }
  0x93   : > { %s357_s30 = scalar_lea.sflag [#allocation4], %s8136_s24  ;;  %s5545_s21 = scalar_lea.hbm %s5992_s29, 128 }
  0x94   : > { %p5546_p6 = scmp.ne.s32.totalorder %s5992_s29, %s5545_s21  ;;  %s5550_s0 = scalar_lea.hbm %s7942_s6, 640 }
  0x95   : > { %p5551_p3 = scmp.lt.u32.totalorder %s5992_s29, %s7942_s6  ;;  %p5552_p7 = scmp.lt.u32.totalorder %s5550_s0, %s5545_s21 }
  0x96   : > { %p5548_p8 = pnand %p5546_p6, %p8133_p10  ;;  %p5554_p1 = scmp.lt.u32.totalorder %s5545_s21, %s5992_s29 }
  0x97   : > { %p5553_p13 = por %p5552_p7, %p5551_p3 }
  0x98   : > { %p5549_p9 = pneg %p5548_p8 }
  0x99   : > { %p5555_p2 = por %p5554_p1, %p5553_p13 }
  0x9b   : > { %p5556_p11 = pnand %p5555_p2, %p5549_p9 }
  0x9d   : > { %5559 = shalt.err (!%p5556_p11)
}
  0x9e   : > { %s5560_s7 = scalar_lea.vmem %s369_s19, 128  ;;  %s5723_s20 = smov [#allocation11]  }
  0x9f   : > { %p5561_p12 = scmp.ne.s32.totalorder %s369_s19, %s5560_s7  ;;  %s5565_s25 = sshll.u32 %s5723_s20, 4  ;;  %s5566_s25 = int_to_ptr.vmem [resolvable:$false] %s5565_s25 }
  0xa0   : > { %s5567_s14 = scalar_lea.vmem %s5566_s25, 256  ;;  %p5568_p6 = scmp.lt.s32.totalorder %s369_s19, %s5566_s25 }
  0xa1   : > { %p5563_p4 = pnand %p5561_p12, %p8133_p10  ;;  %p5569_p8 = scmp.lt.s32.totalorder %s5567_s14, %s5560_s7 }
  0xa3   : > { %p5564_p5 = pneg %p5563_p4  ;;  %p5570_p0 = por %p5569_p8, %p5568_p6 }
  0xa5   : > { %p5571_p3 = pnand %p5570_p0, %p5564_p5 }
  0xa7   : > { %5574 = shalt.err (!%p5571_p3)
}
  0xa8   : > { %p8137_p7 = scmp.ne.s32.totalorder %s8127_s27, 0  ;;  %p8138_p9 = scmp.ne.s32.totalorder %s8118_s17, 0 }
  0xaa   : > { %4790 = dma.hbm_to_vmem [thread:$0]  (!%p8137_p7), %s5992_s29, 128, %s369_s19, %s357_s30  }
  0xab   : > { %377 = sbr.rel (%p8138_p9) target bundleno = 1539 (0x603), region = 48 }
  0xb2   : > { %p8139_p13 = scmp.eq.s32.totalorder %s5801_s13, 0 }
  0xb4   : > { %5674 = dma.done.wait (%p8139_p13), [#allocation4], 2048   ;;  %p8140_p10 = pmov %p8139_p13 }
  0xb5   : > { %s6020_s23 = sand.u32 1, %s5801_s13   ;;  %s6023_s16 = sand.u32 1, %s5703_s10  }
  0xb6   : > { %5676 = vsyncadd (%p8140_p10), [#allocation4], 4294965248  ;;  %s4420_s27 = sshll.u32 %s6023_s16, 10  ;;  %s384_s3 = scalar_lea.sflag [#allocation7], %s6020_s23 }
  0xb7   : > { %s6027_s5 = scalar_lea.vmem [#allocation6], %s4420_s27  ;;  %p8141_p0 = scmp.ne.s32.totalorder %s8115_s15, 0 }
  0xb9   : > { %5678 = dma.done.wait (%p8141_p0), %s384_s3, 32768  }
  0xba   : > { %5680 = vsyncadd (%p8141_p0), %s384_s3, 4294934528  ;;  %s6033_s17 = scalar_lea.vmem [#allocation8], %s4420_s27  ;;  %p8142_p1 = pmov %p8140_p10 }
  0xbc   : > { %5682 = dma.done.wait (%p8142_p1), [#allocation10], 256   ;;  %p8143_p2 = pmov %p8142_p1 }
  0xbd   : > { %s4423_s8 = sshll.u32 %s6023_s16, 3  ;;  %s406_s9 = scalar_lea.sflag [#allocation4], %s6020_s23 }
  0xbe   : > { %5684 = vsyncadd (%p8143_p2), [#allocation10], 4294967040  ;;  %s6041_s29 = scalar_lea.vmem [#allocation11], %s4423_s8 }
  0xbf   : > { %5686 = dma.done.wait (%p8141_p0), %s406_s9, 128  }
  0xc0   : > { %5688 = vsyncadd (%p8141_p0), %s406_s9, 4294967168  ;;  %s4424_s26 = sshll.u32 %s6023_s16, 2  ;;  %s457_s24 = scalar_lea.vmem [#allocation15], %s6023_s16 }
  0xc1   : > { %s6048_s19 = scalar_lea.vmem [#allocation13], %s4424_s26  ;;  %p8144_p11 = scmp.ne.s32.totalorder %s5801_s13, 0 }
  0xc2   : > { %v463_v0 = vld [vmem:[#allocation3] sm:$0xff] (!%p8144_p11)  ;;  %v464_v1 = vld [vmem:[#allocation3 + $0x8] sm:$0xff] (!%p8144_p11)  ;;  %v465_v2 = vld [vmem:[#allocation3 + $0x10] sm:$0xff] (!%p8144_p11)  ;;  %v5724_v6 = vmov (!%p8144_p11), 0.0  }
  0xc3   : > { %462 = sbr.rel (%p8144_p11) target bundleno = 211 (0xd3), region = 72  ;;  %479 = vst [vmem:[#allocation2] sm:$0xff] (!%p8144_p11), %v463_v0  ;;  %480 = vst [vmem:[#allocation2 + $0x8] sm:$0xff] (!%p8144_p11), %v464_v1  ;;  %v466_v3 = vld [vmem:[#allocation3 + $0x18] sm:$0xff] (!%p8144_p11)  ;;  %v467_v4 = vld [vmem:[#allocation3 + $0x20] sm:$0xff] (!%p8144_p11) }
  0xc4   : > { %481 = vst [vmem:[#allocation2 + $0x10] sm:$0xff] (!%p8144_p11), %v465_v2  ;;  %v468_v5 = vld [vmem:[#allocation3 + $0x28] sm:$0xff] (!%p8144_p11)  ;;  %495 = vst [vmem:[#allocation12] sm:$0xff] (!%p8144_p11), %v5724_v6  ;;  %v469_v7 = vld [vmem:[#allocation3 + $0x30] sm:$0xff] (!%p8144_p11) }
  0xc5   : > { %496 = vst [vmem:[#allocation12 + $0x8] sm:$0xff] (!%p8144_p11), %v5724_v6  ;;  %497 = vst [vmem:[#allocation12 + $0x10] sm:$0xff] (!%p8144_p11), %v5724_v6  ;;  %v470_v8 = vld [vmem:[#allocation3 + $0x38] sm:$0xff] (!%p8144_p11)  ;;  %v471_v9 = vld [vmem:[#allocation3 + $0x40] sm:$0xff] (!%p8144_p11) }
  0xc6   : > { %498 = vst [vmem:[#allocation12 + $0x18] sm:$0xff] (!%p8144_p11), %v5724_v6  ;;  %499 = vst [vmem:[#allocation12 + $0x20] sm:$0xff] (!%p8144_p11), %v5724_v6  ;;  %v472_v10 = vld [vmem:[#allocation3 + $0x48] sm:$0xff] (!%p8144_p11)  ;;  %v473_v11 = vld [vmem:[#allocation3 + $0x50] sm:$0xff] (!%p8144_p11) }
  0xc7   : > { %500 = vst [vmem:[#allocation12 + $0x28] sm:$0xff] (!%p8144_p11), %v5724_v6  ;;  %501 = vst [vmem:[#allocation12 + $0x30] sm:$0xff] (!%p8144_p11), %v5724_v6  ;;  %v474_v12 = vld [vmem:[#allocation3 + $0x58] sm:$0xff] (!%p8144_p11)  ;;  %v475_v13 = vld [vmem:[#allocation3 + $0x60] sm:$0xff] (!%p8144_p11) }
  0xc8   : > { %502 = vst [vmem:[#allocation12 + $0x38] sm:$0xff] (!%p8144_p11), %v5724_v6  ;;  %503 = vst [vmem:[#allocation12 + $0x40] sm:$0xff] (!%p8144_p11), %v5724_v6  ;;  %v476_v14 = vld [vmem:[#allocation3 + $0x68] sm:$0xff] (!%p8144_p11)  ;;  %v477_v15 = vld [vmem:[#allocation3 + $0x70] sm:$0xff] (!%p8144_p11) }
  0xc9   : > { %504 = vst [vmem:[#allocation12 + $0x48] sm:$0xff] (!%p8144_p11), %v5724_v6  ;;  %505 = vst [vmem:[#allocation12 + $0x50] sm:$0xff] (!%p8144_p11), %v5724_v6  ;;  %v478_v16 = vld [vmem:[#allocation3 + $0x78] sm:$0xff] (!%p8144_p11) }
  0xca   : > { %506 = vst [vmem:[#allocation12 + $0x58] sm:$0xff] %v5724_v6  ;;  %507 = vst [vmem:[#allocation12 + $0x60] sm:$0xff] %v5724_v6 }
  0xcb   : > { %508 = vst [vmem:[#allocation12 + $0x68] sm:$0xff] %v5724_v6  ;;  %509 = vst [vmem:[#allocation12 + $0x70] sm:$0xff] %v5724_v6 }
  0xcc   : > { %510 = vst [vmem:[#allocation12 + $0x78] sm:$0xff] %v5724_v6  ;;  %482 = vst [vmem:[#allocation2 + $0x18] sm:$0xff] %v466_v3 }
  0xcd   : > { %483 = vst [vmem:[#allocation2 + $0x20] sm:$0xff] %v467_v4  ;;  %484 = vst [vmem:[#allocation2 + $0x28] sm:$0xff] %v468_v5 }
  0xce   : > { %485 = vst [vmem:[#allocation2 + $0x30] sm:$0xff] %v469_v7  ;;  %486 = vst [vmem:[#allocation2 + $0x38] sm:$0xff] %v470_v8 }
  0xcf   : > { %487 = vst [vmem:[#allocation2 + $0x40] sm:$0xff] %v471_v9  ;;  %488 = vst [vmem:[#allocation2 + $0x48] sm:$0xff] %v472_v10 }
  0xd0   : > { %489 = vst [vmem:[#allocation2 + $0x50] sm:$0xff] %v473_v11  ;;  %490 = vst [vmem:[#allocation2 + $0x58] sm:$0xff] %v474_v12 }
  0xd1   : > { %491 = vst [vmem:[#allocation2 + $0x60] sm:$0xff] %v475_v13  ;;  %492 = vst [vmem:[#allocation2 + $0x68] sm:$0xff] %v476_v14 }
  0xd2   : > { %493 = vst [vmem:[#allocation2 + $0x70] sm:$0xff] %v477_v15  ;;  %494 = vst [vmem:[#allocation2 + $0x78] sm:$0xff] %v478_v16 }
  0xd3 PF: > { %v4854_v17 = vld [vmem:[%s6027_s5 + $0x4] ss:$16 sps:$4 sm:$0xff]   ;;  %v4856_v18 = vld [vmem:[%s6027_s5 + $0xc] ss:$16 sps:$4 sm:$0xff]   ;;  %v4858_v19 = vld [vmem:[%s6027_s5] ss:$16 sps:$4 sm:$0xff]  }
  0xd4   : > { %1303 = vmatprep.subr.bf16.mxu0 %v4854_v17  ;;  %v4859_v20 = vld [vmem:[%s6027_s5 + $0x8] ss:$16 sps:$4 sm:$0xff]   ;;  %1409 = vmatprep.subr.bf16.mxu1 %v4856_v18  ;;  %v4860_v21 = vld [vmem:[%s6027_s5 + $0x24] ss:$16 sps:$4 sm:$0xff]   ;;  %v4862_v22 = vld [vmem:[%s6027_s5 + $0x2c] ss:$16 sps:$4 sm:$0xff]  }
  0xd5   : > { %1304 = vmatpush1.bf16.msra.mxu0 %v4858_v19  ;;  %1410 = vmatpush1.bf16.msra.mxu1 %v4859_v20  ;;  %v4864_v23 = vld [vmem:[%s6027_s5 + $0x20] ss:$16 sps:$4 sm:$0xff]   ;;  %v4865_v24 = vld [vmem:[%s6027_s5 + $0x28] ss:$16 sps:$4 sm:$0xff]   ;;  %v4866_v25 = vld [vmem:[%s6027_s5 + $0x44] ss:$16 sps:$4 sm:$0xff]  }
  0xd6   : > { %1305 = vmatprep.subr.bf16.mxu0 %v4860_v21  ;;  %1411 = vmatprep.subr.bf16.mxu1 %v4862_v22  ;;  %v4868_v26 = vld [vmem:[%s6027_s5 + $0x4c] ss:$16 sps:$4 sm:$0xff]   ;;  %v4870_v27 = vld [vmem:[%s6027_s5 + $0x40] ss:$16 sps:$4 sm:$0xff]   ;;  %v4871_v28 = vld [vmem:[%s6027_s5 + $0x48] ss:$16 sps:$4 sm:$0xff]  }
  0xd7   : > { %v4872_v29 = vld [vmem:[%s6027_s5 + $0x64] ss:$16 sps:$4 sm:$0xff]   ;;  %v4874_v30 = vld [vmem:[%s6027_s5 + $0x6c] ss:$16 sps:$4 sm:$0xff]   ;;  %v4876_v31 = vld [vmem:[%s6027_s5 + $0x60] ss:$16 sps:$4 sm:$0xff]  }
  0xd8   : > { %v4877_v32 = vld [vmem:[%s6027_s5 + $0x68] ss:$16 sps:$4 sm:$0xff]   ;;  %v4878_v33 = vld [vmem:[%s6027_s5 + $0x84] ss:$16 sps:$4 sm:$0xff]   ;;  %v4880_v34 = vld [vmem:[%s6027_s5 + $0x8c] ss:$16 sps:$4 sm:$0xff]  }
  0xd9   : > { %1306 = vmatpush1.bf16.msra.mxu0 %v4864_v23  ;;  %1412 = vmatpush1.bf16.msra.mxu1 %v4865_v24  ;;  %v4882_v35 = vld [vmem:[%s6027_s5 + $0x80] ss:$16 sps:$4 sm:$0xff]   ;;  %v4883_v36 = vld [vmem:[%s6027_s5 + $0x88] ss:$16 sps:$4 sm:$0xff]   ;;  %v4884_v37 = vld [vmem:[%s6027_s5 + $0xa4] ss:$16 sps:$4 sm:$0xff]  }
  0xda   : > { %1307 = vmatprep.subr.bf16.mxu0 %v4866_v25  ;;  %1413 = vmatprep.subr.bf16.mxu1 %v4868_v26  ;;  %v4886_v38 = vld [vmem:[%s6027_s5 + $0xac] ss:$16 sps:$4 sm:$0xff]   ;;  %v4888_v39 = vld [vmem:[%s6027_s5 + $0xa0] ss:$16 sps:$4 sm:$0xff]   ;;  %v4889_v40 = vld [vmem:[%s6027_s5 + $0xa8] ss:$16 sps:$4 sm:$0xff]  }
  0xdb   : > { %v4890_v41 = vld [vmem:[%s6027_s5 + $0xc4] ss:$16 sps:$4 sm:$0xff]   ;;  %v4892_v42 = vld [vmem:[%s6027_s5 + $0xcc] ss:$16 sps:$4 sm:$0xff]   ;;  %v4894_v43 = vld [vmem:[%s6027_s5 + $0xc0] ss:$16 sps:$4 sm:$0xff]  }
  0xdc   : > { %v4895_v44 = vld [vmem:[%s6027_s5 + $0xc8] ss:$16 sps:$4 sm:$0xff]   ;;  %v4896_v45 = vld [vmem:[%s6027_s5 + $0xe4] ss:$16 sps:$4 sm:$0xff]   ;;  %v4898_v46 = vld [vmem:[%s6027_s5 + $0xec] ss:$16 sps:$4 sm:$0xff]  }
  0xdd   : > { %1308 = vmatpush1.bf16.msra.mxu0 %v4870_v27  ;;  %1414 = vmatpush1.bf16.msra.mxu1 %v4871_v28  ;;  %v4900_v47 = vld [vmem:[%s6027_s5 + $0xe0] ss:$16 sps:$4 sm:$0xff]   ;;  %v4901_v48 = vld [vmem:[%s6027_s5 + $0xe8] ss:$16 sps:$4 sm:$0xff]   ;;  %v4902_v49 = vld [vmem:[%s6027_s5 + $0x104] ss:$16 sps:$4 sm:$0xff]  }
  0xde   : > { %1309 = vmatprep.subr.bf16.mxu0 %v4872_v29  ;;  %1415 = vmatprep.subr.bf16.mxu1 %v4874_v30  ;;  %v4904_v50 = vld [vmem:[%s6027_s5 + $0x10c] ss:$16 sps:$4 sm:$0xff]   ;;  %v4906_v51 = vld [vmem:[%s6027_s5 + $0x100] ss:$16 sps:$4 sm:$0xff]   ;;  %v4907_v52 = vld [vmem:[%s6027_s5 + $0x108] ss:$16 sps:$4 sm:$0xff]  }
  0xdf   : > { %v4908_v53 = vld [vmem:[%s6027_s5 + $0x124] ss:$16 sps:$4 sm:$0xff]   ;;  %v4910_v54 = vld [vmem:[%s6027_s5 + $0x12c] ss:$16 sps:$4 sm:$0xff]   ;;  %v4912_v55 = vld [vmem:[%s6027_s5 + $0x120] ss:$16 sps:$4 sm:$0xff]  }
  0xe0   : > { %v4913_v56 = vld [vmem:[%s6027_s5 + $0x128] ss:$16 sps:$4 sm:$0xff]   ;;  %v4914_v57 = vld [vmem:[%s6027_s5 + $0x144] ss:$16 sps:$4 sm:$0xff]   ;;  %v4916_v58 = vld [vmem:[%s6027_s5 + $0x14c] ss:$16 sps:$4 sm:$0xff]  }
  0xe1   : > { %1310 = vmatpush1.bf16.msra.mxu0 %v4876_v31  ;;  %1416 = vmatpush1.bf16.msra.mxu1 %v4877_v32  ;;  %v4918_v59 = vld [vmem:[%s6027_s5 + $0x140] ss:$16 sps:$4 sm:$0xff]   ;;  %v4919_v60 = vld [vmem:[%s6027_s5 + $0x148] ss:$16 sps:$4 sm:$0xff]   ;;  %v4920_v61 = vld [vmem:[%s6027_s5 + $0x164] ss:$16 sps:$4 sm:$0xff]  }
  0xe2   : > { %1311 = vmatprep.subr.bf16.mxu0 %v4878_v33  ;;  %1417 = vmatprep.subr.bf16.mxu1 %v4880_v34  ;;  %v4922_v62 = vld [vmem:[%s6027_s5 + $0x16c] ss:$16 sps:$4 sm:$0xff]   ;;  %v4924_v1 = vld [vmem:[%s6027_s5 + $0x160] ss:$16 sps:$4 sm:$0xff]   ;;  %v4925_v2 = vld [vmem:[%s6027_s5 + $0x168] ss:$16 sps:$4 sm:$0xff]  }
  0xe3   : > { %v512_v63 = vld [vmem:[#allocation2 + $0x8] sm:$0xff]  ;;  %v4926_v4 = vld [vmem:[%s6027_s5 + $0x184] ss:$16 sps:$4 sm:$0xff]   ;;  %v4930_v6 = vld [vmem:[%s6027_s5 + $0x180] ss:$16 sps:$4 sm:$0xff]   ;;  %s8145_s21 = sld [smem:[#allocation140_spill]] }
  0xe4   : > { %v516_v0 = vld [vmem:[#allocation2 + $0x28] sm:$0xff]  ;;  %v4932_v8 = vld [vmem:[%s6027_s5 + $0x1a4] ss:$16 sps:$4 sm:$0xff]   ;;  %v4936_v10 = vld [vmem:[%s6027_s5 + $0x1a0] ss:$16 sps:$4 sm:$0xff]   ;;  %s8165_s30 = sld [smem:[#allocation139_spill]] }
  0xe5   : > { %1312 = vmatpush1.bf16.msra.mxu0 %v4882_v35  ;;  %1418 = vmatpush1.bf16.msra.mxu1 %v4883_v36  ;;  %v528_v3 = vpack.c.bf16 %v516_v0, %v512_v63  ;;  %v4928_v5 = vld [vmem:[%s6027_s5 + $0x18c] ss:$16 sps:$4 sm:$0xff]   ;;  %v4931_v7 = vld [vmem:[%s6027_s5 + $0x188] ss:$16 sps:$4 sm:$0xff]   ;;  %v4938_v12 = vld [vmem:[%s6027_s5 + $0x1c4] ss:$16 sps:$4 sm:$0xff]  }
  0xe6   : > { %1313 = vmatprep.subr.bf16.mxu0 %v4884_v37  ;;  %1419 = vmatprep.subr.bf16.mxu1 %v4886_v38  ;;  %v4934_v9 = vld [vmem:[%s6027_s5 + $0x1ac] ss:$16 sps:$4 sm:$0xff]   ;;  %v4937_v11 = vld [vmem:[%s6027_s5 + $0x1a8] ss:$16 sps:$4 sm:$0xff]   ;;  %v4942_v14 = vld [vmem:[%s6027_s5 + $0x1c0] ss:$16 sps:$4 sm:$0xff]  }
  0xe7   : > { %1335 = vmatprep.mubr.bf16.mxu0 %v528_v3  ;;  %1441 = vmatprep.mubr.bf16.mxu1 %v528_v3  ;;  %v4940_v13 = vld [vmem:[%s6027_s5 + $0x1cc] ss:$16 sps:$4 sm:$0xff]   ;;  %v4943_v15 = vld [vmem:[%s6027_s5 + $0x1c8] ss:$16 sps:$4 sm:$0xff]   ;;  %v4944_v16 = vld [vmem:[%s6027_s5 + $0x1e4] ss:$16 sps:$4 sm:$0xff]  }
  0xe8   : > { %v4946_v17 = vld [vmem:[%s6027_s5 + $0x1ec] ss:$16 sps:$4 sm:$0xff]   ;;  %v4948_v18 = vld [vmem:[%s6027_s5 + $0x1e0] ss:$16 sps:$4 sm:$0xff]   ;;  %v4949_v19 = vld [vmem:[%s6027_s5 + $0x1e8] ss:$16 sps:$4 sm:$0xff]  }
  0xe9   : > { %1314 = vmatpush1.bf16.msra.mxu0 %v4888_v39  ;;  %1420 = vmatpush1.bf16.msra.mxu1 %v4889_v40  ;;  %v4952_v20 = vld [vmem:[%s6027_s5 + $0x204] ss:$16 sps:$4 sm:$0xff]   ;;  %v4955_v23 = vld [vmem:[%s6027_s5 + $0x20c] ss:$16 sps:$4 sm:$0xff]   ;;  %v4950_v24 = vld [vmem:[%s6027_s5 + $0x200] ss:$16 sps:$4 sm:$0xff]  }
  0xea   : > { %1315 = vmatprep.subr.bf16.mxu0 %v4890_v41  ;;  %1421 = vmatprep.subr.bf16.mxu1 %v4892_v42  ;;  %v511_v21 = vld [vmem:[#allocation2] sm:$0xff]  ;;  %v4953_v25 = vld [vmem:[%s6027_s5 + $0x208] ss:$16 sps:$4 sm:$0xff]   ;;  %v4961_v28 = vld [vmem:[%s6027_s5 + $0x22c] ss:$16 sps:$4 sm:$0xff]   ;;  %s8166_s1 = smov %s8165_s30  ;;  %vm1551_vm0 = vcmask 261120  }
  0xeb   : > { %v515_v22 = vld [vmem:[#allocation2 + $0x20] sm:$0xff]  ;;  %v4959_v30 = vld [vmem:[%s6027_s5 + $0x228] ss:$16 sps:$4 sm:$0xff]   ;;  %v4967_v32 = vld [vmem:[%s6027_s5 + $0x24c] ss:$16 sps:$4 sm:$0xff]   ;;  %s8415_s27 = sld [smem:[#allocation142_spill]] }
  0xec   : > { %v527_v26 = vpack.c.bf16 %v515_v22, %v511_v21  ;;  %v4958_v27 = vld [vmem:[%s6027_s5 + $0x224] ss:$16 sps:$4 sm:$0xff]   ;;  %v4956_v29 = vld [vmem:[%s6027_s5 + $0x220] ss:$16 sps:$4 sm:$0xff]   ;;  %v4965_v34 = vld [vmem:[%s6027_s5 + $0x248] ss:$16 sps:$4 sm:$0xff]  }
  0xed   : > { %1316 = vmatpush1.bf16.msra.mxu0 %v4894_v43  ;;  %1422 = vmatpush1.bf16.msra.mxu1 %v4895_v44  ;;  %v4964_v31 = vld [vmem:[%s6027_s5 + $0x244] ss:$16 sps:$4 sm:$0xff]   ;;  %v4962_v33 = vld [vmem:[%s6027_s5 + $0x240] ss:$16 sps:$4 sm:$0xff]   ;;  %v4973_v36 = vld [vmem:[%s6027_s5 + $0x26c] ss:$16 sps:$4 sm:$0xff]  }
  0xee   : > { %1317 = vmatprep.subr.bf16.mxu0 %v4896_v45  ;;  %1423 = vmatprep.subr.bf16.mxu1 %v4898_v46  ;;  %v4970_v35 = vld [vmem:[%s6027_s5 + $0x264] ss:$16 sps:$4 sm:$0xff]   ;;  %v4968_v37 = vld [vmem:[%s6027_s5 + $0x260] ss:$16 sps:$4 sm:$0xff]   ;;  %v4971_v38 = vld [vmem:[%s6027_s5 + $0x268] ss:$16 sps:$4 sm:$0xff]  }
  0xef   : > { %v4976_v39 = vld [vmem:[%s6027_s5 + $0x284] ss:$16 sps:$4 sm:$0xff]   ;;  %v4979_v40 = vld [vmem:[%s6027_s5 + $0x28c] ss:$16 sps:$4 sm:$0xff]   ;;  %v4974_v41 = vld [vmem:[%s6027_s5 + $0x280] ss:$16 sps:$4 sm:$0xff]  }
  0xf0   : > { %v4977_v42 = vld [vmem:[%s6027_s5 + $0x288] ss:$16 sps:$4 sm:$0xff]   ;;  %v4982_v43 = vld [vmem:[%s6027_s5 + $0x2a4] ss:$16 sps:$4 sm:$0xff]   ;;  %v4985_v44 = vld [vmem:[%s6027_s5 + $0x2ac] ss:$16 sps:$4 sm:$0xff]  }
  0xf1   : > { %1318 = vmatpush1.bf16.msra.mxu0 %v4900_v47  ;;  %1424 = vmatpush1.bf16.msra.mxu1 %v4901_v48  ;;  %v520_v45 = vld [vmem:[#allocation2 + $0x48] sm:$0xff]  ;;  %v519_v48 = vld [vmem:[#allocation2 + $0x40] sm:$0xff]  ;;  %s4190_s8 = scalar_lea.sflag [#allocation14], %s6020_s23  ;;  %s5727_s26 = smov [#allocation13]  }
  0xf2   : > { %1319 = vmatprep.subr.bf16.mxu0 %v4902_v49  ;;  %1425 = vmatprep.subr.bf16.mxu1 %v4904_v50  ;;  %v524_v46 = vld [vmem:[#allocation2 + $0x68] sm:$0xff]  ;;  %v523_v49 = vld [vmem:[#allocation2 + $0x60] sm:$0xff]  ;;  %s5579_s15 = sshll.u32 %s5727_s26, 4  ;;  %s5580_s15 = int_to_ptr.vmem [resolvable:$false] %s5579_s15 }
  0xf3   : > { %v532_v47 = vpack.c.bf16 %v524_v46, %v520_v45  ;;  %v4980_v50 = vld [vmem:[%s6027_s5 + $0x2a0] ss:$16 sps:$4 sm:$0xff]   ;;  %v4995_v63 = vld [vmem:[%s6027_s5 + $0x2e8] ss:$16 sps:$4 sm:$0xff]   ;;  %v5000_v0 = vld [vmem:[%s6027_s5 + $0x304] ss:$16 sps:$4 sm:$0xff]  }
  0xf4   : > { %v5001_v3 = vld [vmem:[%s6027_s5 + $0x308] ss:$16 sps:$4 sm:$0xff]   ;;  %v5033_v21 = vld [vmem:[%s6027_s5 + $0x3ac] ss:$16 sps:$4 sm:$0xff]   ;;  %v5028_v22 = vld [vmem:[%s6027_s5 + $0x3a0] ss:$16 sps:$4 sm:$0xff]  }
  0xf5   : > { %1320 = vmatpush1.bf16.msra.mxu0 %v4906_v51  ;;  %1426 = vmatpush1.bf16.msra.mxu1 %v4907_v52  ;;  %v4983_v51 = vld [vmem:[%s6027_s5 + $0x2a8] ss:$16 sps:$4 sm:$0xff]   ;;  %v531_v52 = vpack.c.bf16 %v523_v49, %v519_v48  ;;  %v2393_v49 = vld [vmem:[%s8145_s21 + $0x30] sm:$0xff] }
  0xf6   : > { %1321 = vmatprep.subr.bf16.mxu0 %v4908_v53  ;;  %1427 = vmatprep.subr.bf16.mxu1 %v4910_v54  ;;  %v4988_v53 = vld [vmem:[%s6027_s5 + $0x2c4] ss:$16 sps:$4 sm:$0xff]   ;;  %v4991_v54 = vld [vmem:[%s6027_s5 + $0x2cc] ss:$16 sps:$4 sm:$0xff]  }
  0xf7   : > { %v2388_v45 = vld [vmem:[%s8145_s21 + $0x8] sm:$0xff]  ;;  %v2394_v48 = vld [vmem:[%s8145_s21 + $0x38] sm:$0xff] }
  0xf8   : > { %v2392_v46 = vld [vmem:[%s8145_s21 + $0x28] sm:$0xff] }
  0xf9   : > { %1322 = vmatpush1.bf16.msra.mxu0 %v4912_v55  ;;  %1428 = vmatpush1.bf16.msra.mxu1 %v4913_v56  ;;  %v4986_v55 = vld [vmem:[%s6027_s5 + $0x2c0] ss:$16 sps:$4 sm:$0xff]   ;;  %v4989_v56 = vld [vmem:[%s6027_s5 + $0x2c8] ss:$16 sps:$4 sm:$0xff]  }
  0xfa   : > { %1323 = vmatprep.subr.bf16.mxu0 %v4914_v57  ;;  %1429 = vmatprep.subr.bf16.mxu1 %v4916_v58  ;;  %v514_v57 = vld [vmem:[#allocation2 + $0x18] sm:$0xff] }
  0xfb   : > { %v518_v58 = vld [vmem:[#allocation2 + $0x38] sm:$0xff] }
  0xfd   : > { %1324 = vmatpush1.bf16.msra.mxu0 %v4918_v59  ;;  %1430 = vmatpush1.bf16.msra.mxu1 %v4919_v60  ;;  %v4994_v59 = vld [vmem:[%s6027_s5 + $0x2e4] ss:$16 sps:$4 sm:$0xff]   ;;  %v4997_v60 = vld [vmem:[%s6027_s5 + $0x2ec] ss:$16 sps:$4 sm:$0xff]  }
  0xfe   : > { %1325 = vmatprep.subr.bf16.mxu0 %v4920_v61  ;;  %1431 = vmatprep.subr.bf16.mxu1 %v4922_v62  ;;  %v530_v61 = vpack.c.bf16 %v518_v58, %v514_v57  ;;  %v4992_v62 = vld [vmem:[%s6027_s5 + $0x2e0] ss:$16 sps:$4 sm:$0xff]  }
 0x101   : > { %1326 = vmatpush1.bf16.msra.mxu0 %v4924_v1  ;;  %1432 = vmatpush1.bf16.msra.mxu1 %v4925_v2  ;;  %v5003_v1 = vld [vmem:[%s6027_s5 + $0x30c] ss:$16 sps:$4 sm:$0xff]   ;;  %v4998_v2 = vld [vmem:[%s6027_s5 + $0x300] ss:$16 sps:$4 sm:$0xff]  }
 0x102   : > { %1327 = vmatprep.subr.bf16.mxu0 %v4926_v4  ;;  %1433 = vmatprep.subr.bf16.mxu1 %v4928_v5  ;;  %v5006_v4 = vld [vmem:[%s6027_s5 + $0x324] ss:$16 sps:$4 sm:$0xff]   ;;  %v5009_v5 = vld [vmem:[%s6027_s5 + $0x32c] ss:$16 sps:$4 sm:$0xff]  }
 0x105   : > { %1328 = vmatpush1.bf16.msra.mxu0 %v4930_v6  ;;  %1434 = vmatpush1.bf16.msra.mxu1 %v4931_v7  ;;  %v5004_v6 = vld [vmem:[%s6027_s5 + $0x320] ss:$16 sps:$4 sm:$0xff]   ;;  %v5007_v7 = vld [vmem:[%s6027_s5 + $0x328] ss:$16 sps:$4 sm:$0xff]  }
 0x106   : > { %1329 = vmatprep.subr.bf16.mxu0 %v4932_v8  ;;  %1435 = vmatprep.subr.bf16.mxu1 %v4934_v9  ;;  %v5012_v8 = vld [vmem:[%s6027_s5 + $0x344] ss:$16 sps:$4 sm:$0xff]   ;;  %v5015_v9 = vld [vmem:[%s6027_s5 + $0x34c] ss:$16 sps:$4 sm:$0xff]  }
 0x109   : > { %1330 = vmatpush1.bf16.msra.mxu0 %v4936_v10  ;;  %1436 = vmatpush1.bf16.msra.mxu1 %v4937_v11  ;;  %v5010_v10 = vld [vmem:[%s6027_s5 + $0x340] ss:$16 sps:$4 sm:$0xff]   ;;  %v5013_v11 = vld [vmem:[%s6027_s5 + $0x348] ss:$16 sps:$4 sm:$0xff]  }
 0x10a   : > { %1331 = vmatprep.subr.bf16.mxu0 %v4938_v12  ;;  %1437 = vmatprep.subr.bf16.mxu1 %v4940_v13  ;;  %v5018_v12 = vld [vmem:[%s6027_s5 + $0x364] ss:$16 sps:$4 sm:$0xff]   ;;  %v5021_v13 = vld [vmem:[%s6027_s5 + $0x36c] ss:$16 sps:$4 sm:$0xff]  }
 0x10d   : > { %1332 = vmatpush1.bf16.msra.mxu0 %v4942_v14  ;;  %1438 = vmatpush1.bf16.msra.mxu1 %v4943_v15  ;;  %v5016_v14 = vld [vmem:[%s6027_s5 + $0x360] ss:$16 sps:$4 sm:$0xff]   ;;  %v5019_v15 = vld [vmem:[%s6027_s5 + $0x368] ss:$16 sps:$4 sm:$0xff]  }
 0x10e   : > { %1333 = vmatprep.subr.bf16.mxu0 %v4944_v16  ;;  %1439 = vmatprep.subr.bf16.mxu1 %v4946_v17  ;;  %v5024_v16 = vld [vmem:[%s6027_s5 + $0x384] ss:$16 sps:$4 sm:$0xff]   ;;  %v5027_v17 = vld [vmem:[%s6027_s5 + $0x38c] ss:$16 sps:$4 sm:$0xff]  }
 0x111   : > { %1334 = vmatpush1.bf16.msra.mxu0 %v4948_v18  ;;  %1440 = vmatpush1.bf16.msra.mxu1 %v4949_v19  ;;  %v5022_v18 = vld [vmem:[%s6027_s5 + $0x380] ss:$16 sps:$4 sm:$0xff]   ;;  %v5025_v19 = vld [vmem:[%s6027_s5 + $0x388] ss:$16 sps:$4 sm:$0xff]  }
 0x112   : > { %1356 = vmatprep.subr.bf16.mxu0 %v4952_v20  ;;  %1462 = vmatprep.subr.bf16.mxu1 %v4955_v23  ;;  %v5030_v20 = vld [vmem:[%s6027_s5 + $0x3a4] ss:$16 sps:$4 sm:$0xff]   ;;  %v5031_v23 = vld [vmem:[%s6027_s5 + $0x3a8] ss:$16 sps:$4 sm:$0xff]  }
 0x114   : > { %1336 = vmatmul.mubr.bf16.vlgmr.msra.gmra.mrb[0].mxu0 %v527_v26  ;;  %1442 = vmatmul.mubr.bf16.vlgmr.msra.gmra.mrb[0].mxu1 %v527_v26  ;;  %v5034_v26 = vld [vmem:[%s6027_s5 + $0x3c0] ss:$16 sps:$4 sm:$0xff]  }
 0x115   : > { %1357 = vmatpush1.bf16.msra.mxu0 %v4950_v24  ;;  %1463 = vmatpush1.bf16.msra.mxu1 %v4953_v25  ;;  %v5036_v24 = vld [vmem:[%s6027_s5 + $0x3c4] ss:$16 sps:$4 sm:$0xff]   ;;  %v5039_v25 = vld [vmem:[%s6027_s5 + $0x3cc] ss:$16 sps:$4 sm:$0xff]  }
 0x116   : > { %1358 = vmatprep.subr.bf16.mxu0 %v4958_v27  ;;  %1464 = vmatprep.subr.bf16.mxu1 %v4961_v28  ;;  %v5037_v27 = vld [vmem:[%s6027_s5 + $0x3c8] ss:$16 sps:$4 sm:$0xff]   ;;  %v5042_v28 = vld [vmem:[%s6027_s5 + $0x3e4] ss:$16 sps:$4 sm:$0xff]  }
 0x117   : > { %1345 = vmatprep.mubr.bf16.mxu0 %v532_v47  ;;  %1451 = vmatprep.mubr.bf16.mxu1 %v532_v47  ;;  %v2391_v47 = vld [vmem:[%s8145_s21 + $0x20] sm:$0xff] }
 0x119   : > { %1359 = vmatpush1.bf16.msra.mxu0 %v4956_v29  ;;  %1465 = vmatpush1.bf16.msra.mxu1 %v4959_v30  ;;  %v5045_v29 = vld [vmem:[%s6027_s5 + $0x3ec] ss:$16 sps:$4 sm:$0xff]   ;;  %v5040_v30 = vld [vmem:[%s6027_s5 + $0x3e0] ss:$16 sps:$4 sm:$0xff]  }
 0x11a   : > { %1360 = vmatprep.subr.bf16.mxu0 %v4964_v31  ;;  %1466 = vmatprep.subr.bf16.mxu1 %v4967_v32  ;;  %v5043_v31 = vld [vmem:[%s6027_s5 + $0x3e8] ss:$16 sps:$4 sm:$0xff]   ;;  %v513_v32 = vld [vmem:[#allocation2 + $0x10] sm:$0xff]  ;;  %s4221_s5 = sshll.u32 %s6048_s19, 4  ;;  %s4222_s5 = int_to_ptr.vmem [resolvable:$true] %s4221_s5 }
 0x11b   : > { %s5575_s9 = scalar_lea.vmem %s4222_s5, 64  ;;  %p5582_p8 = scmp.lt.s32.totalorder %s4222_s5, %s5580_s15 }
 0x11c   : > { %1346 = vmatmul.mubr.bf16.gmra.mrb[4].mxu0 %v531_v52  ;;  %1452 = vmatmul.mubr.bf16.gmra.mrb[4].mxu1 %v531_v52  ;;  %p5576_p12 = scmp.ne.s32.totalorder %s4222_s5, %s5575_s9 }
 0x11d   : > { %1361 = vmatpush1.bf16.msra.mxu0 %v4962_v33  ;;  %1467 = vmatpush1.bf16.msra.mxu1 %v4965_v34  ;;  %v517_v33 = vld [vmem:[#allocation2 + $0x30] sm:$0xff]  ;;  %v522_v34 = vld [vmem:[#allocation2 + $0x58] sm:$0xff] }
 0x11e   : > { %1362 = vmatprep.subr.bf16.mxu0 %v4970_v35  ;;  %1468 = vmatprep.subr.bf16.mxu1 %v4973_v36  ;;  %v526_v35 = vld [vmem:[#allocation2 + $0x78] sm:$0xff]  ;;  %v529_v36 = vpack.c.bf16 %v517_v33, %v513_v32 }
 0x11f   : > { %1388 = vmatprep.mubr.bf16.mxu0 %v530_v61  ;;  %1494 = vmatprep.mubr.bf16.mxu1 %v530_v61 }
 0x121   : > { %1363 = vmatpush1.bf16.msra.mxu0 %v4968_v37  ;;  %1469 = vmatpush1.bf16.msra.mxu1 %v4971_v38  ;;  %v534_v37 = vpack.c.bf16 %v526_v35, %v522_v34  ;;  %v521_v38 = vld [vmem:[#allocation2 + $0x50] sm:$0xff] }
 0x122   : > { %1364 = vmatprep.subr.bf16.mxu0 %v4976_v39  ;;  %1470 = vmatprep.subr.bf16.mxu1 %v4979_v40  ;;  %v525_v39 = vld [vmem:[#allocation2 + $0x70] sm:$0xff] }
 0x123   : > { %v533_v40 = vpack.c.bf16 %v525_v39, %v521_v38  ;;  %v5047_v39 = vld [vmem:[%s8166_s1 + $0x8] sm:$0xff]  }
 0x125   : > { %1365 = vmatpush1.bf16.msra.mxu0 %v4974_v41  ;;  %1471 = vmatpush1.bf16.msra.mxu1 %v4977_v42  ;;  %v7971_v41 = vmov 0   ;;  %v2389_v42 = vld [vmem:[%s8145_s21 + $0x10] sm:$0xff] }
 0x126   : > { %1366 = vmatprep.subr.bf16.mxu0 %v4982_v43  ;;  %1472 = vmatprep.subr.bf16.mxu1 %v4985_v44  ;;  %v2387_v43 = vld [vmem:[%s8145_s21] sm:$0xff]  ;;  %v2390_v44 = vld [vmem:[%s8145_s21 + $0x18] sm:$0xff] }
 0x127   : > { %4853 = vset.pattern.permute.xlu1 %v7971_v41  ;;  %4852 = vset.pattern.permute.xlu0 %v7971_v41 }
 0x128   : > { %2407 = vperm.xlu1 %4853, %v2389_v42   ;;  %2397 = vperm.xlu0 %4852, %v2387_v43   ;;  %v5049_v42 = vld [vmem:[%s8166_s1 + $0x18] sm:$0xff]  }
 0x129   : > { %1367 = vmatpush1.bf16.msra.mxu0 %v4980_v50  ;;  %1473 = vmatpush1.bf16.msra.mxu1 %v4983_v51 }
 0x12a   : > { %1368 = vmatprep.subr.bf16.mxu0 %v4988_v53  ;;  %1474 = vmatprep.subr.bf16.mxu1 %v4991_v54 }
 0x12c   : > { %2412 = vperm.xlu1 %4853, %v2390_v44   ;;  %2402 = vperm.xlu0 %4852, %v2388_v45  }
 0x12d   : > { %1369 = vmatpush1.bf16.msra.mxu0 %v4986_v55  ;;  %1475 = vmatpush1.bf16.msra.mxu1 %v4989_v56 }
 0x12e   : > { %1370 = vmatprep.subr.bf16.mxu0 %v4994_v59  ;;  %1476 = vmatprep.subr.bf16.mxu1 %v4997_v60 }
 0x130   : > { %2422 = vperm.xlu1 %4853, %v2392_v46   ;;  %2417 = vperm.xlu0 %4852, %v2391_v47  }
 0x131   : > { %1371 = vmatpush1.bf16.msra.mxu0 %v4992_v62  ;;  %1477 = vmatpush1.bf16.msra.mxu1 %v4995_v63 }
 0x132   : > { %1372 = vmatprep.subr.bf16.mxu0 %v5000_v0  ;;  %1478 = vmatprep.subr.bf16.mxu1 %v5003_v1 }
 0x134   : > { %2432 = vperm.xlu1 %4853, %v2394_v48   ;;  %2427 = vperm.xlu0 %4852, %v2393_v49  }
 0x135   : > { %1373 = vmatpush1.bf16.msra.mxu0 %v4998_v2  ;;  %1479 = vmatpush1.bf16.msra.mxu1 %v5001_v3 }
 0x136   : > { %1374 = vmatprep.subr.bf16.mxu0 %v5006_v4  ;;  %1480 = vmatprep.subr.bf16.mxu1 %v5009_v5 }
 0x139   : > { %1375 = vmatpush1.bf16.msra.mxu0 %v5004_v6  ;;  %1481 = vmatpush1.bf16.msra.mxu1 %v5007_v7 }
 0x13a   : > { %1376 = vmatprep.subr.bf16.mxu0 %v5012_v8  ;;  %1482 = vmatprep.subr.bf16.mxu1 %v5015_v9 }
 0x13d   : > { %1377 = vmatpush1.bf16.msra.mxu0 %v5010_v10  ;;  %1483 = vmatpush1.bf16.msra.mxu1 %v5013_v11 }
 0x13e   : > { %1378 = vmatprep.subr.bf16.mxu0 %v5018_v12  ;;  %1484 = vmatprep.subr.bf16.mxu1 %v5021_v13 }
 0x141   : > { %1379 = vmatpush1.bf16.msra.mxu0 %v5016_v14  ;;  %1485 = vmatpush1.bf16.msra.mxu1 %v5019_v15 }
 0x142   : > { %1380 = vmatprep.subr.bf16.mxu0 %v5024_v16  ;;  %1486 = vmatprep.subr.bf16.mxu1 %v5027_v17 }
 0x145   : > { %1381 = vmatpush1.bf16.msra.mxu0 %v5022_v18  ;;  %1487 = vmatpush1.bf16.msra.mxu1 %v5025_v19 }
 0x146   : > { %1382 = vmatprep.subr.bf16.mxu0 %v5030_v20  ;;  %1488 = vmatprep.subr.bf16.mxu1 %v5033_v21 }
 0x149   : > { %1383 = vmatpush1.bf16.msra.mxu0 %v5028_v22  ;;  %1489 = vmatpush1.bf16.msra.mxu1 %v5031_v23 }
 0x14a   : > { %1384 = vmatprep.subr.bf16.mxu0 %v5036_v24  ;;  %1490 = vmatprep.subr.bf16.mxu1 %v5039_v25 }
 0x14d   : > { %1385 = vmatpush1.bf16.msra.mxu0 %v5034_v26  ;;  %1491 = vmatpush1.bf16.msra.mxu1 %v5037_v27 }
 0x14e   : > { %1386 = vmatprep.subr.bf16.mxu0 %v5042_v28  ;;  %1492 = vmatprep.subr.bf16.mxu1 %v5045_v29 }
 0x151   : > { %1387 = vmatpush1.bf16.msra.mxu0 %v5040_v30  ;;  %1493 = vmatpush1.bf16.msra.mxu1 %v5043_v31 }
 0x154   : > { %1389 = vmatmul.mubr.bf16.vlgmr.msra.gmra.mrb[0].mxu0 %v529_v36  ;;  %1495 = vmatmul.mubr.bf16.vlgmr.msra.gmra.mrb[0].mxu1 %v529_v36 }
 0x155   : > { %1398 = vmatprep.mubr.bf16.mxu0 %v534_v37  ;;  %1504 = vmatprep.mubr.bf16.mxu1 %v534_v37  ;;  %v5046_v37 = vld [vmem:[%s8165_s30] sm:$0xff]   ;;  %s5581_s30 = scalar_lea.vmem %s5580_s15, 128 }
 0x156   : > { %p5583_p3 = scmp.lt.s32.totalorder %s5581_s30, %s5575_s9 }
 0x158   : > { %p5584_p7 = por %p5583_p3, %p5582_p8 }
 0x15c   : > { %1399 = vmatmul.mubr.bf16.gmra.mrb[4].mxu0 %v533_v40  ;;  %1505 = vmatmul.mubr.bf16.gmra.mrb[4].mxu1 %v533_v40  ;;  %v5048_v40 = vld [vmem:[%s8166_s1 + $0x10] sm:$0xff]  }
 0x15d   : > { %1596 = vmatprep.mubr.bf16.mxu0 %v7971_v41  ;;  %1669 = vmatprep.mubr.bf16.mxu1 %v7971_v41 }
 0x227   : > { %v6209_v50 = vpop.f32.mrb[0].mxu0  ;;  %v6211_v51 = vpop.f32.mrb[0].mxu1 }
 0x228   : > { %8146 = vst [vmem:[#allocation26_spill] sm:$0xff] %v6209_v50  ;;  %8147 = vst [vmem:[#allocation27_spill] sm:$0xff] %v6211_v51  ;;  %v6213_v52 = vpop.f32.mrb[1].mxu0  ;;  %v6215_v53 = vpop.f32.mrb[1].mxu1  ;;  %v2519_v54 = vmul.f32 %v6209_v50, %v6209_v50  ;;  %v2521_v55 = vmul.f32 %v6211_v51, %v6211_v51 }
 0x229   : > { %8148 = vst [vmem:[#allocation28_spill] sm:$0xff] %v6213_v52  ;;  %8149 = vst [vmem:[#allocation29_spill] sm:$0xff] %v6215_v53  ;;  %v2520_v56 = vmul.f32 %v6213_v52, %v6213_v52  ;;  %v2522_v57 = vmul.f32 %v6215_v53, %v6215_v53  ;;  %v6225_v58 = vpop.f32.mrb[2].mxu0  ;;  %v6227_v59 = vpop.f32.mrb[2].mxu1 }
 0x22a   : > { %8150 = vst [vmem:[#allocation30_spill] sm:$0xff] %v6225_v58  ;;  %8151 = vst [vmem:[#allocation31_spill] sm:$0xff] %v6227_v59  ;;  %v1523_v60 = vpack.c.bf16 %v6225_v58, %v6209_v50  ;;  %v2523_v61 = vmul.f32 %v6225_v58, %v6225_v58  ;;  %v1525_v62 = vpack.c.bf16 %v6227_v59, %v6211_v51  ;;  %v6237_v0 = vpop.f32.mrb[3].mxu0  ;;  %v6239_v1 = vpop.f32.mrb[3].mxu1 }
 0x22b   : > { %v2525_v63 = vmul.f32 %v6227_v59, %v6227_v59  ;;  %8152 = vst [vmem:[#allocation32_spill] sm:$0xff] %v6237_v0  ;;  %8153 = vst [vmem:[#allocation33_spill] sm:$0xff] %v6239_v1  ;;  %v1524_v2 = vpack.c.bf16 %v6237_v0, %v6213_v52  ;;  %v2524_v3 = vmul.f32 %v6237_v0, %v6237_v0 }
 0x22c   : > { %v1526_v4 = vpack.c.bf16 %v6239_v1, %v6215_v53  ;;  %v2526_v5 = vmul.f32 %v6239_v1, %v6239_v1  ;;  %v2535_v6 = vadd.f32 %v2523_v61, %v2519_v54 }
 0x22d   : > { %v2553_v7 = vadd.f32 %v2525_v63, %v2521_v55  ;;  %v2544_v8 = vadd.f32 %v2524_v3, %v2520_v56  ;;  %1564 = vmatprep.subr.bf16.mxu0 %v1524_v2 }
 0x22e   : > { %v2562_v9 = vadd.f32 %v2526_v5, %v2522_v57  ;;  %1637 = vmatprep.subr.bf16.mxu1 %v1526_v4  ;;  %1565 = vmatpush1.bf16.msra.mxu0 %v1523_v60 }
 0x22f   : > { %1638 = vmatpush1.bf16.msra.mxu1 %v1525_v62  ;;  %v6249_v10 = vpop.f32.mrb[4].mxu0  ;;  %v6251_v11 = vpop.f32.mrb[4].mxu1 }
 0x230   : > { %8154 = vst [vmem:[#allocation34_spill] sm:$0xff] %v6249_v10  ;;  %8155 = vst [vmem:[#allocation35_spill] sm:$0xff] %v6251_v11  ;;  %v2527_v12 = vmul.f32 %v6249_v10, %v6249_v10  ;;  %v2529_v13 = vmul.f32 %v6251_v11, %v6251_v11  ;;  %v6257_v14 = vpop.f32.mrb[5].mxu0  ;;  %v6259_v15 = vpop.f32.mrb[5].mxu1 }
 0x231   : > { %8156 = vst [vmem:[#allocation36_spill] sm:$0xff] %v6257_v14  ;;  %8157 = vst [vmem:[#allocation37_spill] sm:$0xff] %v6259_v15  ;;  %v2528_v16 = vmul.f32 %v6257_v14, %v6257_v14  ;;  %v2530_v17 = vmul.f32 %v6259_v15, %v6259_v15  ;;  %v6265_v18 = vpop.f32.mrb[6].mxu0  ;;  %v6267_v19 = vpop.f32.mrb[6].mxu1 }
 0x232   : > { %8158 = vst [vmem:[#allocation38_spill] sm:$0xff] %v6265_v18  ;;  %8159 = vst [vmem:[#allocation39_spill] sm:$0xff] %v6267_v19  ;;  %v2536_v20 = vadd.f32 %v2535_v6, %v2527_v12  ;;  %v2554_v21 = vadd.f32 %v2553_v7, %v2529_v13  ;;  %v1527_v22 = vpack.c.bf16 %v6265_v18, %v6249_v10  ;;  %v6273_v24 = vpop.f32.mrb[7].mxu0  ;;  %v6275_v25 = vpop.f32.mrb[7].mxu1 }
 0x233   : > { %v2531_v23 = vmul.f32 %v6265_v18, %v6265_v18  ;;  %8160 = vst [vmem:[#allocation40_spill] sm:$0xff] %v6273_v24  ;;  %8161 = vst [vmem:[#allocation41_spill] sm:$0xff] %v6275_v25  ;;  %v2545_v26 = vadd.f32 %v2544_v8, %v2528_v16  ;;  %v2563_v27 = vadd.f32 %v2562_v9, %v2530_v17 }
 0x234   : > { %v1529_v28 = vpack.c.bf16 %v6267_v19, %v6251_v11  ;;  %v2533_v29 = vmul.f32 %v6267_v19, %v6267_v19  ;;  %v1528_v31 = vpack.c.bf16 %v6273_v24, %v6257_v14  ;;  %v2532_v32 = vmul.f32 %v6273_v24, %v6273_v24 }
 0x235   : > { %v6281_v30 = vadd.f32 %v2536_v20, %v2531_v23  ;;  %v1530_v33 = vpack.c.bf16 %v6275_v25, %v6259_v15  ;;  %v2534_v35 = vmul.f32 %v6275_v25, %v6275_v25 }
 0x236   : > { %v6289_v34 = vadd.f32 %v2554_v21, %v2533_v29  ;;  %v6293_v36 = vadd.f32 %v2545_v26, %v2532_v32  ;;  %1566 = vmatprep.subr.bf16.mxu0 %v1528_v31 }
 0x237   : > { %8162 = vst [vmem:[#allocation42_spill] sm:$0xff] %v6281_v30  ;;  %1639 = vmatprep.subr.bf16.mxu1 %v1530_v33  ;;  %v6298_v38 = vadd.f32 %v2563_v27, %v2534_v35  ;;  %1567 = vmatpush1.bf16.msra.mxu0 %v1527_v22 }
 0x238   : > { %8163 = vst [vmem:[#allocation43_spill] sm:$0xff] %v6289_v34  ;;  %8164 = vst [vmem:[#allocation44_spill] sm:$0xff] %v6293_v36  ;;  %1640 = vmatpush1.bf16.msra.mxu1 %v1529_v28 }
 0x239   : > { %8167 = vst [vmem:[#allocation45_spill] sm:$0xff] %v6298_v38 }
 0x23a   : > { %4558 = vmatmul.mubr.msk.bf16.vlgmr.msra.gmra.mrb[8].mxu0 %vm1551_vm0, %v5046_v37 }
 0x23b   : > { %4562 = vmatmul.mubr.msk.bf16.vlgmr.msra.gmra.mrb[8].mxu1 %vm1551_vm0, %v5046_v37  ;;  %1606 = vmatprep.mubr.bf16.mxu0 %v7971_v41 }
 0x23c   : > { %1679 = vmatprep.mubr.bf16.mxu1 %v7971_v41 }
 0x242   : > { %4559 = vmatmul.mubr.msk.bf16.gmra.mrb[12].mxu0 %vm1551_vm0, %v5047_v39 }
 0x243   : > { %4563 = vmatmul.mubr.msk.bf16.gmra.mrb[12].mxu1 %vm1551_vm0, %v5047_v39  ;;  %1616 = vmatprep.mubr.bf16.mxu0 %v7971_v41 }
 0x244   : > { %1689 = vmatprep.mubr.bf16.mxu1 %v7971_v41 }
 0x24a   : > { %4560 = vmatmul.mubr.msk.bf16.gmra.mrb[16].mxu0 %vm1551_vm0, %v5048_v40 }
 0x24b   : > { %4564 = vmatmul.mubr.msk.bf16.gmra.mrb[16].mxu1 %vm1551_vm0, %v5048_v40  ;;  %1626 = vmatprep.mubr.bf16.mxu0 %v7971_v41 }
 0x24c   : > { %1699 = vmatprep.mubr.bf16.mxu1 %v7971_v41 }
 0x252   : > { %4561 = vmatmul.mubr.msk.bf16.gmra.mrb[20].mxu0 %vm1551_vm0, %v5049_v42 }
 0x253   : > { %4565 = vmatmul.mubr.msk.bf16.gmra.mrb[20].mxu1 %vm1551_vm0, %v5049_v42  ;;  %2213 = vmatprep.mubr.bf16.mxu0 %v7971_v41 }
 0x254   : > { %2266 = vmatprep.mubr.bf16.mxu1 %v7971_v41 }
 0x30d   : > { %v1598_v43 = vpop.f32.mrb[8].mxu0 }
 0x30e   : > { %v1671_v44 = vpop.f32.mrb[8].mxu1  ;;  %v6325_v45 = vpop.f32.mrb[9].mxu0  ;;  %v6331_v48 = vmul.f32 0.17677669, %v1598_v43 }
 0x30f   : > { %v6327_v46 = vmul.f32 0.17677669, %v1671_v44  ;;  %v6329_v47 = vpop.f32.mrb[9].mxu1  ;;  %v1602_v49 = vpop.f32.mrb[10].mxu0 }
 0x310   : > { %v1675_v54 = vpop.f32.mrb[10].mxu1  ;;  %v6333_v55 = vmul.f32 0.17677669, %v1602_v49  ;;  %v6335_v56 = vpop.f32.mrb[11].mxu0 }
 0x311   : > { %v6337_v57 = vmul.f32 0.17677669, %v1675_v54  ;;  %v6339_v60 = vpop.f32.mrb[11].mxu1  ;;  %v6463_v1 = vmul.f32 0.17677669, %v6335_v56 }
 0x312   : > { %v1742_v61 = vmax.f32 %v6331_v48, %v6333_v55  ;;  %v6478_v56 = vmul.f32 0.17677669, %v6325_v45  ;;  %v6509_v34 = vmul.f32 0.17677669, %v6339_v60 }
 0x313   : > { %v1768_v62 = vmax.f32 %v6327_v46, %v6337_v57 }
 0x314   : > { %v1755_v45 = vmax.f32 %v6478_v56, %v6463_v1 }
 0x315   : > { %v1608_v63 = vpop.f32.mrb[12].mxu0 }
 0x316   : > { %v1681_v2 = vpop.f32.mrb[12].mxu1  ;;  %v6345_v3 = vmul.f32 0.17677669, %v1608_v63  ;;  %v6347_v4 = vpop.f32.mrb[13].mxu0 }
 0x317   : > { %v6349_v5 = vmul.f32 0.17677669, %v1681_v2  ;;  %v6351_v6 = vpop.f32.mrb[13].mxu1  ;;  %v1612_v7 = vpop.f32.mrb[14].mxu0  ;;  %v6481_v50 = vmul.f32 0.17677669, %v6347_v4 }
 0x318   : > { %v1685_v8 = vpop.f32.mrb[14].mxu1  ;;  %v1743_v9 = vmax.f32 %v1742_v61, %v6345_v3  ;;  %v6354_v12 = vmul.f32 0.17677669, %v1612_v7  ;;  %v6356_v13 = vpop.f32.mrb[15].mxu0 }
 0x319   : > { %v1769_v16 = vmax.f32 %v1768_v62, %v6349_v5  ;;  %v6359_v17 = vmul.f32 0.17677669, %v1685_v8  ;;  %v6361_v20 = vpop.f32.mrb[15].mxu1  ;;  %v1756_v38 = vmax.f32 %v1755_v45, %v6481_v50  ;;  %v6506_v36 = vmul.f32 0.17677669, %v6356_v13 }
 0x31a   : > { %v1744_v21 = vmax.f32 %v1743_v9, %v6354_v12 }
 0x31b   : > { %v1770_v22 = vmax.f32 %v1769_v16, %v6359_v17 }
 0x31d   : > { %v1618_v23 = vpop.f32.mrb[16].mxu0 }
 0x31e   : > { %v1691_v26 = vpop.f32.mrb[16].mxu1  ;;  %v6365_v27 = vmul.f32 0.17677669, %v1618_v23  ;;  %v6367_v28 = vpop.f32.mrb[17].mxu0 }
 0x31f   : > { %v6369_v29 = vmul.f32 0.17677669, %v1691_v26  ;;  %v6371_v31 = vpop.f32.mrb[17].mxu1  ;;  %v1622_v32 = vpop.f32.mrb[18].mxu0 }
 0x320   : > { %v1695_v33 = vpop.f32.mrb[18].mxu1  ;;  %v1745_v35 = vmax.f32 %v1744_v21, %v6365_v27  ;;  %v6374_v37 = vmul.f32 0.17677669, %v1622_v32  ;;  %v6376_v39 = vpop.f32.mrb[19].mxu0 }
 0x321   : > { %v1771_v40 = vmax.f32 %v1770_v22, %v6369_v29  ;;  %v6379_v42 = vmul.f32 0.17677669, %v1695_v33  ;;  %v6381_v43 = vpop.f32.mrb[19].mxu1 }
 0x322   : > { %v1746_v44 = vmax.f32 %v1745_v35, %v6374_v37 }
 0x323   : > { %v1772_v49 = vmax.f32 %v1771_v40, %v6379_v42 }
 0x325   : > { %v1628_v54 = vpop.f32.mrb[20].mxu0 }
 0x326   : > { %v1701_v61 = vpop.f32.mrb[20].mxu1  ;;  %v6385_v62 = vmul.f32 0.17677669, %v1628_v54  ;;  %v6389_v2 = vpop.f32.mrb[21].mxu0  ;;  %v7976_v54 = vlaneseq }
 0x327   : > { %v6387_v63 = vmul.f32 0.17677669, %v1701_v61  ;;  %v6391_v7 = vpop.f32.mrb[21].mxu1  ;;  %v1632_v8 = vpop.f32.mrb[22].mxu0 }
 0x328   : > { %v1705_v9 = vpop.f32.mrb[22].mxu1  ;;  %v1747_v16 = vmax.f32 %v1746_v44, %v6385_v62  ;;  %v6395_v22 = vmul.f32 0.17677669, %v1632_v8  ;;  %v6399_v26 = vpop.f32.mrb[23].mxu0  ;;  %v6406_v44 = vshrl.u32 %v7976_v54, 7 }
 0x329   : > { %v1773_v21 = vmax.f32 %v1772_v49, %v6387_v63  ;;  %v6397_v23 = vmul.f32 0.17677669, %v1705_v9  ;;  %v6401_v32 = vpop.f32.mrb[23].mxu1 }
 0x32a   : > { %v1748_v33 = vmax.f32 %v1747_v16, %v6395_v22  ;;  %8168 = vst [vmem:[#allocation46_spill] sm:$0xff] %v6406_v44  ;;  %v6409_v19 = vadd.s32 8, %v6406_v44  ;;  %v6412_v15 = vadd.s32 16, %v6406_v44  ;;  %v6415_v16 = vadd.s32 24, %v6406_v44 }
 0x32b   : > { %v1774_v35 = vmax.f32 %v1773_v21, %v6397_v23  ;;  %v6418_v21 = vadd.s32 32, %v6406_v44  ;;  %v6423_v54 = vadd.s32 40, %v6406_v44 }
 0x32c   : > { %v1749_v40 = vrot.slane %v1748_v33, 4  ;;  %8169 = vst [vmem:[#allocation47_spill] sm:$0xff] %v6409_v19  ;;  %8170 = vst [vmem:[#allocation48_spill] sm:$0xff] %v6412_v15  ;;  %v6447_v11 = vcvt.s32.f32 %v6409_v19  ;;  %v6454_v18 = vcvt.s32.f32 %v6412_v15  ;;  %v6457_v14 = vcvt.s32.f32 %v6415_v16 }
 0x32d   : > { %v1775_v41 = vrot.slane %v1774_v35, 4  ;;  %8171 = vst [vmem:[#allocation49_spill] sm:$0xff] %v6415_v16  ;;  %8172 = vst [vmem:[#allocation50_spill] sm:$0xff] %v6418_v21  ;;  %v6460_v10 = vcvt.s32.f32 %v6418_v21  ;;  %v6475_v52 = vcvt.s32.f32 %v6423_v54 }
 0x32e   : > { %v1750_v61 = vmax.f32 %v1748_v33, %v1749_v40  ;;  %8174 = vst [vmem:[#allocation52_spill] sm:$0xff] %v6423_v54  ;;  %v6519_v54 = vmul.f32 0.17677669, %v6367_v28 }
 0x32f   : > { %v1776_v8 = vmax.f32 %v1774_v35, %v1775_v41  ;;  %v6426_v41 = vadd.s32 48, %v6406_v44  ;;  %v6432_v35 = vcvt.s32.f32 %v6406_v44 }
 0x330   : > { %v1751_v25 = vrot.slane %v1750_v61, 2 }
 0x331   : > { %v1777_v40 = vrot.slane %v1776_v8, 2  ;;  %8175 = vst [vmem:[#allocation53_spill] sm:$0xff] %v6426_v41  ;;  %v6522_v13 = vcvt.s32.f32 %v6426_v41  ;;  %v6579_v41 = vmul.f32 0.17677669, %v6389_v2 }
 0x332   : > { %v1752_v49 = vmax.f32 %v1750_v61, %v1751_v25  ;;  %v6429_v25 = vadd.s32 56, %v6406_v44 }
 0x333   : > { %v1778_v51 = vmax.f32 %v1776_v8, %v1777_v40  ;;  %v6486_v8 = vmul.f32 0.17677669, %v6329_v47 }
 0x334   : > { %v1753_v9 = vrot.slane %v1752_v49, 1  ;;  %8176 = vst [vmem:[#allocation54_spill] sm:$0xff] %v6429_v25 }
 0x335   : > { %v1781_v28 = vmax.f32 %v6486_v8, %v6509_v34 }
 0x336   : > { %v6420_v33 = vmax.f32 %v1752_v49, %v1753_v9 }
 0x338   : > { %8173 = vst [vmem:[#allocation51_spill] sm:$0xff] %v6420_v33  ;;  %v6436_v61 = vsub.f32 %v6331_v48, %v6420_v33  ;;  %v6440_v49 = vsub.f32 %v6333_v55, %v6420_v33  ;;  %v6444_v9 = vsub.f32 %v6345_v3, %v6420_v33  ;;  %v6451_v24 = vsub.f32 %v6354_v12, %v6420_v33 }
 0x339   : > { %v6469_v0 = vsub.f32 %v6365_v27, %v6420_v33  ;;  %vm1987_vm1 = vcmp.ge.f32.partialorder %v6331_v48, %v6420_v33  ;;  %vm1991_vm2 = vcmp.ge.f32.partialorder %v6333_v55, %v6420_v33  ;;  %v6490_v40 = vsub.f32 %v6374_v37, %v6420_v33 }
 0x33a   : > { %v1826_v59 = vmul.f32 1.442695, %v6436_v61  ;;  %v1834_v53 = vmul.f32 1.442695, %v6440_v49  ;;  %v1842_v58 = vmul.f32 1.442695, %v6444_v9  ;;  %v6497_v4 = vsub.f32 %v6385_v62, %v6420_v33 }
 0x33b   : > { %v1850_v48 = vmul.f32 1.442695, %v6451_v24  ;;  %v1779_v55 = vrot.slane %v1778_v51, 1  ;;  %v1858_v47 = vmul.f32 1.442695, %v6469_v0  ;;  %vm1995_vm3 = vcmp.ge.f32.partialorder %v6345_v3, %v6420_v33 }
 0x33c   : > { %5244 = vpow2.f32 %v1826_v59  ;;  %v2027_v59 = vsel %vm1987_vm1, %v6432_v35, 64.0  ;;  %v6513_v30 = vsub.f32 %v6395_v22, %v6420_v33  ;;  %vm1999_vm4 = vcmp.ge.f32.partialorder %v6354_v12, %v6420_v33 }
 0x33d   : > { %5246 = vpow2.f32 %v1834_v53  ;;  %v2031_v53 = vsel %vm1991_vm2, %v6447_v11, 64.0  ;;  %v2035_v60 = vsel %vm1995_vm3, %v6454_v18, 64.0  ;;  %v6525_v45 = vmax.f32 %v1778_v51, %v1779_v55 }
 0x33e   : > { %5248 = vpow2.f32 %v1842_v58  ;;  %v1866_v58 = vmul.f32 1.442695, %v6490_v40  ;;  %v2059_v3 = vmin.f32 %v2027_v59, %v2031_v53  ;;  %v1874_v21 = vmul.f32 1.442695, %v6497_v4 }
 0x33f   : > { %5250 = vpow2.f32 %v1850_v48  ;;  %8177 = vst [vmem:[#allocation55_spill] sm:$0xff] %v6525_v45  ;;  %vm2003_vm5 = vcmp.ge.f32.partialorder %v6365_v27, %v6420_v33  ;;  %v1757_v12 = vmax.f32 %v1756_v38, %v6506_v36  ;;  %v6534_v59 = vcvt.s32.f32 %v6429_v25 }
 0x340   : > { %5252 = vpow2.f32 %v1858_v47  ;;  %v2060_v48 = vmin.f32 %v2059_v3, %v2035_v60  ;;  %v2039_v53 = vsel %vm1999_vm4, %v6457_v14, 64.0  ;;  %v1882_v51 = vmul.f32 1.442695, %v6513_v30 }
 0x341   : > { %5254 = vpow2.f32 %v1866_v58  ;;  %vm2007_vm6 = vcmp.ge.f32.partialorder %v6374_v37, %v6420_v33  ;;  %v1758_v27 = vmax.f32 %v1757_v12, %v6519_v54  ;;  %v6544_v38 = vmul.f32 0.17677669, %v6351_v6 }
 0x342   : > { %v2061_v55 = vmin.f32 %v2060_v48, %v2039_v53  ;;  %vm2011_vm7 = vcmp.ge.f32.partialorder %v6385_v62, %v6420_v33  ;;  %v2043_v3 = vsel %vm2003_vm5, %v6460_v10, 64.0  ;;  %5256 = vpow2.f32 %v1874_v21 }
 0x343   : > { %v6553_v37 = vsub.f32 %v6327_v46, %v6525_v45  ;;  %v6557_v48 = vsub.f32 %v6337_v57, %v6525_v45  ;;  %v6560_v6 = vmul.f32 0.17677669, %v6376_v39  ;;  %v2047_v53 = vsel %vm2007_vm6, %v6475_v52, 64.0 }
 0x344   : > { %v2062_v58 = vmin.f32 %v2061_v55, %v2043_v3  ;;  %v6567_v21 = vsub.f32 %v6349_v5, %v6525_v45  ;;  %5258 = vpow2.f32 %v1882_v51  ;;  %vm2015_vm8 = vcmp.ge.f32.partialorder %v6395_v22, %v6420_v33 }
 0x345   : > { %v6575_v39 = vsub.f32 %v6359_v17, %v6525_v45  ;;  %v1782_v25 = vmax.f32 %v1781_v28, %v6544_v38  ;;  %v2051_v51 = vsel %vm2011_vm7, %v6522_v13, 64.0  ;;  %v1838_v28 = vmul.f32 1.442695, %v6557_v48 }
 0x346   : > { %v6540_v47 = vpop.eup %5244  ;;  %v2063_v3 = vmin.f32 %v2062_v58, %v2047_v53  ;;  %v6590_v58 = vsub.f32 %v6369_v29, %v6525_v45  ;;  %v1830_v53 = vmul.f32 1.442695, %v6553_v37  ;;  %v1759_v2 = vmax.f32 %v1758_v27, %v6560_v6 }
 0x347   : > { %v6549_v60 = vpop.eup %5246  ;;  %v2055_v19 = vsel %vm2015_vm8, %v6534_v59, 64.0  ;;  %v1846_v62 = vmul.f32 1.442695, %v6567_v21  ;;  %v6607_v44 = vsub.f32 %v6379_v42, %v6525_v45  ;;  %vm1989_vm9 = vcmp.ge.f32.partialorder %v6327_v46, %v6525_v45 }
 0x348   : > { %8178 = vst [vmem:[#allocation56_spill] sm:$0xff] %v6549_v60  ;;  %v1890_v12 = vadd.f32 %v6549_v60, %v6540_v47  ;;  %v6569_v55 = vpop.eup %5248  ;;  %v2064_v22 = vmin.f32 %v2063_v3, %v2051_v51  ;;  %v6601_v3 = vmul.f32 0.17677669, %v6361_v20  ;;  %v1760_v27 = vmax.f32 %v1759_v2, %v6579_v41 }
 0x349   : > { %8179 = vst [vmem:[#allocation57_spill] sm:$0xff] %v6569_v55  ;;  %v6586_v15 = vpop.eup %5250  ;;  %5260 = vpow2.f32 %v1830_v53  ;;  %v1862_v20 = vmul.f32 1.442695, %v6590_v58  ;;  %v6625_v2 = vsub.f32 %v6397_v23, %v6525_v45  ;;  %vm1993_vm10 = vcmp.ge.f32.partialorder %v6337_v57, %v6525_v45 }
 0x34a   : > { %v1891_v16 = vadd.f32 %v6569_v55, %v1890_v12  ;;  %8180 = vst [vmem:[#allocation58_spill] sm:$0xff] %v6586_v15  ;;  %v6598_v33 = vpop.eup %5252  ;;  %v6603_v51 = vmin.f32 %v2064_v22, %v2055_v19  ;;  %v1854_v55 = vmul.f32 1.442695, %v6575_v39  ;;  %v6619_v19 = vsub.f32 %v6387_v63, %v6525_v45 }
 0x34b   : > { %8181 = vst [vmem:[#allocation59_spill] sm:$0xff] %v6598_v33  ;;  %v6615_v60 = vpop.eup %5254  ;;  %5262 = vpow2.f32 %v1838_v28  ;;  %v1783_v28 = vmax.f32 %v1782_v25, %v6601_v3  ;;  %vm1997_vm11 = vcmp.ge.f32.partialorder %v6349_v5, %v6525_v45  ;;  %v6649_v57 = vmul.f32 100.0, %v6440_v49 }
 0x34c   : > { %v1892_v12 = vadd.f32 %v6586_v15, %v1891_v16  ;;  %v6613_v15 = vmul.f32 0.17677669, %v6399_v26  ;;  %8182 = vst [vmem:[#allocation60_spill] sm:$0xff] %v6615_v60  ;;  %5264 = vpow2.f32 %v1846_v62  ;;  %v6627_v53 = vpop.eup %5256  ;;  %v1870_v26 = vmul.f32 1.442695, %v6607_v44 }
 0x34d   : > { %8183 = vst [vmem:[#allocation61_spill] sm:$0xff] %v6627_v53  ;;  %5266 = vpow2.f32 %v1854_v55  ;;  %v6640_v62 = vmul.f32 100.0, %v6436_v61  ;;  %v1878_v55 = vmul.f32 1.442695, %v6619_v19  ;;  %8186 = vst [vmem:[#allocation64_spill] sm:$0xff] %v6649_v57  ;;  %v2029_v25 = vsel %vm1989_vm9, %v6432_v35, 64.0 }
 0x34e   : > { %v1893_v16 = vadd.f32 %v6598_v33, %v1892_v12  ;;  %5268 = vpow2.f32 %v1862_v20  ;;  %v1886_v61 = vmul.f32 1.442695, %v6625_v2  ;;  %vm2001_vm12 = vcmp.ge.f32.partialorder %v6359_v17, %v6525_v45 }
 0x34f   : > { %8185 = vst [vmem:[#allocation63_spill] sm:$0xff] %v6640_v62  ;;  %5270 = vpow2.f32 %v1870_v26  ;;  %v2037_v5 = vsel %vm1997_vm11, %v6454_v18, 64.0  ;;  %vm2005_vm13 = vcmp.ge.f32.partialorder %v6369_v29, %v6525_v45  ;;  %v2041_v26 = vsel %vm2001_vm12, %v6457_v14, 64.0 }
 0x350   : > { %v1894_v22 = vadd.f32 %v6615_v60, %v1893_v16  ;;  %v1761_v16 = vmax.f32 %v1760_v27, %v6613_v15  ;;  %v6637_v60 = vpop.eup %5258  ;;  %v2033_v27 = vsel %vm1993_vm10, %v6447_v11, 64.0  ;;  %5272 = vpow2.f32 %v1878_v55 }
 0x351   : > { %8184 = vst [vmem:[#allocation62_spill] sm:$0xff] %v6637_v60  ;;  %v2085_v49 = vmin.f32 %v2029_v25, %v2033_v27  ;;  %5274 = vpow2.f32 %v1886_v61  ;;  %vm2009_vm14 = vcmp.ge.f32.partialorder %v6379_v42, %v6525_v45  ;;  %v6675_v29 = vmul.f32 0.17677669, %v6381_v43 }
 0x352   : > { %v1895_v12 = vadd.f32 %v6627_v53, %v1894_v22  ;;  %v6654_v22 = vmul.f32 0.17677669, %v6371_v31  ;;  %v1762_v20 = vrot.slane %v1761_v16, 4  ;;  %v2623_v31 = vmul.f32 1.442695, %v6649_v57 }
 0x353   : > { %v2086_v33 = vmin.f32 %v2085_v49, %v2037_v5  ;;  %v6678_v25 = vmul.f32 100.0, %v6444_v9  ;;  %vm2013_vm15 = vcmp.ge.f32.partialorder %v6387_v63, %v6525_v45  ;;  %v2049_v61 = vsel %vm2009_vm14, %v6475_v52, 64.0 }
 0x354   : > { %v6646_v46 = vadd.f32 %v6637_v60, %v1895_v12  ;;  %v2615_v12 = vmul.f32 1.442695, %v6640_v62  ;;  %v6663_v60 = vpop.eup %5260  ;;  %v1784_v17 = vmax.f32 %v1783_v28, %v6654_v22  ;;  %v2045_v62 = vsel %vm2005_vm13, %v6460_v10, 64.0 }
 0x355   : > { %v6667_v53 = vpop.eup %5262  ;;  %8189 = vst [vmem:[#allocation67_spill] sm:$0xff] %v6678_v25  ;;  %v2087_v42 = vmin.f32 %v2086_v33, %v2041_v26  ;;  %v1763_v28 = vmax.f32 %v1761_v16, %v1762_v20  ;;  %vm2017_vm0 = vcmp.ge.f32.partialorder %v6397_v23, %v6525_v45  ;;  %v6694_v49 = vmul.f32 100.0, %v6451_v24 }
 0x356   : > { %8187 = vst [vmem:[#allocation65_spill] sm:$0xff] %v6667_v53  ;;  %v6672_v55 = vpop.eup %5264  ;;  %v1916_v27 = vadd.f32 %v6667_v53, %v6663_v60  ;;  %5276 = vpow2.f32 %v2615_v12  ;;  %v2631_v12 = vmul.f32 1.442695, %v6678_v25  ;;  %v2053_v33 = vsel %vm2013_vm15, %v6522_v13, 64.0 }
 0x357   : > { %8188 = vst [vmem:[#allocation66_spill] sm:$0xff] %v6672_v55  ;;  %v6683_v57 = vpop.eup %5266  ;;  %5278 = vpow2.f32 %v2623_v31  ;;  %v2088_v5 = vmin.f32 %v2087_v42, %v2045_v62  ;;  %8192 = vst [vmem:[#allocation70_spill] sm:$0xff] %v6694_v49  ;;  %v1785_v20 = vmax.f32 %v1784_v17, %v6675_v29  ;;  %v1764_v26 = vrot.slane %v1763_v28, 2 }
 0x358   : > { %8190 = vst [vmem:[#allocation68_spill] sm:$0xff] %v6683_v57  ;;  %v1917_v43 = vadd.f32 %v6672_v55, %v1916_v27  ;;  %v6689_v9 = vpop.eup %5268  ;;  %v6703_v27 = vmul.f32 0.17677669, %v6391_v7  ;;  %v6706_v23 = vmul.f32 100.0, %v6469_v0  ;;  %v2057_v62 = vsel %vm2017_vm0, %v6534_v59, 64.0 }
 0x359   : > { %8191 = vst [vmem:[#allocation69_spill] sm:$0xff] %v6689_v9  ;;  %v6699_v16 = vpop.eup %5270  ;;  %v2089_v31 = vmin.f32 %v2088_v5, %v2049_v61  ;;  %v6713_v45 = vmul.f32 100.0, %v6553_v37  ;;  %5280 = vpow2.f32 %v2631_v12  ;;  %v2639_v17 = vmul.f32 1.442695, %v6694_v49 }
 0x35a   : > { %v1918_v63 = vadd.f32 %v6683_v57, %v1917_v43  ;;  %8193 = vst [vmem:[#allocation71_spill] sm:$0xff] %v6699_v16  ;;  %8194 = vst [vmem:[#allocation72_spill] sm:$0xff] %v6706_v23  ;;  %v6710_v42 = vpop.eup %5272  ;;  %v6718_v7 = vmul.f32 100.0, %v6557_v48  ;;  %v1786_v25 = vmax.f32 %v1785_v20, %v6703_v27  ;;  %v6728_v12 = vmul.f32 0.17677669, %v6401_v32 }
 0x35b   : > { %8195 = vst [vmem:[#allocation73_spill] sm:$0xff] %v6710_v42  ;;  %v2090_v43 = vmin.f32 %v2089_v31, %v2053_v33  ;;  %8196 = vst [vmem:[#allocation74_spill] sm:$0xff] %v6713_v45  ;;  %v6720_v0 = vpop.eup %5274  ;;  %v2647_v33 = vmul.f32 1.442695, %v6706_v23  ;;  %v2619_v48 = vmul.f32 1.442695, %v6713_v45  ;;  %5282 = vpow2.f32 %v2639_v17 }
 0x35c   : > { %v1919_v24 = vadd.f32 %v6689_v9, %v1918_v63  ;;  %8197 = vst [vmem:[#allocation75_spill] sm:$0xff] %v6718_v7  ;;  %8198 = vst [vmem:[#allocation76_spill] sm:$0xff] %v6720_v0  ;;  %v1765_v63 = vmax.f32 %v1763_v28, %v1764_v26  ;;  %v6742_v20 = vmul.f32 100.0, %v6567_v21  ;;  %v2627_v26 = vmul.f32 1.442695, %v6718_v7 }
 0x35d   : > { %v6722_v5 = vmin.f32 %v2090_v43, %v2057_v62  ;;  %5284 = vpow2.f32 %v2647_v33  ;;  %v1787_v62 = vmax.f32 %v1786_v25, %v6728_v12  ;;  %v6761_v25 = vmul.f32 100.0, %v6513_v30 }
 0x35e   : > { %v1920_v61 = vadd.f32 %v6699_v16, %v1919_v24  ;;  %v6733_v24 = vmul.f32 100.0, %v6490_v40  ;;  %8202 = vst [vmem:[#allocation80_spill] sm:$0xff] %v6742_v20  ;;  %v1766_v32 = vrot.slane %v1765_v63, 1  ;;  %v6747_v40 = vmul.f32 100.0, %v6497_v4 }
 0x35f   : > { %5286 = vpow2.f32 %v2619_v48  ;;  %v2635_v21 = vmul.f32 1.442695, %v6742_v20  ;;  %8207 = vst [vmem:[#allocation85_spill] sm:$0xff] %v6761_v25  ;;  %v1788_v4 = vrot.slane %v1787_v62, 4  ;;  %v6766_v48 = vmul.f32 100.0, %v6590_v58 }
 0x360   : > { %v1921_v37 = vadd.f32 %v6710_v42, %v1920_v61  ;;  %v6730_v31 = vpop.eup %5276  ;;  %8200 = vst [vmem:[#allocation78_spill] sm:$0xff] %v6733_v24  ;;  %8203 = vst [vmem:[#allocation81_spill] sm:$0xff] %v6747_v40  ;;  %v2655_v43 = vmul.f32 1.442695, %v6733_v24  ;;  %v6753_v61 = vmul.f32 100.0, %v6575_v39  ;;  %5288 = vpow2.f32 %v2627_v26 }
 0x361   : > { %8199 = vst [vmem:[#allocation77_spill] sm:$0xff] %v6730_v31  ;;  %v6736_v49 = vpop.eup %5278  ;;  %v2663_v24 = vmul.f32 1.442695, %v6747_v40  ;;  %8208 = vst [vmem:[#allocation86_spill] sm:$0xff] %v6766_v48  ;;  %v1789_v58 = vmax.f32 %v1787_v62, %v1788_v4  ;;  %v6792_v40 = vmul.f32 100.0, %v6607_v44  ;;  %v6846_v7 = vmul.f32 100.0, %v6625_v2 }
 0x362   : > { %8201 = vst [vmem:[#allocation79_spill] sm:$0xff] %v6736_v49  ;;  %v6739_v28 = vadd.f32 %v6720_v0, %v1921_v37  ;;  %v2679_v17 = vadd.f32 %v6736_v49, %v6730_v31  ;;  %8204 = vst [vmem:[#allocation82_spill] sm:$0xff] %v6753_v61  ;;  %v6756_v37 = vmax.f32 %v1765_v63, %v1766_v32  ;;  %5290 = vpow2.f32 %v2655_v43 }
 0x363   : > { %v6758_v33 = vpop.eup %5280  ;;  %5292 = vpow2.f32 %v2635_v21  ;;  %v2643_v39 = vmul.f32 1.442695, %v6753_v61  ;;  %v2671_v32 = vmul.f32 1.442695, %v6761_v25  ;;  %8211 = vst [vmem:[#allocation89_spill] sm:$0xff] %v6792_v40  ;;  %8223 = vst [vmem:[#allocation101_spill] sm:$0xff] %v6846_v7 }
 0x364   : > { %8205 = vst [vmem:[#allocation83_spill] sm:$0xff] %v6756_v37  ;;  %8206 = vst [vmem:[#allocation84_spill] sm:$0xff] %v6758_v33  ;;  %v2680_v0 = vadd.f32 %v6758_v33, %v2679_v17  ;;  %v6771_v63 = vsub.f32 %v6478_v56, %v6756_v37  ;;  %v6775_v30 = vsub.f32 %v6463_v1, %v6756_v37  ;;  %5294 = vpow2.f32 %v2663_v24 }
 0x365   : > { %v6777_v26 = vpop.eup %5282  ;;  %v6782_v43 = vsub.f32 %v6481_v50, %v6756_v37  ;;  %v6787_v21 = vsub.f32 %v6506_v36, %v6756_v37  ;;  %5296 = vpow2.f32 %v2643_v39  ;;  %v2651_v42 = vmul.f32 1.442695, %v6766_v48 }
 0x366   : > { %8209 = vst [vmem:[#allocation87_spill] sm:$0xff] %v6777_v26  ;;  %v2681_v17 = vadd.f32 %v6777_v26, %v2680_v0  ;;  %v6799_v62 = vsub.f32 %v6519_v54, %v6756_v37  ;;  %v6802_v0 = vmul.f32 100.0, %v6771_v63  ;;  %v6805_v24 = vmul.f32 100.0, %v6775_v30 }
 0x367   : > { %v6789_v61 = vpop.eup %5284  ;;  %5298 = vpow2.f32 %v2671_v32  ;;  %v6810_v44 = vmul.f32 100.0, %v6782_v43  ;;  %v1790_v39 = vrot.slane %v1789_v58, 2  ;;  %v6814_v33 = vmul.f32 100.0, %v6619_v19 }
 0x368   : > { %8210 = vst [vmem:[#allocation88_spill] sm:$0xff] %v6789_v61  ;;  %8213 = vst [vmem:[#allocation91_spill] sm:$0xff] %v6802_v0  ;;  %v2682_v26 = vadd.f32 %v6789_v61, %v2681_v17  ;;  %v6818_v48 = vsub.f32 %v6560_v6, %v6756_v37  ;;  %v6821_v23 = vmul.f32 100.0, %v6787_v21  ;;  %5300 = vpow2.f32 %v2651_v42 }
 0x369   : > { %v6795_v20 = vpop.eup %5286  ;;  %8214 = vst [vmem:[#allocation92_spill] sm:$0xff] %v6805_v24  ;;  %8216 = vst [vmem:[#allocation94_spill] sm:$0xff] %v6810_v44  ;;  %v2659_v16 = vmul.f32 1.442695, %v6792_v40  ;;  %v2617_v32 = vmul.f32 1.442695, %v6802_v0  ;;  %v6832_v17 = vsub.f32 %v6579_v41, %v6756_v37  ;;  %v1791_v40 = vmax.f32 %v1789_v58, %v1790_v39 }
 0x36a   : > { %8212 = vst [vmem:[#allocation90_spill] sm:$0xff] %v6795_v20  ;;  %v6807_v4 = vpop.eup %5288  ;;  %8217 = vst [vmem:[#allocation95_spill] sm:$0xff] %v6814_v33  ;;  %v2625_v9 = vmul.f32 1.442695, %v6805_v24  ;;  %v6835_v61 = vmul.f32 100.0, %v6799_v62  ;;  %v6842_v24 = vmul.f32 100.0, %v6818_v48  ;;  %vm1988_vm1 = vcmp.ge.f32.partialorder %v6478_v56, %v6756_v37 }
 0x36b   : > { %8215 = vst [vmem:[#allocation93_spill] sm:$0xff] %v6807_v4  ;;  %8218 = vst [vmem:[#allocation96_spill] sm:$0xff] %v6821_v23  ;;  %v2705_v19 = vadd.f32 %v6807_v4, %v6795_v20  ;;  %v2633_v42 = vmul.f32 1.442695, %v6810_v44  ;;  %5302 = vpow2.f32 %v2617_v32  ;;  %v2641_v20 = vmul.f32 1.442695, %v6821_v23 }
 0x36c   : > { %v6826_v45 = vpop.eup %5290  ;;  %8220 = vst [vmem:[#allocation98_spill] sm:$0xff] %v6835_v61  ;;  %8222 = vst [vmem:[#allocation100_spill] sm:$0xff] %v6842_v24  ;;  %5304 = vpow2.f32 %v2625_v9  ;;  %v2667_v4 = vmul.f32 1.442695, %v6814_v33  ;;  %v6851_v44 = vsub.f32 %v6613_v15, %v6756_v37  ;;  %v6857_v58 = vmul.f32 100.0, %v6832_v17 }
 0x36d   : > { %8219 = vst [vmem:[#allocation97_spill] sm:$0xff] %v6826_v45  ;;  %v6838_v31 = vpop.eup %5292  ;;  %v2683_v0 = vadd.f32 %v6826_v45, %v2682_v26  ;;  %5306 = vpow2.f32 %v2659_v16  ;;  %v2649_v9 = vmul.f32 1.442695, %v6835_v61  ;;  %v1792_v2 = vrot.slane %v1791_v40, 1 }
 0x36e   : > { %8221 = vst [vmem:[#allocation99_spill] sm:$0xff] %v6838_v31  ;;  %v6853_v32 = vpop.eup %5294  ;;  %v2706_v26 = vadd.f32 %v6838_v31, %v2705_v19  ;;  %8225 = vst [vmem:[#allocation103_spill] sm:$0xff] %v6857_v58  ;;  %5308 = vpow2.f32 %v2633_v42  ;;  %v2657_v45 = vmul.f32 1.442695, %v6842_v24  ;;  %v2675_v33 = vmul.f32 1.442695, %v6846_v7 }
 0x36f   : > { %8224 = vst [vmem:[#allocation102_spill] sm:$0xff] %v6853_v32  ;;  %v6860_v39 = vpop.eup %5296  ;;  %v2684_v16 = vadd.f32 %v6853_v32, %v2683_v0  ;;  %5310 = vpow2.f32 %v2641_v20  ;;  %v6868_v19 = vmul.f32 100.0, %v6851_v44  ;;  %v2665_v31 = vmul.f32 1.442695, %v6857_v58 }
 0x370   : > { %8226 = vst [vmem:[#allocation104_spill] sm:$0xff] %v6860_v39  ;;  %5312 = vpow2.f32 %v2667_v4  ;;  %v2707_v42 = vadd.f32 %v6860_v39, %v2706_v26  ;;  %v6876_v20 = vmax.f32 %v1791_v40, %v1792_v2  ;;  %v1897_v0 = vrot.slane %v6646_v46, 4 }
 0x371   : > { %v6864_v23 = vpop.eup %5298  ;;  %8228 = vst [vmem:[#allocation106_spill] sm:$0xff] %v6868_v19  ;;  %5314 = vpow2.f32 %v2649_v9  ;;  %vm1992_vm2 = vcmp.ge.f32.partialorder %v6463_v1, %v6756_v37  ;;  %v2673_v9 = vmul.f32 1.442695, %v6868_v19  ;;  %v2028_v40 = vsel %vm1988_vm1, %v6432_v35, 64.0 }
 0x372   : > { %8227 = vst [vmem:[#allocation105_spill] sm:$0xff] %v6864_v23  ;;  %v6872_v61 = vpop.eup %5300  ;;  %8230 = vst [vmem:[#allocation108_spill] sm:$0xff] %v6876_v20  ;;  %v6880_v4 = vadd.f32 %v6864_v23, %v2684_v16  ;;  %5316 = vpow2.f32 %v2657_v45  ;;  %v2032_v16 = vsel %vm1992_vm2, %v6447_v11, 64.0  ;;  %v6898_v45 = vsub.f32 %v6486_v8, %v6876_v20 }
 0x373   : > { %8229 = vst [vmem:[#allocation107_spill] sm:$0xff] %v6872_v61  ;;  %5318 = vpow2.f32 %v2675_v33  ;;  %v2708_v56 = vadd.f32 %v6872_v61, %v2707_v42  ;;  %v6902_v33 = vsub.f32 %v6509_v34, %v6876_v20  ;;  %v6907_v42 = vadd.f32 %v1897_v0, %v6646_v46 }
 0x374   : > { %5320 = vpow2.f32 %v2665_v31  ;;  %v2686_v31 = vrot.slane %v6880_v4, 4  ;;  %v6912_v39 = vsub.f32 %v6544_v38, %v6876_v20  ;;  %v6916_v58 = vsub.f32 %v6601_v3, %v6876_v20 }
 0x375   : > { %v6884_v26 = vpop.eup %5302  ;;  %vm1996_vm3 = vcmp.ge.f32.partialorder %v6481_v50, %v6756_v37  ;;  %5322 = vpow2.f32 %v2673_v9  ;;  %v6923_v46 = vsub.f32 %v6654_v22, %v6876_v20  ;;  %vm1990_vm4 = vcmp.ge.f32.partialorder %v6486_v8, %v6876_v20 }
 0x376   : > { %8231 = vst [vmem:[#allocation109_spill] sm:$0xff] %v6884_v26  ;;  %v6887_v24 = vpop.eup %5304  ;;  %vm1994_vm5 = vcmp.ge.f32.partialorder %v6509_v34, %v6876_v20  ;;  %v6949_v8 = vsub.f32 %v6703_v27, %v6876_v20  ;;  %vm1998_vm6 = vcmp.ge.f32.partialorder %v6544_v38, %v6876_v20  ;;  %v6954_v34 = vmul.f32 100.0, %v6912_v39 }
 0x377   : > { %8232 = vst [vmem:[#allocation110_spill] sm:$0xff] %v6887_v24  ;;  %v6891_v2 = vpop.eup %5306  ;;  %v2692_v1 = vadd.f32 %v6887_v24, %v6884_v26  ;;  %v2072_v26 = vmin.f32 %v2028_v40, %v2032_v16  ;;  %v6963_v49 = vmul.f32 100.0, %v6923_v46  ;;  %v6970_v57 = vsub.f32 %v6728_v12, %v6876_v20 }
 0x378   : > { %8233 = vst [vmem:[#allocation111_spill] sm:$0xff] %v6891_v2  ;;  %v6904_v23 = vpop.eup %5308  ;;  %v2709_v61 = vadd.f32 %v6891_v2, %v2708_v56  ;;  %v6943_v56 = vmul.f32 100.0, %v6902_v33  ;;  %8239 = vst [vmem:[#allocation117_spill] sm:$0xff] %v6954_v34  ;;  %v2030_v2 = vsel %vm1990_vm4, %v6432_v35, 64.0  ;;  %vm2000_vm7 = vcmp.ge.f32.partialorder %v6506_v36, %v6756_v37 }
 0x379   : > { %8234 = vst [vmem:[#allocation112_spill] sm:$0xff] %v6904_v23  ;;  %v2693_v32 = vadd.f32 %v6904_v23, %v2692_v1  ;;  %v6925_v0 = vpop.eup %5310  ;;  %v6937_v1 = vsub.f32 %v6675_v29, %v6876_v20  ;;  %v6940_v23 = vmul.f32 100.0, %v6898_v45  ;;  %vm2002_vm8 = vcmp.ge.f32.partialorder %v6601_v3, %v6876_v20 }
 0x37a   : > { %8235 = vst [vmem:[#allocation113_spill] sm:$0xff] %v6925_v0  ;;  %v6932_v24 = vpop.eup %5312  ;;  %v2629_v25 = vmul.f32 1.442695, %v6943_v56  ;;  %v2042_v3 = vsel %vm2002_vm8, %v6457_v14, 64.0  ;;  %vm2004_vm9 = vcmp.ge.f32.partialorder %v6519_v54, %v6756_v37  ;;  %vm2006_vm10 = vcmp.ge.f32.partialorder %v6654_v22, %v6876_v20 }
 0x37b   : > { %8236 = vst [vmem:[#allocation114_spill] sm:$0xff] %v6932_v24  ;;  %v2694_v9 = vadd.f32 %v6925_v0, %v2693_v32  ;;  %8237 = vst [vmem:[#allocation115_spill] sm:$0xff] %v6940_v23  ;;  %v6945_v40 = vpop.eup %5314  ;;  %v6957_v32 = vmul.f32 100.0, %v6916_v58  ;;  %v2034_v0 = vsel %vm1994_vm5, %v6447_v11, 64.0  ;;  %v2710_v7 = vadd.f32 %v6932_v24, %v2709_v61 }
 0x37c   : > { %8238 = vst [vmem:[#allocation116_spill] sm:$0xff] %v6945_v40  ;;  %v6965_v19 = vpop.eup %5316  ;;  %v2621_v55 = vmul.f32 1.442695, %v6940_v23  ;;  %v6978_v11 = vmul.f32 100.0, %v6937_v1  ;;  %v2036_v24 = vsel %vm1996_vm3, %v6454_v18, 64.0  ;;  %v2038_v23 = vsel %vm1998_vm6, %v6454_v18, 64.0 }
 0x37d   : > { %8240 = vst [vmem:[#allocation118_spill] sm:$0xff] %v6957_v32  ;;  %v2695_v16 = vadd.f32 %v6945_v40, %v2694_v9  ;;  %8241 = vst [vmem:[#allocation119_spill] sm:$0xff] %v6965_v19  ;;  %v6974_v9 = vpop.eup %5318  ;;  %v2637_v40 = vmul.f32 1.442695, %v6954_v34  ;;  %v2645_v53 = vmul.f32 1.442695, %v6957_v32  ;;  %v2073_v50 = vmin.f32 %v2072_v26, %v2036_v24 }
 0x37e   : > { %8242 = vst [vmem:[#allocation120_spill] sm:$0xff] %v6974_v9  ;;  %8243 = vst [vmem:[#allocation121_spill] sm:$0xff] %v6978_v11  ;;  %v6982_v61 = vpop.eup %5320  ;;  %5324 = vpow2.f32 %v2621_v55  ;;  %v6994_v34 = vmul.f32 100.0, %v6949_v8  ;;  %v2653_v32 = vmul.f32 1.442695, %v6963_v49  ;;  %v2711_v18 = vadd.f32 %v6974_v9, %v2710_v7 }
 0x37f   : > { %v2696_v35 = vadd.f32 %v6965_v19, %v2695_v16  ;;  %v2098_v16 = vmin.f32 %v2030_v2, %v2034_v0  ;;  %5326 = vpow2.f32 %v2629_v25  ;;  %v7001_v38 = vpop.eup %5322  ;;  %v7005_v55 = vmul.f32 100.0, %v6970_v57 }
 0x380   : > { %5328 = vpow2.f32 %v2637_v40  ;;  %8244 = vst [vmem:[#allocation122_spill] sm:$0xff] %v7001_v38  ;;  %v2661_v25 = vmul.f32 1.442695, %v6978_v11  ;;  %v1923_v2 = vrot.slane %v6739_v28, 4  ;;  %v1899_v24 = vrot.slane %v6907_v42, 2 }
 0x381   : > { %v2697_v19 = vadd.f32 %v6982_v61, %v2696_v35  ;;  %8245 = vst [vmem:[#allocation123_spill] sm:$0xff] %v7005_v55  ;;  %5330 = vpow2.f32 %v2645_v53  ;;  %v2099_v35 = vmin.f32 %v2098_v16, %v2038_v23  ;;  %v2669_v26 = vmul.f32 1.442695, %v6994_v34 }
 0x382   : > { %5332 = vpow2.f32 %v2653_v32  ;;  %v2687_v7 = vadd.f32 %v2686_v31, %v6880_v4  ;;  %v2040_v53 = vsel %vm2000_vm7, %v6457_v14, 64.0  ;;  %v2712_v23 = vrot.slane %v2711_v18, 4 }
 0x383   : > { %v2698_v0 = vadd.f32 %v7001_v38, %v2697_v19  ;;  %v2074_v19 = vmin.f32 %v2073_v50, %v2040_v53  ;;  %5334 = vpow2.f32 %v2661_v25  ;;  %v2677_v40 = vmul.f32 1.442695, %v7005_v55 }
 0x384   : > { %v1924_v32 = vadd.f32 %v1923_v2, %v6739_v28  ;;  %v2100_v4 = vmin.f32 %v2099_v35, %v2042_v3  ;;  %v1900_v31 = vadd.f32 %v1899_v24, %v6907_v42  ;;  %v2046_v54 = vsel %vm2006_vm10, %v6460_v10, 64.0 }
 0x385   : > { %v2699_v16 = vrot.slane %v2698_v0, 4  ;;  %5336 = vpow2.f32 %v2669_v26  ;;  %v2688_v14 = vrot.slane %v2687_v7, 2  ;;  %v2044_v36 = vsel %vm2004_vm9, %v6460_v10, 64.0 }
 0x386   : > { %vm2010_vm11 = vcmp.ge.f32.partialorder %v6675_v29, %v6876_v20  ;;  %v2713_v50 = vadd.f32 %v2712_v23, %v2711_v18  ;;  %vm2008_vm12 = vcmp.ge.f32.partialorder %v6560_v6, %v6756_v37  ;;  %v2075_v28 = vmin.f32 %v2074_v19, %v2044_v36 }
 0x387   : > { %5338 = vpow2.f32 %v2677_v40  ;;  %v1925_v25 = vrot.slane %v1924_v32, 2  ;;  %v2700_v2 = vadd.f32 %v2699_v16, %v2698_v0  ;;  %v2101_v35 = vmin.f32 %v2100_v4, %v2046_v54 }
 0x388   : > { %v7026_v9 = vpop.eup %5324  ;;  %v1901_v3 = vrot.slane %v1900_v31, 1  ;;  %v2050_v29 = vsel %vm2010_vm11, %v6475_v52, 64.0  ;;  %v2689_v26 = vadd.f32 %v2688_v14, %v2687_v7  ;;  %v2048_v18 = vsel %vm2008_vm12, %v6475_v52, 64.0 }
 0x389   : > { %v7031_v22 = vpop.eup %5326  ;;  %vm2014_vm13 = vcmp.ge.f32.partialorder %v6703_v27, %v6876_v20  ;;  %v2714_v0 = vrot.slane %v2713_v50, 2  ;;  %vm2012_vm14 = vcmp.ge.f32.partialorder %v6579_v41, %v6756_v37  ;;  %v2076_v23 = vmin.f32 %v2075_v28, %v2048_v18 }
 0x38a   : > { %v7035_v42 = vpop.eup %5328  ;;  %v2718_v24 = vadd.f32 %v7031_v22, %v7026_v9  ;;  %v1926_v19 = vadd.f32 %v1925_v25, %v1924_v32  ;;  %v2701_v40 = vrot.slane %v2700_v2, 2  ;;  %v2102_v16 = vmin.f32 %v2101_v35, %v2050_v29 }
 0x38b   : > { %v7039_v10 = vpop.eup %5330  ;;  %v1902_v52 = vadd.f32 %v1901_v3, %v1900_v31  ;;  %v2054_v54 = vsel %vm2014_vm13, %v6522_v13, 64.0  ;;  %v2690_v27 = vrot.slane %v2689_v26, 1  ;;  %v2052_v14 = vsel %vm2012_vm14, %v6522_v13, 64.0 }
 0x38c   : > { %8246 = vst [vmem:[#allocation124_spill] sm:$0xff] %v7039_v10  ;;  %v2719_v6 = vadd.f32 %v7035_v42, %v2718_v24  ;;  %v7046_v53 = vpop.eup %5332  ;;  %vm2018_vm15 = vcmp.ge.f32.partialorder %v6728_v12, %v6876_v20  ;;  %v2715_v32 = vadd.f32 %v2714_v0, %v2713_v50  ;;  %v1860_v28 = vmul.f32 1.442695, %v6799_v62  ;;  %v8276_v20 = vld [vmem:[#allocation46_spill] sm:$0xff] }
 0x38d   : > { %v7051_v7 = vpop.eup %5334  ;;  %vm2016_vm0 = vcmp.ge.f32.partialorder %v6613_v15, %v6756_v37  ;;  %v2077_v25 = vmin.f32 %v2076_v23, %v2052_v14  ;;  %v1927_v31 = vrot.slane %v1926_v19, 1  ;;  %v2702_v35 = vadd.f32 %v2701_v40, %v2700_v2 }
 0x38e   : > { %v2720_v4 = vadd.f32 %v7039_v10, %v2719_v6  ;;  %8247 = vst [vmem:[#allocation125_spill] sm:$0xff] %v7051_v7  ;;  %v2103_v24 = vmin.f32 %v2102_v16, %v2054_v54  ;;  %v2066_v12 = vrot.slane %v6603_v51, 4  ;;  %v1868_v29 = vmul.f32 1.442695, %v6818_v48 }
 0x38f   : > { %v7058_v41 = vpop.eup %5336  ;;  %v2058_v18 = vsel %vm2018_vm15, %v6534_v59, 64.0  ;;  %5340 = vrcp.f32 %v1902_v52  ;;  %v2691_v50 = vadd.f32 %v2690_v27, %v2689_v26  ;;  %v2056_v62 = vsel %vm2016_vm0, %v6534_v59, 64.0 }
 0x390   : > { %v2721_v36 = vadd.f32 %v7046_v53, %v2720_v4  ;;  %v2092_v6 = vrot.slane %v6722_v5, 4  ;;  %v2716_v2 = vrot.slane %v2715_v32, 1  ;;  %5342 = vpow2.f32 %v1860_v28 }
 0x391   : > { %v7064_v13 = vpop.eup %5338  ;;  %v2078_v0 = vmin.f32 %v2077_v25, %v2056_v62  ;;  %v1928_v23 = vadd.f32 %v1927_v31, %v1926_v19  ;;  %v2703_v40 = vrot.slane %v2702_v35, 1  ;;  %v2104_v16 = vmin.f32 %v2103_v24, %v2058_v18 }
 0x392   : > { %v2722_v3 = vadd.f32 %v7051_v7, %v2721_v36  ;;  %8248 = vst [vmem:[#allocation126_spill] sm:$0xff] %v7064_v13  ;;  %5344 = vpow2.f32 %v1868_v29  ;;  %v1876_v48 = vmul.f32 1.442695, %v6832_v17  ;;  %v2067_v52 = vmin.f32 %v6603_v51, %v2066_v12 }
 0x393   : > { %5346 = vrcp.f32 %v2691_v50  ;;  %v1884_v59 = vmul.f32 1.442695, %v6851_v44  ;;  %v2093_v54 = vmin.f32 %v6722_v5, %v2092_v6  ;;  %v2717_v27 = vadd.f32 %v2716_v2, %v2715_v32 }
 0x394   : > { %v2723_v15 = vadd.f32 %v7058_v41, %v2722_v3  ;;  %5348 = vlog2.f32 %v2691_v50  ;;  %v2079_v14 = vrot.slane %v2078_v0, 4  ;;  %v2704_v19 = vadd.f32 %v2703_v40, %v2702_v35 }
 0x395   : > { %5350 = vrcp.f32 %v1928_v23  ;;  %v2105_v36 = vrot.slane %v2104_v16, 4  ;;  %v1864_v25 = vmul.f32 1.442695, %v6923_v46  ;;  %v2068_v31 = vrot.slane %v2067_v52, 2 }
 0x396   : > { %v2724_v4 = vadd.f32 %v7064_v13, %v2723_v15  ;;  %5352 = vpow2.f32 %v1876_v48  ;;  %v2094_v51 = vrot.slane %v2093_v54, 2  ;;  %v2080_v24 = vmin.f32 %v2078_v0, %v2079_v14  ;;  %v8250_v14 = vld [vmem:[#allocation56_spill] sm:$0xff] }
 0x397   : > { %5354 = vpow2.f32 %v1884_v59  ;;  %v2106_v3 = vmin.f32 %v2104_v16, %v2105_v36  ;;  %v1828_v35 = vmul.f32 1.442695, %v6771_v63  ;;  %v1836_v12 = vmul.f32 1.442695, %v6775_v30 }
 0x398   : > { %v2725_v26 = vrot.slane %v2724_v4, 4  ;;  %5356 = vlog2.f32 %v2717_v27  ;;  %v2069_v29 = vmin.f32 %v2067_v52, %v2068_v31  ;;  %v2095_v50 = vmin.f32 %v2093_v54, %v2094_v51 }
 0x399   : > { %v7078_v44 = vpop.eup %5340  ;;  %5358 = vlog2.f32 %v2704_v19  ;;  %v2081_v62 = vrot.slane %v2080_v24, 2  ;;  %v2107_v6 = vrot.slane %v2106_v3, 2  ;;  %v1844_v0 = vmul.f32 1.442695, %v6782_v43 }
 0x39a   : > { %v2726_v28 = vadd.f32 %v2725_v26, %v2724_v4  ;;  %v7080_v32 = vpop.eup %5342  ;;  %5360 = vpow2.f32 %v1864_v25  ;;  %v1852_v63 = vmul.f32 1.442695, %v6787_v21  ;;  %v2070_v40 = vrot.slane %v2069_v29, 1 }
 0x39b   : > { %5362 = vrcp.f32 %v2717_v27  ;;  %v1832_v16 = vmul.f32 1.442695, %v6898_v45  ;;  %v2096_v48 = vrot.slane %v2095_v50, 1  ;;  %v1840_v52 = vmul.f32 1.442695, %v6902_v33 }
 0x39c   : > { %v2727_v17 = vrot.slane %v2726_v28, 2  ;;  %v7084_v18 = vpop.eup %5344  ;;  %5364 = vpow2.f32 %v1828_v35  ;;  %v7098_v59 = vmul.f32 %v7078_v44, %v6540_v47  ;;  %v2082_v26 = vmin.f32 %v2080_v24, %v2081_v62  ;;  %v8256_v35 = vld [vmem:[#allocation57_spill] sm:$0xff] }
 0x39d   : > { %v7086_v15 = vpop.eup %5346  ;;  %5366 = vrcp.f32 %v2704_v19  ;;  %v2108_v21 = vmin.f32 %v2106_v3, %v2107_v6  ;;  %v1848_v54 = vmul.f32 1.442695, %v6912_v39  ;;  %v1856_v45 = vmul.f32 1.442695, %v6916_v58 }
 0x39e   : > { %v2728_v5 = vadd.f32 %v2727_v17, %v2726_v28  ;;  %v5349_v23 = vpop.eup %5348  ;;  %5368 = vpow2.f32 %v1836_v12  ;;  %8249 = vst [vmem:[#allocation127_spill] sm:$0xff] %v7098_v59  ;;  %v7106_v19 = vmul.f32 %v7078_v44, %v8250_v14  ;;  %v1872_v28 = vmul.f32 1.442695, %v6937_v1  ;;  %v8254_v17 = vld [vmem:[#allocation65_spill] sm:$0xff] }
 0x39f   : > { %v7090_v30 = vpop.eup %5350  ;;  %v7112_v36 = vmul.f32 0.6931472, %v5349_v23  ;;  %v1880_v25 = vmul.f32 1.442695, %v6949_v8  ;;  %v1888_v58 = vmul.f32 1.442695, %v6970_v57  ;;  %v7137_v12 = vmul.f32 %v7078_v44, %v8256_v35 }
 0x3a0   : > { %v2729_v46 = vrot.slane %v2728_v5, 1  ;;  %v7093_v4 = vpop.eup %5352  ;;  %8251 = vst [vmem:[#allocation56_spill] sm:$0xff] %v7106_v19  ;;  %v7110_v33 = vmul.f32 %v7090_v30, %v6663_v60  ;;  %v7123_v60 = vmul.f32 %v7090_v30, %v8254_v17  ;;  %v2083_v1 = vrot.slane %v2082_v26, 1  ;;  %v8274_v35 = vld [vmem:[#allocation93_spill] sm:$0xff] }
 0x3a1   : > { %v7100_v43 = vpop.eup %5354  ;;  %v2109_v3 = vrot.slane %v2108_v21, 1  ;;  %8257 = vst [vmem:[#allocation57_spill] sm:$0xff] %v7137_v12  ;;  %v7141_v62 = vmin.f32 %v2069_v29, %v2070_v40  ;;  %v7143_v6 = vmin.f32 %v2095_v50, %v2096_v48  ;;  %v2899_v37 = vsub.s32 0, %v8276_v20 }
 0x3a2   : > { %v2730_v2 = vadd.f32 %v2729_v46, %v2728_v5  ;;  %v5357_v27 = vpop.eup %5356  ;;  %8252 = vst [vmem:[#allocation128_spill] sm:$0xff] %v7110_v33  ;;  %8255 = vst [vmem:[#allocation65_spill] sm:$0xff] %v7123_v60  ;;  %vm2174_vm1 = vcmask 523264   ;;  %vm2921_vm2 = vcmask 1040384  }
 0x3a3   : > { %v5359_v47 = vpop.eup %5358  ;;  %v7127_v24 = vmul.f32 0.6931472, %v5357_v27  ;;  %8258 = vst [vmem:[#allocation130_spill] sm:$0xff] %v7141_v62  ;;  %8259 = vst [vmem:[#allocation131_spill] sm:$0xff] %v7143_v6  ;;  %v8265_v27 = vld [vmem:[#allocation68_spill] sm:$0xff]  ;;  %v7171_v17 = vmin.f32 %v2108_v21, %v2109_v3 }
 0x3a4   : > { %5370 = vrcp.f32 %v2730_v2  ;;  %v7116_v39 = vpop.eup %5360  ;;  %v7131_v5 = vmul.f32 0.6931472, %v5359_v47  ;;  %v7159_v29 = vmul.f32 %v7090_v30, %v8265_v27  ;;  %v8272_v27 = vld [vmem:[#allocation110_spill] sm:$0xff] }
 0x3a5   : > { %5372 = vlog2.f32 %v2730_v2  ;;  %8253 = vst [vmem:[#allocation129_spill] sm:$0xff] %v7116_v39  ;;  %v7125_v51 = vpop.eup %5362  ;;  %v8260_v2 = vld [vmem:[#allocation58_spill] sm:$0xff]  ;;  %8270 = vst [vmem:[#allocation133_spill] sm:$0xff] %v7171_v17 }
 0x3a6   : > { %5374 = vpow2.f32 %v1844_v0  ;;  %v7129_v8 = vpop.eup %5364  ;;  %v7147_v0 = vmul.f32 %v7078_v44, %v8260_v2  ;;  %8266 = vst [vmem:[#allocation68_spill] sm:$0xff] %v7159_v29  ;;  %v2895_v3 = vld [vmem:[%s6041_s29] sm:$0xff]  ;;  %v2741_v2 = vmul.f32 %v7125_v51, %v8274_v35 }
 0x3a7   : > { %5376 = vpow2.f32 %v1852_v63  ;;  %v7139_v46 = vpop.eup %5366  ;;  %v7210_v62 = vrot.slane %v2895_v3, %v2899_v37  ;;  %v2911_v63 = vsub.s32 6, %v8276_v20 }
 0x3a8   : > { %5378 = vpow2.f32 %v1832_v16  ;;  %8261 = vst [vmem:[#allocation58_spill] sm:$0xff] %v7147_v0  ;;  %v7149_v23 = vpop.eup %5368  ;;  %v2740_v48 = vmul.f32 %v7139_v46, %v8272_v27 }
 0x3a9   : > { %5380 = vpow2.f32 %v1840_v52  ;;  %v8263_v52 = vld [vmem:[#allocation66_spill] sm:$0xff]  ;;  %v1903_v14 = vadd.f32 %v7149_v23, %v7129_v8  ;;  %v7228_v38 = vrot.slane %v7210_v62, %v2899_v37 }
 0x3aa   : > { %5382 = vpow2.f32 %v1848_v54  ;;  %v7155_v54 = vmul.f32 %v7090_v30, %v8263_v52 }
 0x3ab   : > { %5384 = vpow2.f32 %v1856_v45  ;;  %v7165_v45 = vmin.f32 %v2082_v26, %v2083_v1 }
 0x3ac   : > { %5386 = vpow2.f32 %v1872_v28  ;;  %8264 = vst [vmem:[#allocation66_spill] sm:$0xff] %v7155_v54  ;;  %v2907_v28 = vsub.s32 4, %v8276_v20 }
 0x3ad   : > { %5388 = vpow2.f32 %v1880_v25  ;;  %8268 = vst [vmem:[#allocation132_spill] sm:$0xff] %v7165_v45  ;;  %v8273_v25 = vld [vmem:[#allocation64_spill] sm:$0xff] }
 0x3ae   : > { %v7161_v50 = vpop.eup %5370  ;;  %5390 = vpow2.f32 %v1888_v58  ;;  %v8271_v58 = vld [vmem:[#allocation79_spill] sm:$0xff]  ;;  %v2779_v21 = vsub.f32 %v8273_v25, %v7112_v36  ;;  %v8278_v25 = vld [vmem:[#allocation92_spill] sm:$0xff]  ;;  %8280 = vst [vmem:[#allocation64_spill] sm:$0xff] %v7210_v62  ;;  %v8287_v62 = vld [vmem:[#allocation77_spill] sm:$0xff] }
 0x3af   : > { %v5373_v47 = vpop.eup %5372  ;;  %v2739_v1 = vmul.f32 %v7086_v15, %v8271_v58  ;;  %v2742_v27 = vmul.f32 %v7161_v50, %v7031_v22  ;;  %v2780_v17 = vsub.f32 %v8278_v25, %v7131_v5  ;;  %v2732_v29 = vmul.f32 %v7086_v15, %v8287_v62  ;;  %v8290_v62 = vld [vmem:[#allocation63_spill] sm:$0xff] }
 0x3b0   : > { %v7177_v52 = vpop.eup %5374  ;;  %v7179_v26 = vmul.f32 0.6931472, %v5373_v47  ;;  %v8275_v47 = vld [vmem:[#allocation75_spill] sm:$0xff]  ;;  %v2775_v10 = vsub.f32 %v8290_v62, %v7112_v36  ;;  %v2738_v12 = vmul.f32 %v7161_v50, %v7026_v9 }
 0x3b1   : > { %v7188_v16 = vpop.eup %5376  ;;  %v1904_v57 = vadd.f32 %v7177_v52, %v1903_v14  ;;  %v2781_v31 = vsub.f32 %v8275_v47, %v7127_v24  ;;  %v2903_v14 = vsub.s32 2, %v8276_v20  ;;  %v2811_v40 = vmul.f32 %v2779_v21, %v2739_v1 }
 0x3b2   : > { %v7196_v58 = vpop.eup %5378  ;;  %v2782_v45 = vsub.f32 %v6943_v56, %v7179_v26  ;;  %v2812_v9 = vmul.f32 %v2780_v17, %v2740_v48  ;;  %v8296_v17 = vld [vmem:[#allocation69_spill] sm:$0xff] }
 0x3b3   : > { %8277 = vst [vmem:[#allocation79_spill] sm:$0xff] %v7196_v58  ;;  %v7205_v6 = vpop.eup %5380  ;;  %v1905_v47 = vadd.f32 %v7188_v16, %v1904_v57  ;;  %v7217_v56 = vrot.slane %v2895_v3, %v2903_v14  ;;  %v7223_v55 = vmul.f32 %v2781_v31, %v2741_v2  ;;  %v7225_v57 = vrot.slane %v2895_v3, %v2907_v28 }
 0x3b4   : > { %8279 = vst [vmem:[#allocation110_spill] sm:$0xff] %v7205_v6  ;;  %v7213_v22 = vpop.eup %5382  ;;  %v1929_v25 = vadd.f32 %v7205_v6, %v7196_v58  ;;  %v2814_v21 = vmul.f32 %v2782_v45, %v2742_v27  ;;  %v7233_v14 = vrot.slane %v2895_v3, %v2911_v63 }
 0x3b5   : > { %8281 = vst [vmem:[#allocation93_spill] sm:$0xff] %v7213_v22  ;;  %8282 = vst [vmem:[#allocation75_spill] sm:$0xff] %v7217_v56  ;;  %v7220_v13 = vpop.eup %5384  ;;  %v1906_v35 = vadd.f32 %v7080_v32, %v1905_v47  ;;  %v7236_v20 = vrot.slane %v7217_v56, %v2899_v37  ;;  %v7242_v28 = vrot.slane %v7225_v57, %v2899_v37 }
 0x3b6   : > { %8283 = vst [vmem:[#allocation92_spill] sm:$0xff] %v7220_v13  ;;  %8284 = vst [vmem:[#allocation134_spill] sm:$0xff] %v7225_v57  ;;  %v7230_v11 = vpop.eup %5386  ;;  %v1930_v7 = vadd.f32 %v7213_v22, %v1929_v25  ;;  %v2951_v47 = vmul.f32 %v7228_v38, %v2739_v1  ;;  %v7251_v45 = vrot.slane %v7233_v14, %v2899_v37  ;;  %v8288_v25 = vld [vmem:[#allocation109_spill] sm:$0xff]  ;;  %v8289_v1 = vld [vmem:[#allocation90_spill] sm:$0xff] }
 0x3b7   : > { %8285 = vst [vmem:[#allocation135_spill] sm:$0xff] %v7230_v11  ;;  %8286 = vst [vmem:[#allocation136_spill] sm:$0xff] %v7233_v14  ;;  %v7238_v54 = vpop.eup %5388  ;;  %v1907_v31 = vadd.f32 %v7084_v18, %v1906_v35  ;;  %v2952_v3 = vmul.f32 %v7236_v20, %v2740_v48  ;;  %v2734_v35 = vmul.f32 %v7139_v46, %v8288_v25 }
 0x3b8   : > { %v7247_v33 = vpop.eup %5390  ;;  %v1931_v63 = vadd.f32 %v7220_v13, %v1930_v7  ;;  %v2953_v56 = vmul.f32 %v7242_v28, %v2741_v2  ;;  %v2736_v60 = vmul.f32 %v7125_v51, %v8289_v1  ;;  %v2954_v37 = vmul.f32 %v7251_v45, %v2742_v27  ;;  %v8292_v2 = vld [vmem:[#allocation74_spill] sm:$0xff]  ;;  %v8293_v1 = vld [vmem:[#allocation115_spill] sm:$0xff] }
 0x3b9   : > { %v1908_v57 = vadd.f32 %v7093_v4, %v1907_v31  ;;  %v2984_v14 = vadd.f32 %v2952_v3, %v2951_v47  ;;  %v8291_v31 = vld [vmem:[#allocation91_spill] sm:$0xff]  ;;  %v2777_v13 = vsub.f32 %v8292_v2, %v7127_v24  ;;  %v2778_v22 = vsub.f32 %v8293_v1, %v7179_v26 }
 0x3ba   : > { %v1932_v7 = vadd.f32 %v7116_v39, %v1931_v63  ;;  %v2776_v0 = vsub.f32 %v8291_v31, %v7131_v5  ;;  %v2947_v27 = vmul.f32 %v7228_v38, %v2732_v29  ;;  %v2948_v47 = vmul.f32 %v7236_v20, %v2734_v35 }
 0x3bb   : > { %v1909_v25 = vadd.f32 %v7100_v43, %v1908_v57  ;;  %v2985_v63 = vadd.f32 %v2984_v14, %v2953_v56  ;;  %v2807_v39 = vmul.f32 %v2775_v10, %v2732_v29  ;;  %v2810_v57 = vmul.f32 %v2778_v22, %v2738_v12  ;;  %v8295_v29 = vld [vmem:[#allocation60_spill] sm:$0xff] }
 0x3bc   : > { %v1933_v62 = vadd.f32 %v7230_v11, %v1932_v7  ;;  %v2809_v19 = vmul.f32 %v2777_v13, %v2736_v60  ;;  %v2949_v2 = vmul.f32 %v7242_v28, %v2736_v60  ;;  %v2950_v7 = vmul.f32 %v7251_v45, %v2738_v12  ;;  %v8294_v11 = vld [vmem:[#allocation59_spill] sm:$0xff] }
 0x3bd   : > { %v1910_v3 = vrot.slane %v1909_v25, 4  ;;  %v2986_v31 = vadd.f32 %v2985_v63, %v2954_v37  ;;  %v7278_v58 = vadd.f32 %v2814_v21, %v2810_v57  ;;  %v2979_v56 = vadd.f32 %v2948_v47, %v2947_v27  ;;  %v8298_v12 = vld [vmem:[#allocation71_spill] sm:$0xff]  ;;  %v8300_v27 = vld [vmem:[#allocation116_spill] sm:$0xff] }
 0x3be   : > { %v1934_v59 = vadd.f32 %v7238_v54, %v1933_v62  ;;  %v2808_v1 = vmul.f32 %v2776_v0, %v2734_v35  ;;  %v7284_v10 = vmul.f32 %v7078_v44, %v8294_v11  ;;  %v7288_v48 = vmul.f32 %v7078_v44, %v8295_v29  ;;  %v8299_v35 = vld [vmem:[#allocation88_spill] sm:$0xff]  ;;  %v8301_v57 = vld [vmem:[#allocation107_spill] sm:$0xff]  ;;  %v8303_v29 = vld [vmem:[#allocation98_spill] sm:$0xff] }
 0x3bf   : > { %v1911_v6 = vadd.f32 %v1910_v3, %v1909_v25  ;;  %2987 = vadd.xlane.f32.xlu1 %v2986_v31  ;;  %v2980_v60 = vadd.f32 %v2979_v56, %v2949_v2  ;;  %v7292_v22 = vmul.f32 %v7090_v30, %v8296_v17  ;;  %v7296_v21 = vmul.f32 %v7090_v30, %v8298_v12 }
 0x3c0   : > { %v1935_v14 = vadd.f32 %v7247_v33, %v1934_v59  ;;  %v2839_v0 = vadd.f32 %v2811_v40, %v2807_v39  ;;  %v2751_v37 = vmul.f32 %v7086_v15, %v8299_v35  ;;  %v2752_v47 = vmul.f32 %v7139_v46, %v8300_v27  ;;  %v8302_v40 = vld [vmem:[#allocation72_spill] sm:$0xff] }
 0x3c1   : > { %v1912_v13 = vrot.slane %v1911_v6, 2  ;;  %8297 = vst [vmem:[#allocation77_spill] sm:$0xff] %v7292_v22  ;;  %v2981_v62 = vadd.f32 %v2980_v60, %v2950_v7  ;;  %v2753_v31 = vmul.f32 %v7125_v51, %v8301_v57  ;;  %v2754_v39 = vmul.f32 %v7161_v50, %v7046_v53  ;;  %v8306_v57 = vld [vmem:[#allocation84_spill] sm:$0xff] }
 0x3c2   : > { %v1936_v59 = vrot.slane %v1935_v14, 4  ;;  %v2791_v2 = vsub.f32 %v8302_v40, %v7112_v36  ;;  %v2852_v7 = vadd.f32 %v2812_v9, %v2808_v1  ;;  %v2963_v12 = vmul.f32 %v7228_v38, %v2751_v37 }
 0x3c3   : > { %v1913_v25 = vadd.f32 %v1912_v13, %v1911_v6  ;;  %v2865_v6 = vadd.f32 %v7223_v55, %v2809_v19  ;;  %2982 = vadd.xlane.f32.xlu0 %v2981_v62  ;;  %v2792_v13 = vsub.f32 %v8303_v29, %v7131_v5  ;;  %v2794_v35 = vsub.f32 %v6963_v49, %v7179_v26  ;;  %v8307_v29 = vld [vmem:[#allocation112_spill] sm:$0xff] }
 0x3c4   : > { %v1937_v3 = vadd.f32 %v1936_v59, %v1935_v14  ;;  %v8304_v14 = vld [vmem:[#allocation86_spill] sm:$0xff]  ;;  %v2964_v59 = vmul.f32 %v7236_v20, %v2752_v47  ;;  %v7321_v27 = vmul.f32 %v2791_v2, %v2751_v37  ;;  %v2965_v9 = vmul.f32 %v7242_v28, %v2753_v31 }
 0x3c5   : > { %v1914_v56 = vrot.slane %v1913_v25, 1  ;;  %v2793_v17 = vsub.f32 %v8304_v14, %v7127_v24  ;;  %v7323_v55 = vmul.f32 %v2792_v13, %v2752_v47  ;;  %v2966_v1 = vmul.f32 %v7251_v45, %v2754_v39 }
 0x3c6   : > { %v1938_v60 = vrot.slane %v1937_v3, 2  ;;  %v2999_v62 = vadd.f32 %v2964_v59, %v2963_v12  ;;  %v2743_v40 = vmul.f32 %v7086_v15, %v8306_v57  ;;  %v2746_v47 = vmul.f32 %v7161_v50, %v7035_v42  ;;  %v8311_v12 = vld [vmem:[#allocation80_spill] sm:$0xff] }
 0x3c7   : > { %v1915_v53 = vadd.f32 %v1914_v56, %v1913_v25  ;;  %8305 = vst [vmem:[#allocation109_spill] sm:$0xff] %v7323_v55  ;;  %v2744_v25 = vmul.f32 %v7139_v46, %v8307_v29  ;;  %v8308_v56 = vld [vmem:[#allocation99_spill] sm:$0xff]  ;;  %v2785_v59 = vsub.f32 %v8311_v12, %v7127_v24  ;;  %v7344_v63 = vmul.f32 %v2793_v17, %v2753_v31  ;;  %v8313_v17 = vld [vmem:[#allocation61_spill] sm:$0xff] }
 0x3c8   : > { %v1939_v19 = vadd.f32 %v1938_v60, %v1937_v3  ;;  %v2745_v49 = vmul.f32 %v7125_v51, %v8308_v56  ;;  %v3000_v2 = vadd.f32 %v2999_v62, %v2965_v9  ;;  %v8309_v3 = vld [vmem:[#allocation67_spill] sm:$0xff]  ;;  %v8310_v60 = vld [vmem:[#allocation94_spill] sm:$0xff]  ;;  %v2955_v29 = vmul.f32 %v7228_v38, %v2743_v40 }
 0x3c9   : > { %5392 = vrcp.f32 %v1915_v53  ;;  %v2783_v13 = vsub.f32 %v8309_v3, %v7112_v36  ;;  %v2784_v14 = vsub.f32 %v8310_v60, %v7131_v5  ;;  %v8312_v53 = vld [vmem:[#allocation117_spill] sm:$0xff]  ;;  %v2956_v42 = vmul.f32 %v7236_v20, %v2744_v25 }
 0x3ca   : > { %v1940_v37 = vrot.slane %v1939_v19, 1  ;;  %v2786_v57 = vsub.f32 %v8312_v53, %v7179_v26  ;;  %v3001_v9 = vadd.f32 %v3000_v2, %v2966_v1  ;;  %v7347_v62 = vmul.f32 %v2794_v35, %v2754_v39  ;;  %v8314_v1 = vld [vmem:[#allocation62_spill] sm:$0xff] }
 0x3cb   : > { %v2815_v3 = vmul.f32 %v2783_v13, %v2743_v40  ;;  %v2816_v11 = vmul.f32 %v2784_v14, %v2744_v25  ;;  %v2817_v60 = vmul.f32 %v2785_v59, %v2745_v49  ;;  %v2957_v12 = vmul.f32 %v7242_v28, %v2745_v49  ;;  %v8315_v25 = vld [vmem:[#allocation73_spill] sm:$0xff]  ;;  %v8317_v2 = vld [vmem:[#allocation102_spill] sm:$0xff] }
 0x3cc   : > { %v1941_v56 = vadd.f32 %v1940_v37, %v1939_v19  ;;  %v2818_v55 = vmul.f32 %v2786_v57, %v2746_v47  ;;  %3002 = vadd.xlane.f32.xlu1 %v3001_v9  ;;  %v2989_v22 = vadd.f32 %v2956_v42, %v2955_v29  ;;  %v2958_v31 = vmul.f32 %v7251_v45, %v2746_v47 }
 0x3cd   : > { %v7350_v53 = vadd.f32 %v2839_v0, %v2815_v3  ;;  %v7358_v39 = vmul.f32 %v7078_v44, %v8313_v17  ;;  %v7362_v40 = vmul.f32 %v7078_v44, %v8314_v1  ;;  %v7366_v49 = vmul.f32 %v7090_v30, %v8315_v25  ;;  %v8316_v0 = vld [vmem:[#allocation76_spill] sm:$0xff] }
 0x3ce   : > { %5394 = vrcp.f32 %v1941_v56  ;;  %v7353_v19 = vadd.f32 %v7278_v58, %v2818_v55  ;;  %v2990_v35 = vadd.f32 %v2989_v22, %v2957_v12  ;;  %v7370_v37 = vmul.f32 %v7090_v30, %v8316_v0  ;;  %v8318_v30 = vld [vmem:[#allocation114_spill] sm:$0xff] }
 0x3cf   : > { %v7372_v58 = vadd.f32 %v2865_v6, %v2817_v60  ;;  %v7374_v55 = vadd.f32 %v2852_v7, %v2816_v11  ;;  %v2759_v47 = vmul.f32 %v7086_v15, %v8317_v2  ;;  %v7380_v22 = vmul.f32 %v7139_v46, %v6982_v61  ;;  %v8319_v7 = vld [vmem:[#allocation81_spill] sm:$0xff]  ;;  %v8320_v61 = vld [vmem:[#allocation95_spill] sm:$0xff] }
 0x3d0   : > { %v2991_v44 = vadd.f32 %v2990_v35, %v2958_v31  ;;  %v2160_v13 = vpack.c.bf16 %v7362_v40, %v7358_v39  ;;  %v2162_v14 = vpack.c.bf16 %v7370_v37, %v7366_v49  ;;  %v2761_v6 = vmul.f32 %v7125_v51, %v8318_v30  ;;  %v5051_v37 = vld [vmem:[#allocation9 + $0x8] sm:$0xff]  }
 0x3d1   : > { %v2762_v11 = vmul.f32 %v7161_v50, %v7058_v41  ;;  %v2799_v57 = vsub.f32 %v8319_v7, %v7112_v36  ;;  %v2801_v29 = vsub.f32 %v8320_v61, %v7127_v24  ;;  %v2802_v56 = vsub.f32 %v6994_v34, %v7179_v26  ;;  %v8321_v34 = vld [vmem:[#allocation103_spill] sm:$0xff] }
 0x3d2   : > { %2992 = vadd.xlane.f32.xlu0 %v2991_v44  ;;  %v8322_v44 = vld [vmem:[#allocation79_spill] sm:$0xff] }
 0x3d3   : > { %v5393_v59 = vpop.eup %5392  ;;  %v7406_v25 = vmul.f32 %v2799_v57, %v2759_v47  ;;  %v7408_v0 = vmul.f32 %v2801_v29, %v2761_v6  ;;  %v2974_v2 = vmul.f32 %v7251_v45, %v2762_v11  ;;  %v8324_v57 = vld [vmem:[#allocation56_spill] sm:$0xff]  ;;  %v8325_v61 = vld [vmem:[#allocation127_spill] sm:$0xff] }
 0x3d4   : > { %v1945_v9 = vmul.f32 %v5393_v59, %v7129_v8  ;;  %v1951_v42 = vmul.f32 %v5393_v59, %v7149_v23  ;;  %v1955_v3 = vmul.f32 %v5393_v59, %v7177_v52  ;;  %v1959_v60 = vmul.f32 %v5393_v59, %v7188_v16 }
 0x3d5   : > { %v1963_v41 = vmul.f32 %v5393_v59, %v7080_v32  ;;  %v1967_v12 = vmul.f32 %v5393_v59, %v7084_v18  ;;  %v1971_v31 = vmul.f32 %v5393_v59, %v7093_v4  ;;  %v1975_v17 = vmul.f32 %v5393_v59, %v7100_v43  ;;  %v8323_v59 = vld [vmem:[#allocation110_spill] sm:$0xff] }
 0x3d6   : > { %v2149_v35 = vpack.c.bf16 %v1951_v42, %v1945_v9  ;;  %v2153_v1 = vpack.c.bf16 %v1959_v60, %v1955_v3  ;;  %v2800_v8 = vsub.f32 %v8321_v34, %v7131_v5  ;;  %v7410_v16 = vmul.f32 %v2802_v56, %v2762_v11  ;;  %v8327_v56 = vld [vmem:[#allocation93_spill] sm:$0xff]  ;;  %v8328_v42 = vld [vmem:[#allocation92_spill] sm:$0xff] }
 0x3d7   : > { %v2157_v23 = vpack.c.bf16 %v1967_v12, %v1963_v41  ;;  %v2161_v52 = vpack.c.bf16 %v1975_v17, %v1971_v31  ;;  %v2971_v18 = vmul.f32 %v7228_v38, %v2759_v47  ;;  %v2972_v4 = vmul.f32 %v7236_v20, %v7380_v22  ;;  %v8329_v47 = vld [vmem:[#allocation129_spill] sm:$0xff]  ;;  %v8330_v41 = vld [vmem:[#allocation135_spill] sm:$0xff] }
 0x3d8   : > { %v5395_v32 = vpop.eup %5394  ;;  %2181 = vmatprep.subr.bf16.mxu0 %v2149_v35  ;;  %v2973_v43 = vmul.f32 %v7242_v28, %v2761_v6  ;;  %v8326_v29 = vpack.c.bf16 %v8324_v57, %v8325_v61 }
 0x3d9   : > { %v1949_v30 = vmul.f32 %v5395_v32, %v8322_v44  ;;  %v1953_v7 = vmul.f32 %v5395_v32, %v8323_v59  ;;  %v1957_v9 = vmul.f32 %v5395_v32, %v8327_v56  ;;  %v1961_v3 = vmul.f32 %v5395_v32, %v8328_v42  ;;  %v8331_v44 = vld [vmem:[#allocation87_spill] sm:$0xff] }
 0x3da   : > { %2182 = vmatpush1.bf16.msra.mxu0 %v8326_v29  ;;  %v1965_v60 = vmul.f32 %v5395_v32, %v8329_v47  ;;  %v1969_v12 = vmul.f32 %v5395_v32, %v8330_v41  ;;  %v1973_v6 = vmul.f32 %v5395_v32, %v7238_v54  ;;  %v1977_v11 = vmul.f32 %v5395_v32, %v7247_v33  ;;  %v8332_v29 = vld [vmem:[#allocation113_spill] sm:$0xff]  ;;  %v8334_v47 = vld [vmem:[#allocation58_spill] sm:$0xff]  ;;  %v8337_v32 = vld [vmem:[#allocation124_spill] sm:$0xff] }
 0x3db   : > { %2183 = vmatprep.subr.bf16.mxu0 %v2153_v1  ;;  %v2151_v31 = vpack.c.bf16 %v1953_v7, %v1949_v30  ;;  %v2155_v17 = vpack.c.bf16 %v1961_v3, %v1957_v9  ;;  %v3009_v35 = vadd.f32 %v2972_v4, %v2971_v18  ;;  %v2747_v59 = vmul.f32 %v7086_v15, %v8331_v44  ;;  %v8333_v1 = vld [vmem:[#allocation104_spill] sm:$0xff]  ;;  %v8335_v41 = vld [vmem:[#allocation57_spill] sm:$0xff]  ;;  %v8338_v4 = vld [vmem:[#allocation70_spill] sm:$0xff] }
 0x3dc   : > { %v2159_v57 = vpack.c.bf16 %v1969_v12, %v1965_v60  ;;  %v2163_v61 = vpack.c.bf16 %v1977_v11, %v1973_v6  ;;  %v2748_v56 = vmul.f32 %v7139_v46, %v8332_v29  ;;  %v2749_v42 = vmul.f32 %v7125_v51, %v8333_v1  ;;  %v8339_v7 = vld [vmem:[#allocation65_spill] sm:$0xff]  ;;  %v8340_v9 = vld [vmem:[#allocation128_spill] sm:$0xff]  ;;  %v8343_v6 = vld [vmem:[#allocation82_spill] sm:$0xff] }
 0x3dd   : > { %2234 = vmatprep.subr.bf16.mxu1 %v2151_v31  ;;  %v8336_v54 = vpack.c.bf16 %v8334_v47, %v8335_v41  ;;  %v3010_v33 = vadd.f32 %v3009_v35, %v2973_v43  ;;  %v2750_v18 = vmul.f32 %v7161_v50, %v8337_v32  ;;  %v2787_v30 = vsub.f32 %v8338_v4, %v7112_v36  ;;  %v8342_v60 = vld [vmem:[#allocation96_spill] sm:$0xff]  ;;  %v8344_v31 = vld [vmem:[#allocation118_spill] sm:$0xff] }
 0x3de   : > { %v8341_v3 = vpack.c.bf16 %v8339_v7, %v8340_v9  ;;  %v2788_v12 = vsub.f32 %v8342_v60, %v7131_v5  ;;  %v2789_v11 = vsub.f32 %v8343_v6, %v7127_v24  ;;  %v2790_v43 = vsub.f32 %v8344_v31, %v7179_v26  ;;  %v8350_v9 = vld [vmem:[#allocation119_spill] sm:$0xff] }
 0x3df   : > { %2184 = vmatpush1.bf16.msra.mxu0 %v8336_v54  ;;  %v3011_v35 = vadd.f32 %v3010_v33, %v2974_v2  ;;  %v2819_v44 = vmul.f32 %v2787_v30, %v2747_v59  ;;  %v2959_v29 = vmul.f32 %v7228_v38, %v2747_v59  ;;  %v2960_v1 = vmul.f32 %v7236_v20, %v2748_v56  ;;  %v8346_v33 = vld [vmem:[#allocation68_spill] sm:$0xff]  ;;  %v8347_v30 = vld [vmem:[#allocation66_spill] sm:$0xff] }
 0x3e0   : > { %2235 = vmatpush1.bf16.msra.mxu1 %v8341_v3  ;;  %2185 = vmatprep.subr.bf16.mxu0 %v2157_v23  ;;  %v2820_v47 = vmul.f32 %v2788_v12, %v2748_v56  ;;  %v2821_v41 = vmul.f32 %v2789_v11, %v2749_v42  ;;  %v2822_v54 = vmul.f32 %v2790_v43, %v2750_v18  ;;  %v8351_v3 = vld [vmem:[#allocation111_spill] sm:$0xff]  ;;  %v5050_v12 = vld [vmem:[#allocation9] sm:$0xff]  }
 0x3e1   : > { %2236 = vmatprep.subr.bf16.mxu1 %v2155_v17  ;;  %v2961_v23 = vmul.f32 %v7242_v28, %v2749_v42  ;;  %v8345_v32 = vpack.c.bf16 %v7288_v48, %v7284_v10  ;;  %3012 = vadd.xlane.f32.xlu1 %v3011_v35  ;;  %v2841_v4 = vadd.f32 %v7350_v53, %v2819_v44  ;;  %v8349_v48 = vld [vmem:[#allocation97_spill] sm:$0xff] }
 0x3e2   : > { %v2962_v17 = vmul.f32 %v7251_v45, %v2750_v18  ;;  %v2994_v2 = vadd.f32 %v2960_v1, %v2959_v29  ;;  %v8348_v59 = vpack.c.bf16 %v8346_v33, %v8347_v30  ;;  %v2867_v56 = vadd.f32 %v7372_v58, %v2821_v41  ;;  %v8353_v58 = vld [vmem:[#allocation78_spill] sm:$0xff]  ;;  %v8355_v11 = vld [vmem:[#allocation89_spill] sm:$0xff] }
 0x3e3   : > { %2186 = vmatpush1.bf16.msra.mxu0 %v8345_v32  ;;  %v2880_v42 = vadd.f32 %v7353_v19, %v2822_v54  ;;  %v2854_v7 = vadd.f32 %v7374_v55, %v2820_v47  ;;  %v2755_v53 = vmul.f32 %v7086_v15, %v8349_v48  ;;  %v2756_v18 = vmul.f32 %v7139_v46, %v8350_v9  ;;  %v8354_v55 = vld [vmem:[#allocation100_spill] sm:$0xff]  ;;  %v8356_v35 = vld [vmem:[#allocation121_spill] sm:$0xff]  ;;  %v8364_v9 = vld [vmem:[#allocation126_spill] sm:$0xff] }
 0x3e4   : > { %2237 = vmatpush1.bf16.msra.mxu1 %v8348_v59  ;;  %2187 = vmatprep.subr.bf16.mxu0 %v2161_v52  ;;  %v2995_v10 = vadd.f32 %v2994_v2, %v2961_v23  ;;  %v2757_v60 = vmul.f32 %v7125_v51, %v8351_v3  ;;  %v8352_v52 = vld [vmem:[#allocation125_spill] sm:$0xff]  ;;  %v2795_v19 = vsub.f32 %v8353_v58, %v7112_v36  ;;  %v8363_v48 = vld [vmem:[#allocation120_spill] sm:$0xff]  ;;  %v8369_v58 = vld [vmem:[#allocation123_spill] sm:$0xff] }
 0x3e5   : > { %2238 = vmatprep.subr.bf16.mxu1 %v2159_v57  ;;  %v2758_v6 = vmul.f32 %v7161_v50, %v8352_v52  ;;  %v2796_v57 = vsub.f32 %v8354_v55, %v7131_v5  ;;  %v2797_v31 = vsub.f32 %v8355_v11, %v7127_v24  ;;  %v2798_v44 = vsub.f32 %v8356_v35, %v7179_v26  ;;  %v8357_v47 = vld [vmem:[#allocation77_spill] sm:$0xff] }
 0x3e6   : > { %v2996_v43 = vadd.f32 %v2995_v10, %v2962_v17  ;;  %v2842_v29 = vadd.f32 %v2841_v4, %v7321_v27  ;;  %v2868_v1 = vadd.f32 %v2867_v56, %v7344_v63  ;;  %v8358_v41 = vpack.c.bf16 %v7296_v21, %v8357_v47  ;;  %v8359_v30 = vld [vmem:[#allocation109_spill] sm:$0xff] }
 0x3e7   : > { %2188 = vmatpush1.bf16.msra.mxu0 %v2160_v13  ;;  %v2827_v54 = vmul.f32 %v2795_v19, %v2755_v53  ;;  %v2828_v23 = vmul.f32 %v2796_v57, %v2756_v18  ;;  %v2829_v32 = vmul.f32 %v2797_v31, %v2757_v60  ;;  %v2881_v2 = vadd.f32 %v2880_v42, %v7347_v62  ;;  %v8362_v42 = vld [vmem:[#allocation122_spill] sm:$0xff]  ;;  %v8365_v52 = vld [vmem:[#allocation85_spill] sm:$0xff] }
 0x3e8   : > { %2239 = vmatpush1.bf16.msra.mxu1 %v8358_v41  ;;  %2997 = vadd.xlane.f32.xlu0 %v2996_v43  ;;  %v2830_v39 = vmul.f32 %v2798_v44, %v2758_v6  ;;  %v2967_v40 = vmul.f32 %v7228_v38, %v2755_v53  ;;  %v2968_v13 = vmul.f32 %v7236_v20, %v2756_v18  ;;  %v8360_v62 = vmov 0   ;;  %v8373_v44 = vld [vmem:[#allocation130_spill] sm:$0xff] }
 0x3e9   : > { %2240 = vmatprep.subr.bf16.mxu1 %v2163_v61  ;;  %v2843_v27 = vadd.f32 %v2842_v29, %v2827_v54  ;;  %v2869_v63 = vadd.f32 %v2868_v1, %v2829_v32  ;;  %v2969_v4 = vmul.f32 %v7242_v28, %v2757_v60  ;;  %v2970_v21 = vmul.f32 %v7251_v45, %v2758_v6  ;;  %v8361_v61 = vld [vmem:[#allocation105_spill] sm:$0xff]  ;;  %v8374_v1 = vld [vmem:[#allocation131_spill] sm:$0xff] }
 0x3ea   : > { %4568 = vmatmul.mubr.msk.bf16.vlgmr.msra.gmra.mrb[24].mxu0 %vm2174_vm1, %v5050_v12  ;;  %v2882_v17 = vadd.f32 %v2881_v2, %v2830_v39  ;;  %v3004_v33 = vadd.f32 %v2968_v13, %v2967_v40  ;;  %v2855_v59 = vadd.f32 %v2854_v7, %v8359_v30  ;;  %v2763_v56 = vmul.f32 %v7086_v15, %v8361_v61 }
 0x3eb   : > { %2223 = vmatprep.mubr.bf16.mxu0 %v8360_v62  ;;  %v2764_v10 = vmul.f32 %v7139_v46, %v8362_v42  ;;  %v2765_v53 = vmul.f32 %v7125_v51, %v8363_v48  ;;  %v2766_v18 = vmul.f32 %v7161_v50, %v8364_v9  ;;  %v2844_v7 = vadd.f32 %v2843_v27, %v7406_v25  ;;  %v8367_v51 = vld [vmem:[#allocation101_spill] sm:$0xff] }
 0x3ec   : > { %2241 = vmatpush1.bf16.msra.mxu1 %v2162_v14  ;;  %v3005_v3 = vadd.f32 %v3004_v33, %v2969_v4  ;;  %v2856_v60 = vadd.f32 %v2855_v59, %v2828_v23  ;;  %v8366_v15 = vsub.f32 %v8365_v52, %v7112_v36  ;;  %v2870_v49 = vadd.f32 %v2869_v63, %v7408_v0  ;;  %v8375_v23 = vld [vmem:[#allocation132_spill] sm:$0xff] }
 0x3ed   : > { %v2832_v46 = vmul.f32 %v2800_v8, %v7380_v22  ;;  %v8368_v14 = vsub.f32 %v8367_v51, %v7127_v24  ;;  %v8370_v25 = vsub.f32 %v8369_v58, %v7179_v26  ;;  %v2883_v55 = vadd.f32 %v2882_v17, %v7410_v16  ;;  %v8371_v22 = vld [vmem:[#allocation106_spill] sm:$0xff] }
 0x3ee   : > { %v2835_v6 = vmul.f32 %v8366_v15, %v2763_v56  ;;  %v3006_v36 = vadd.f32 %v3005_v3, %v2970_v21  ;;  %v2975_v57 = vmul.f32 %v7228_v38, %v2763_v56  ;;  %v2976_v34 = vmul.f32 %v7236_v20, %v2764_v10 }
 0x3ef   : > { %v2837_v50 = vmul.f32 %v8368_v14, %v2765_v53  ;;  %v2838_v19 = vmul.f32 %v8370_v25, %v2766_v18  ;;  %4570 = vmatmul.mubr.msk.bf16.vlgmr.msra.gmra.mrb[24].mxu1 %vm2174_vm1, %v5050_v12  ;;  %v8372_v24 = vsub.f32 %v8371_v22, %v7131_v5  ;;  %v2977_v26 = vmul.f32 %v7242_v28, %v2765_v53  ;;  %v8376_v28 = vld [vmem:[#allocation133_spill] sm:$0xff]  ;;  %v8378_v25 = vld [vmem:[#allocation46_spill] sm:$0xff] }
 0x3f0   : > { %v2845_v0 = vadd.f32 %v2844_v7, %v2835_v6  ;;  %2276 = vmatprep.mubr.bf16.mxu1 %v8360_v62  ;;  %3007 = vadd.xlane.f32.xlu0 %v3006_v36  ;;  %v2978_v12 = vmul.f32 %v7251_v45, %v2766_v18  ;;  %v3014_v43 = vadd.f32 %v2976_v34, %v2975_v57  ;;  %v4744_v38 = vtrunc.f32 %v8373_v44  ;;  %v8379_v34 = vld [vmem:[#allocation75_spill] sm:$0xff] }
 0x3f1   : > { %v2836_v8 = vmul.f32 %v8372_v24, %v2764_v10  ;;  %v2871_v11 = vadd.f32 %v2870_v49, %v2837_v50  ;;  %v2884_v31 = vadd.f32 %v2883_v55, %v2838_v19  ;;  %v2857_v35 = vadd.f32 %v2856_v60, %v2832_v46  ;;  %v8377_v50 = vld [vmem:[#allocation64_spill] sm:$0xff]  ;;  %v8380_v24 = vld [vmem:[#allocation134_spill] sm:$0xff] }
 0x3f2   : > { %v2846_v16 = vrot.slane %v2845_v0, 4  ;;  %4569 = vmatmul.mubr.msk.bf16.gmra.mrb[28].mxu0 %vm2174_vm1, %v5051_v37  ;;  %v4748_v47 = vtrunc.f32 %v8374_v1  ;;  %v3015_v5 = vadd.f32 %v3014_v43, %v2977_v26  ;;  %v4746_v32 = vtrunc.f32 %v8375_v23  ;;  %v5058_v23 = vld [vmem:[%s6033_s17 + $0x20] ss:$16 sps:$4 sm:$0xff]  }
 0x3f3   : > { %v2872_v29 = vrot.slane %v2871_v11, 4  ;;  %v2885_v20 = vrot.slane %v2884_v31, 4  ;;  %v2858_v41 = vadd.f32 %v2857_v35, %v2836_v8  ;;  %v4750_v2 = vtrunc.f32 %v8376_v28  ;;  %v5061_v28 = vld [vmem:[%s6033_s17 + $0x28] ss:$16 sps:$4 sm:$0xff]  }
 0x3f4   : > { %v2847_v54 = vadd.f32 %v2846_v16, %v2845_v0  ;;  %v3016_v45 = vadd.f32 %v3015_v5, %v2978_v12  ;;  %v7537_v21 = vcvt.f32.s32 %v4744_v38  ;;  %v7539_v17 = vcvt.f32.s32 %v4748_v47  ;;  %v8382_v16 = vld [vmem:[#allocation136_spill] sm:$0xff]  ;;  %v5054_v47 = vld [vmem:[%s6033_s17 + $0x4] ss:$16 sps:$4 sm:$0xff]  }
 0x3f5   : > { %v2873_v39 = vadd.f32 %v2872_v29, %v2871_v11  ;;  %v2886_v40 = vadd.f32 %v2885_v20, %v2884_v31  ;;  %v2859_v13 = vrot.slane %v2858_v41, 4  ;;  %v7542_v59 = vcvt.f32.s32 %v4746_v32  ;;  %v5057_v5 = vld [vmem:[%s6033_s17 + $0xc] ss:$16 sps:$4 sm:$0xff]   ;;  %3897 = vmatprep.subr.bf16.mxu0 %v5054_v47  ;;  %v5060_v32 = vld [vmem:[%s6033_s17 + $0x24] ss:$16 sps:$4 sm:$0xff]  }
 0x3f6   : > { %v2848_v27 = vrot.slane %v2847_v54, 2  ;;  %3017 = vadd.xlane.f32.xlu0 %v3016_v45  ;;  %v7544_v62 = vcvt.f32.s32 %v4750_v2  ;;  %v5726_v7 = vmov 1966171168   ;;  %v8381_v26 = vlaneseq  ;;  %4003 = vmatprep.subr.bf16.mxu1 %v5057_v5  ;;  %v5063_v2 = vld [vmem:[%s6033_s17 + $0x2c] ss:$16 sps:$4 sm:$0xff]  }
 0x3f7   : > { %v2874_v63 = vrot.slane %v2873_v39, 2  ;;  %v2887_v4 = vrot.slane %v2886_v40, 2  ;;  %4571 = vmatmul.mubr.msk.bf16.gmra.mrb[28].mxu1 %vm2174_vm1, %v5051_v37  ;;  %v2860_v30 = vadd.f32 %v2859_v13, %v2858_v41  ;;  %v2118_v3 = vunpack.c.l.s4 %v5726_v7  ;;  %v5052_v41 = vld [vmem:[%s6033_s17] ss:$16 sps:$4 sm:$0xff]   ;;  %v5067_v13 = vld [vmem:[%s6033_s17 + $0x48] ss:$16 sps:$4 sm:$0xff]  }
 0x3f8   : > { %v2849_v33 = vadd.f32 %v2848_v27, %v2847_v54  ;;  %v2115_v52 = vcombine.low %v7537_v21, %v7542_v59  ;;  %v2116_v15 = vcombine.low %v7539_v17, %v7544_v62  ;;  %vm2141_vm3 = vcmp.lt.s32.totalorder %v8381_v26, 512  ;;  %v5055_v54 = vld [vmem:[%s6033_s17 + $0x8] ss:$16 sps:$4 sm:$0xff]   ;;  %3898 = vmatpush1.bf16.msra.mxu0 %v5052_v41  ;;  %v5064_v45 = vld [vmem:[%s6033_s17 + $0x40] ss:$16 sps:$4 sm:$0xff]  }
 0x3f9   : > { %v2875_v61 = vadd.f32 %v2874_v63, %v2873_v39  ;;  %v2888_v56 = vadd.f32 %v2887_v4, %v2886_v40  ;;  %v2861_v10 = vrot.slane %v2860_v30, 2  ;;  %v2119_v37 = vunpack.c.0.s8 %v2118_v3  ;;  %4004 = vmatpush1.bf16.msra.mxu1 %v5055_v54  ;;  %v5066_v39 = vld [vmem:[%s6033_s17 + $0x44] ss:$16 sps:$4 sm:$0xff]   ;;  %3899 = vmatprep.subr.bf16.mxu0 %v5060_v32  ;;  %v5069_v40 = vld [vmem:[%s6033_s17 + $0x4c] ss:$16 sps:$4 sm:$0xff]  }
 0x3fa   : > { %v2850_v42 = vrot.slane %v2849_v33, 1  ;;  %4005 = vmatprep.subr.bf16.mxu1 %v5063_v2  ;;  %v5072_v27 = vld [vmem:[%s6033_s17 + $0x64] ss:$16 sps:$4 sm:$0xff]   ;;  %v5075_v63 = vld [vmem:[%s6033_s17 + $0x6c] ss:$16 sps:$4 sm:$0xff]   ;;  %vm2355_vm4 = vcmp.eq.s32.totalorder %v8378_v25, %v7537_v21  ;;  %vm2356_vm6 = vcmp.eq.s32.totalorder %v8378_v25, %v7542_v59  ;;  %vm2357_vm8 = vcmp.eq.s32.totalorder %v8378_v25, %v7539_v17 }
 0x3fb   : > { %v2876_v48 = vrot.slane %v2875_v61, 1  ;;  %v2889_v53 = vrot.slane %v2888_v56, 1  ;;  %v2862_v18 = vadd.f32 %v2861_v10, %v2860_v30  ;;  %v2122_v19 = vsub.s32 %v2119_v37, %v8378_v25  ;;  %v5070_v4 = vld [vmem:[%s6033_s17 + $0x60] ss:$16 sps:$4 sm:$0xff]   ;;  %v5084_v10 = vld [vmem:[%s6033_s17 + $0xa4] ss:$16 sps:$4 sm:$0xff]  }
 0x3fc   : > { %v2851_v9 = vadd.f32 %v2850_v42, %v2849_v33  ;;  %3900 = vmatpush1.bf16.msra.mxu0 %v5058_v23  ;;  %v5073_v33 = vld [vmem:[%s6033_s17 + $0x68] ss:$16 sps:$4 sm:$0xff]   ;;  %v5076_v30 = vld [vmem:[%s6033_s17 + $0x80] ss:$16 sps:$4 sm:$0xff]   ;;  %v5081_v42 = vld [vmem:[%s6033_s17 + $0x8c] ss:$16 sps:$4 sm:$0xff]   ;;  %vm2358_vm13 = vcmp.eq.s32.totalorder %v8378_v25, %v7544_v62 }
 0x3fd   : > { %v2877_v60 = vadd.f32 %v2876_v48, %v2875_v61  ;;  %v2863_v6 = vrot.slane %v2862_v18, 1  ;;  %v2890_v49 = vadd.f32 %v2889_v53, %v2888_v56  ;;  %v2123_v0 = vrot.slane %v2115_v52, %v2122_v19  ;;  %4006 = vmatpush1.bf16.msra.mxu1 %v5061_v28  ;;  %3901 = vmatprep.subr.bf16.mxu0 %v5066_v39  ;;  %v5078_v61 = vld [vmem:[%s6033_s17 + $0x84] ss:$16 sps:$4 sm:$0xff]   ;;  %v5079_v56 = vld [vmem:[%s6033_s17 + $0x88] ss:$16 sps:$4 sm:$0xff]   ;;  %v2398_v39 = vpop.permute.xlu0 %2397 }
 0x3fe   : > { %v2891_v46 = vsub.f32 0.0, %v2851_v9  ;;  %v2130_v57 = vrot.slane %v2116_v15, %v2122_v19  ;;  %4007 = vmatprep.subr.bf16.mxu1 %v5069_v40  ;;  %v5087_v48 = vld [vmem:[%s6033_s17 + $0xac] ss:$16 sps:$4 sm:$0xff]   ;;  %v5082_v53 = vld [vmem:[%s6033_s17 + $0xa0] ss:$16 sps:$4 sm:$0xff]  }
 0x3ff   : > { %v2864_v51 = vadd.f32 %v2863_v6, %v2862_v18  ;;  %v2893_v14 = vsub.f32 0.0, %v2877_v60  ;;  %v2894_v36 = vsub.f32 0.0, %v2890_v49  ;;  %v5085_v9 = vld [vmem:[%s6033_s17 + $0xa8] ss:$16 sps:$4 sm:$0xff]   ;;  %v5090_v18 = vld [vmem:[%s6033_s17 + $0xc4] ss:$16 sps:$4 sm:$0xff]  }
 0x400   : > { %v2917_v58 = vmul.f32 %v8377_v50, %v2891_v46  ;;  %v2131_v31 = vcombine.low %v2123_v0, %v2130_v57  ;;  %3902 = vmatpush1.bf16.msra.mxu0 %v5064_v45  ;;  %v5093_v7 = vld [vmem:[%s6033_s17 + $0xcc] ss:$16 sps:$4 sm:$0xff]   ;;  %v5088_v3 = vld [vmem:[%s6033_s17 + $0xc0] ss:$16 sps:$4 sm:$0xff]   ;;  %v5091_v60 = vld [vmem:[%s6033_s17 + $0xc8] ss:$16 sps:$4 sm:$0xff]  }
 0x401   : > { %v2892_v55 = vsub.f32 0.0, %v2864_v51  ;;  %v2919_v8 = vmul.f32 %v8380_v24, %v2893_v14  ;;  %v2920_v12 = vmul.f32 %v8382_v16, %v2894_v36  ;;  %4008 = vmatpush1.bf16.msra.mxu1 %v5067_v13  ;;  %3903 = vmatprep.subr.bf16.mxu0 %v5072_v27  ;;  %v5096_v52 = vld [vmem:[%s6033_s17 + $0xe4] ss:$16 sps:$4 sm:$0xff]   ;;  %v5099_v15 = vld [vmem:[%s6033_s17 + $0xec] ss:$16 sps:$4 sm:$0xff]   ;;  %v2403_v45 = vpop.permute.xlu0 %2402  ;;  %v2435_v13 = vsel %vm2355_vm4, %v2398_v39, 0.0 }
 0x402   : > { %v2922_v11 = vsel %vm2921_vm2, %v2917_v58, 0.0  ;;  %v2138_v35 = vrot.slane %v2131_v31, %v2122_v19  ;;  %4009 = vmatprep.subr.bf16.mxu1 %v5075_v63  ;;  %v5094_v6 = vld [vmem:[%s6033_s17 + $0xe0] ss:$16 sps:$4 sm:$0xff]   ;;  %v5097_v49 = vld [vmem:[%s6033_s17 + $0xe8] ss:$16 sps:$4 sm:$0xff]   ;;  %v2436_v63 = vsel %vm2356_vm6, %v2398_v39, 0.0 }
 0x403   : > { %v2918_v22 = vmul.f32 %v8379_v34, %v2892_v55  ;;  %v2925_v38 = vsel %vm2921_vm2, %v2919_v8, 0.0  ;;  %v2927_v20 = vsel %vm2921_vm2, %v2920_v12, 0.0  ;;  %v5102_v46 = vld [vmem:[%s6033_s17 + $0x104] ss:$16 sps:$4 sm:$0xff]   ;;  %v5105_v37 = vld [vmem:[%s6033_s17 + $0x10c] ss:$16 sps:$4 sm:$0xff]  }
 0x404   : > { %2143 = vst.msk [vmem:[%s6048_s19] sm:$0xf] %vm2141_vm3, %v2138_v35  ;;  %3904 = vmatpush1.bf16.msra.mxu0 %v5070_v4  ;;  %v5100_v51 = vld [vmem:[%s6033_s17 + $0x100] ss:$16 sps:$4 sm:$0xff]   ;;  %v5103_v14 = vld [vmem:[%s6033_s17 + $0x108] ss:$16 sps:$4 sm:$0xff]  }
 0x405   : > { %v2923_v43 = vsel %vm2921_vm2, %v2918_v22, 0.0  ;;  %4010 = vmatpush1.bf16.msra.mxu1 %v5073_v33  ;;  %3905 = vmatprep.subr.bf16.mxu0 %v5078_v61  ;;  %v5108_v50 = vld [vmem:[%s6033_s17 + $0x124] ss:$16 sps:$4 sm:$0xff]   ;;  %v5111_v58 = vld [vmem:[%s6033_s17 + $0x12c] ss:$16 sps:$4 sm:$0xff]   ;;  %v2408_v33 = vpop.permute.xlu1 %2407  ;;  %v2437_v61 = vsel %vm2357_vm8, %v2398_v39, 0.0 }
 0x406   : > { %v2924_v44 = vadd.f32 %v2923_v43, %v2922_v11  ;;  %4011 = vmatprep.subr.bf16.mxu1 %v5081_v42  ;;  %v5106_v19 = vld [vmem:[%s6033_s17 + $0x120] ss:$16 sps:$4 sm:$0xff]   ;;  %v5109_v55 = vld [vmem:[%s6033_s17 + $0x128] ss:$16 sps:$4 sm:$0xff]   ;;  %v5114_v36 = vld [vmem:[%s6033_s17 + $0x144] ss:$16 sps:$4 sm:$0xff]  }
 0x407   : > { %v5117_v0 = vld [vmem:[%s6033_s17 + $0x14c] ss:$16 sps:$4 sm:$0xff]   ;;  %v5112_v57 = vld [vmem:[%s6033_s17 + $0x140] ss:$16 sps:$4 sm:$0xff]   ;;  %v5115_v34 = vld [vmem:[%s6033_s17 + $0x148] ss:$16 sps:$4 sm:$0xff]  }
 0x408   : > { %v2926_v29 = vadd.f32 %v2925_v38, %v2924_v44  ;;  %3906 = vmatpush1.bf16.msra.mxu0 %v5076_v30  ;;  %v5120_v22 = vld [vmem:[%s6033_s17 + $0x164] ss:$16 sps:$4 sm:$0xff]   ;;  %v5123_v24 = vld [vmem:[%s6033_s17 + $0x16c] ss:$16 sps:$4 sm:$0xff]   ;;  %v5118_v8 = vld [vmem:[%s6033_s17 + $0x160] ss:$16 sps:$4 sm:$0xff]  }
 0x409   : > { %4012 = vmatpush1.bf16.msra.mxu1 %v5079_v56  ;;  %3907 = vmatprep.subr.bf16.mxu0 %v5084_v10  ;;  %v5121_v11 = vld [vmem:[%s6033_s17 + $0x168] ss:$16 sps:$4 sm:$0xff]   ;;  %v5126_v31 = vld [vmem:[%s6033_s17 + $0x184] ss:$16 sps:$4 sm:$0xff]   ;;  %v5129_v16 = vld [vmem:[%s6033_s17 + $0x18c] ss:$16 sps:$4 sm:$0xff]  }
 0x40a   : > { %v2928_v1 = vadd.f32 %v2927_v20, %v2926_v29  ;;  %4013 = vmatprep.subr.bf16.mxu1 %v5087_v48  ;;  %v5124_v12 = vld [vmem:[%s6033_s17 + $0x180] ss:$16 sps:$4 sm:$0xff]   ;;  %v5127_v43 = vld [vmem:[%s6033_s17 + $0x188] ss:$16 sps:$4 sm:$0xff]   ;;  %v5132_v35 = vld [vmem:[%s6033_s17 + $0x1a4] ss:$16 sps:$4 sm:$0xff]  }
 0x40b   : > { %v5135_v44 = vld [vmem:[%s6033_s17 + $0x1ac] ss:$16 sps:$4 sm:$0xff]   ;;  %v5130_v38 = vld [vmem:[%s6033_s17 + $0x1a0] ss:$16 sps:$4 sm:$0xff]   ;;  %v5133_v29 = vld [vmem:[%s6033_s17 + $0x1a8] ss:$16 sps:$4 sm:$0xff]  }
 0x40c   : > { %2929 = vadd.xlane.f32.xlu1 %v2928_v1  ;;  %3908 = vmatpush1.bf16.msra.mxu0 %v5082_v53  ;;  %v5138_v20 = vld [vmem:[%s6033_s17 + $0x1c4] ss:$16 sps:$4 sm:$0xff]   ;;  %v5141_v1 = vld [vmem:[%s6033_s17 + $0x1cc] ss:$16 sps:$4 sm:$0xff]   ;;  %v5136_v47 = vld [vmem:[%s6033_s17 + $0x1c0] ss:$16 sps:$4 sm:$0xff]  }
 0x40d   : > { %4014 = vmatpush1.bf16.msra.mxu1 %v5085_v9  ;;  %3909 = vmatprep.subr.bf16.mxu0 %v5090_v18  ;;  %v5139_v5 = vld [vmem:[%s6033_s17 + $0x1c8] ss:$16 sps:$4 sm:$0xff]   ;;  %v5144_v41 = vld [vmem:[%s6033_s17 + $0x1e4] ss:$16 sps:$4 sm:$0xff]   ;;  %v5147_v54 = vld [vmem:[%s6033_s17 + $0x1ec] ss:$16 sps:$4 sm:$0xff]  }
 0x40e   : > { %4015 = vmatprep.subr.bf16.mxu1 %v5093_v7  ;;  %v5142_v23 = vld [vmem:[%s6033_s17 + $0x1e0] ss:$16 sps:$4 sm:$0xff]   ;;  %v5145_v32 = vld [vmem:[%s6033_s17 + $0x1e8] ss:$16 sps:$4 sm:$0xff]   ;;  %v5150_v28 = vld [vmem:[%s6033_s17 + $0x204] ss:$16 sps:$4 sm:$0xff]  }
 0x40f   : > { %v5153_v2 = vld [vmem:[%s6033_s17 + $0x20c] ss:$16 sps:$4 sm:$0xff]   ;;  %v8383_v40 = vld [vmem:[#allocation47_spill] sm:$0xff]  ;;  %v8385_v18 = vld [vmem:[#allocation49_spill] sm:$0xff] }
 0x410   : > { %3910 = vmatpush1.bf16.msra.mxu0 %v5088_v3  ;;  %vm2359_vm5 = vcmp.eq.s32.totalorder %v8383_v40, %v7537_v21  ;;  %vm2360_vm7 = vcmp.eq.s32.totalorder %v8383_v40, %v7542_v59  ;;  %vm2361_vm9 = vcmp.eq.s32.totalorder %v8383_v40, %v7539_v17  ;;  %v8384_v30 = vld [vmem:[#allocation48_spill] sm:$0xff]  ;;  %vm2362_vm14 = vcmp.eq.s32.totalorder %v8383_v40, %v7544_v62 }
 0x411   : > { %4016 = vmatpush1.bf16.msra.mxu1 %v5091_v60  ;;  %3911 = vmatprep.subr.bf16.mxu0 %v5096_v52  ;;  %v2439_v27 = vsel %vm2359_vm5, %v2403_v45, 0.0  ;;  %v2440_v4 = vsel %vm2360_vm7, %v2403_v45, 0.0  ;;  %vm2363_vm10 = vcmp.eq.s32.totalorder %v8384_v30, %v7537_v21  ;;  %v2441_v56 = vsel %vm2361_vm9, %v2403_v45, 0.0 }
 0x412   : > { %4017 = vmatprep.subr.bf16.mxu1 %v5099_v15  ;;  %v2467_v42 = vadd.f32 %v2439_v27, %v2435_v13  ;;  %vm2365_vm11 = vcmp.eq.s32.totalorder %v8384_v30, %v7539_v17  ;;  %vm2364_vm12 = vcmp.eq.s32.totalorder %v8384_v30, %v7542_v59  ;;  %v2480_v10 = vadd.f32 %v2440_v4, %v2436_v63  ;;  %v2413_v15 = vpop.permute.xlu1 %2412 }
 0x413   : > { %v2443_v48 = vsel %vm2363_vm10, %v2408_v33, 0.0  ;;  %v2493_v53 = vadd.f32 %v2441_v56, %v2437_v61  ;;  %v2445_v9 = vsel %vm2365_vm11, %v2408_v33, 0.0  ;;  %vm2367_vm15 = vcmp.eq.s32.totalorder %v8385_v18, %v7537_v21 }
 0x414   : > { %3912 = vmatpush1.bf16.msra.mxu0 %v5094_v6  ;;  %v2468_v7 = vadd.f32 %v2467_v42, %v2443_v48  ;;  %v2444_v3 = vsel %vm2364_vm12, %v2408_v33, 0.0  ;;  %v2438_v60 = vsel %vm2358_vm13, %v2398_v39, 0.0  ;;  %vm2369_vm0 = vcmp.eq.s32.totalorder %v8385_v18, %v7539_v17 }
 0x415   : > { %4018 = vmatpush1.bf16.msra.mxu1 %v5097_v49  ;;  %3913 = vmatprep.subr.bf16.mxu0 %v5102_v46  ;;  %v2442_v52 = vsel %vm2362_vm14, %v2403_v45, 0.0  ;;  %vm2366_vm1 = vcmp.eq.s32.totalorder %v8384_v30, %v7544_v62  ;;  %vm2368_vm3 = vcmp.eq.s32.totalorder %v8385_v18, %v7542_v59  ;;  %v2481_v6 = vadd.f32 %v2480_v10, %v2444_v3 }
 0x416   : > { %4019 = vmatprep.subr.bf16.mxu1 %v5105_v37  ;;  %v2447_v49 = vsel %vm2367_vm15, %v2413_v15, 0.0  ;;  %v2494_v46 = vadd.f32 %v2493_v53, %v2445_v9  ;;  %v2449_v37 = vsel %vm2369_vm0, %v2413_v15, 0.0  ;;  %vm2370_vm6 = vcmp.eq.s32.totalorder %v8385_v18, %v7544_v62 }
 0x418   : > { %3914 = vmatpush1.bf16.msra.mxu0 %v5100_v51  ;;  %v2506_v51 = vadd.f32 %v2442_v52, %v2438_v60 }
 0x419   : > { %4020 = vmatpush1.bf16.msra.mxu1 %v5103_v14  ;;  %3915 = vmatprep.subr.bf16.mxu0 %v5108_v50  ;;  %v8386_v14 = vld [vmem:[#allocation50_spill] sm:$0xff]  ;;  %v2469_v50 = vadd.f32 %v2468_v7, %v2447_v49  ;;  %v8392_v49 = vld [vmem:[#allocation44_spill] sm:$0xff] }
 0x41a   : > { %4021 = vmatprep.subr.bf16.mxu1 %v5111_v58  ;;  %vm2371_vm4 = vcmp.eq.s32.totalorder %v8386_v14, %v7537_v21  ;;  %v2446_v58 = vsel %vm2366_vm1, %v2408_v33, 0.0  ;;  %vm2373_vm5 = vcmp.eq.s32.totalorder %v8386_v14, %v7539_v17  ;;  %vm2372_vm7 = vcmp.eq.s32.totalorder %v8386_v14, %v7542_v59 }
 0x41b   : > { %vm2374_vm11 = vcmp.eq.s32.totalorder %v8386_v14, %v7544_v62 }
 0x41c   : > { %3916 = vmatpush1.bf16.msra.mxu0 %v5106_v19  ;;  %v2448_v19 = vsel %vm2368_vm3, %v2413_v15, 0.0 }
 0x41d   : > { %4022 = vmatpush1.bf16.msra.mxu1 %v5109_v55  ;;  %3917 = vmatprep.subr.bf16.mxu0 %v5114_v36  ;;  %v2418_v55 = vpop.permute.xlu0 %2417  ;;  %v2482_v36 = vadd.f32 %v2481_v6, %v2448_v19 }
 0x41e   : > { %4023 = vmatprep.subr.bf16.mxu1 %v5117_v0  ;;  %v2451_v0 = vsel %vm2371_vm4, %v2418_v55, 0.0 }
 0x420   : > { %3918 = vmatpush1.bf16.msra.mxu0 %v5112_v57  ;;  %v2495_v57 = vadd.f32 %v2494_v46, %v2449_v37  ;;  %v2547_v46 = vrot.slane %v8392_v49, 4  ;;  %v8393_v37 = vld [vmem:[#allocation45_spill] sm:$0xff] }
 0x421   : > { %4024 = vmatpush1.bf16.msra.mxu1 %v5115_v34  ;;  %3919 = vmatprep.subr.bf16.mxu0 %v5120_v22  ;;  %v2507_v34 = vadd.f32 %v2506_v51, %v2446_v58  ;;  %v8387_v22 = vld [vmem:[#allocation52_spill] sm:$0xff]  ;;  %v2565_v51 = vrot.slane %v8393_v37, 4 }
 0x422   : > { %4025 = vmatprep.subr.bf16.mxu1 %v5123_v24  ;;  %vm2375_vm8 = vcmp.eq.s32.totalorder %v8387_v22, %v7537_v21  ;;  %v2453_v24 = vsel %vm2373_vm5, %v2418_v55, 0.0  ;;  %vm2377_vm9 = vcmp.eq.s32.totalorder %v8387_v22, %v7539_v17  ;;  %vm2376_vm10 = vcmp.eq.s32.totalorder %v8387_v22, %v7542_v59 }
 0x423   : > { %vm2378_vm14 = vcmp.eq.s32.totalorder %v8387_v22, %v7544_v62 }
 0x424   : > { %3920 = vmatpush1.bf16.msra.mxu0 %v5118_v8  ;;  %v2470_v8 = vadd.f32 %v2469_v50, %v2451_v0  ;;  %v2566_v0 = vadd.f32 %v2565_v51, %v8393_v37 }
 0x425   : > { %4026 = vmatpush1.bf16.msra.mxu1 %v5121_v11  ;;  %3921 = vmatprep.subr.bf16.mxu0 %v5126_v31  ;;  %v2450_v11 = vsel %vm2370_vm6, %v2413_v15, 0.0  ;;  %v2452_v31 = vsel %vm2372_vm7, %v2418_v55, 0.0  ;;  %v8391_v15 = vld [vmem:[#allocation43_spill] sm:$0xff] }
 0x426   : > { %4027 = vmatprep.subr.bf16.mxu1 %v5129_v16  ;;  %v2423_v16 = vpop.permute.xlu1 %2422  ;;  %v2556_v6 = vrot.slane %v8391_v15, 4 }
 0x427   : > { %v2458_v45 = vsel %vm2378_vm14, %v2423_v16, 0.0 }
 0x428   : > { %3922 = vmatpush1.bf16.msra.mxu0 %v5124_v12  ;;  %v2483_v12 = vadd.f32 %v2482_v36, %v2452_v31  ;;  %v2548_v36 = vadd.f32 %v2547_v46, %v8392_v49 }
 0x429   : > { %4028 = vmatpush1.bf16.msra.mxu1 %v5127_v43  ;;  %3923 = vmatprep.subr.bf16.mxu0 %v5132_v35  ;;  %v2455_v43 = vsel %vm2375_vm8, %v2423_v16, 0.0  ;;  %v2496_v35 = vadd.f32 %v2495_v57, %v2453_v24 }
 0x42a   : > { %4029 = vmatprep.subr.bf16.mxu1 %v5135_v44  ;;  %v2457_v44 = vsel %vm2377_vm9, %v2423_v16, 0.0  ;;  %v2549_v31 = vrot.slane %v2548_v36, 2 }
 0x42c   : > { %3924 = vmatpush1.bf16.msra.mxu0 %v5130_v38  ;;  %v2508_v38 = vadd.f32 %v2507_v34, %v2450_v11 }
 0x42d   : > { %4030 = vmatpush1.bf16.msra.mxu1 %v5133_v29  ;;  %3925 = vmatprep.subr.bf16.mxu0 %v5138_v20  ;;  %v2428_v29 = vpop.permute.xlu0 %2427  ;;  %v8388_v20 = vld [vmem:[#allocation53_spill] sm:$0xff] }
 0x42e   : > { %4031 = vmatprep.subr.bf16.mxu1 %v5141_v1  ;;  %vm2379_vm12 = vcmp.eq.s32.totalorder %v8388_v20, %v7537_v21  ;;  %v2471_v1 = vadd.f32 %v2470_v8, %v2455_v43  ;;  %vm2381_vm13 = vcmp.eq.s32.totalorder %v8388_v20, %v7539_v17  ;;  %vm2380_vm15 = vcmp.eq.s32.totalorder %v8388_v20, %v7542_v59 }
 0x42f   : > { %v2461_v39 = vsel %vm2381_vm13, %v2428_v29, 0.0  ;;  %v2460_v13 = vsel %vm2380_vm15, %v2428_v29, 0.0  ;;  %vm2382_vm4 = vcmp.eq.s32.totalorder %v8388_v20, %v7544_v62  ;;  %v8394_v20 = vld [vmem:[#allocation26_spill] sm:$0xff] }
 0x430   : > { %3926 = vmatpush1.bf16.msra.mxu0 %v5136_v47  ;;  %v2456_v47 = vsel %vm2376_vm10, %v2423_v16, 0.0  ;;  %v2462_v56 = vsel %vm2382_vm4, %v2428_v29, 0.0  ;;  %v2567_v16 = vrot.slane %v2566_v0, 2 }
 0x431   : > { %4032 = vmatpush1.bf16.msra.mxu1 %v5139_v5  ;;  %3927 = vmatprep.subr.bf16.mxu0 %v5144_v41  ;;  %v2454_v5 = vsel %vm2374_vm11, %v2418_v55, 0.0  ;;  %v2484_v41 = vadd.f32 %v2483_v12, %v2456_v47  ;;  %v2557_v55 = vadd.f32 %v2556_v6, %v8391_v15  ;;  %v8399_v6 = vld [vmem:[#allocation29_spill] sm:$0xff] }
 0x432   : > { %4033 = vmatprep.subr.bf16.mxu1 %v5147_v54  ;;  %v2459_v54 = vsel %vm2379_vm12, %v2428_v29, 0.0 }
 0x433   : > { %v2472_v40 = vadd.f32 %v2471_v1, %v2459_v54  ;;  %v2485_v27 = vadd.f32 %v2484_v41, %v2460_v13  ;;  %v2558_v11 = vrot.slane %v2557_v55, 2  ;;  %v7702_v41 = vadd.f32 %v2549_v31, %v2548_v36  ;;  %v8395_v54 = vld [vmem:[#allocation28_spill] sm:$0xff] }
 0x434   : > { %3928 = vmatpush1.bf16.msra.mxu0 %v5142_v23  ;;  %v2497_v23 = vadd.f32 %v2496_v35, %v2457_v44  ;;  %v5154_v36 = vld [vmem:[%s6033_s17 + $0x220] ss:$16 sps:$4 sm:$0xff]   ;;  %v5157_v31 = vld [vmem:[%s6033_s17 + $0x228] ss:$16 sps:$4 sm:$0xff]  }
 0x435   : > { %4034 = vmatpush1.bf16.msra.mxu1 %v5145_v32  ;;  %3950 = vmatprep.subr.bf16.mxu0 %v5150_v28  ;;  %v2509_v32 = vadd.f32 %v2508_v38, %v2454_v5  ;;  %v2433_v28 = vpop.permute.xlu1 %2432  ;;  %v7700_v5 = vadd.f32 %v2558_v11, %v2557_v55 }
 0x436   : > { %4056 = vmatprep.subr.bf16.mxu1 %v5153_v2  ;;  %v8389_v2 = vld [vmem:[#allocation54_spill] sm:$0xff]  ;;  %v2498_v4 = vadd.f32 %v2497_v23, %v2461_v39 }
 0x437   : > { %vm2383_vm0 = vcmp.eq.s32.totalorder %v8389_v2, %v7537_v21  ;;  %vm2385_vm1 = vcmp.eq.s32.totalorder %v8389_v2, %v7539_v17  ;;  %vm2384_vm3 = vcmp.eq.s32.totalorder %v8389_v2, %v7542_v59  ;;  %v2510_v61 = vadd.f32 %v2509_v32, %v2458_v45  ;;  %v8390_v17 = vld [vmem:[#allocation42_spill] sm:$0xff] }
 0x438   : > { %v2463_v63 = vsel %vm2383_vm0, %v2433_v28, 0.0  ;;  %v2465_v33 = vsel %vm2385_vm1, %v2433_v28, 0.0  ;;  %v2464_v21 = vsel %vm2384_vm3, %v2433_v28, 0.0  ;;  %vm2386_vm5 = vcmp.eq.s32.totalorder %v8389_v2, %v7544_v62  ;;  %v8396_v39 = vld [vmem:[#allocation30_spill] sm:$0xff] }
 0x439   : > { %v2473_v30 = vadd.f32 %v2472_v40, %v2463_v63  ;;  %v2486_v42 = vadd.f32 %v2485_v27, %v2464_v21  ;;  %v2538_v10 = vrot.slane %v8390_v17, 4  ;;  %v2499_v48 = vadd.f32 %v2498_v4, %v2465_v33  ;;  %v8397_v4 = vld [vmem:[#allocation32_spill] sm:$0xff] }
 0x43a   : > { %v2511_v59 = vadd.f32 %v2510_v61, %v2462_v56  ;;  %v2466_v9 = vsel %vm2386_vm5, %v2433_v28, 0.0  ;;  %v7705_v28 = vadd.f32 %v2567_v16, %v2566_v0  ;;  %v5148_v61 = vld [vmem:[%s6033_s17 + $0x200] ss:$16 sps:$4 sm:$0xff]   ;;  %v5162_v16 = vld [vmem:[%s6033_s17 + $0x244] ss:$16 sps:$4 sm:$0xff]  }
 0x43b   : > { %v2474_v53 = vrot.slane %v2473_v30, 4  ;;  %v2487_v18 = vrot.slane %v2486_v42, 4  ;;  %v2539_v7 = vadd.f32 %v2538_v10, %v8390_v17  ;;  %v2500_v3 = vrot.slane %v2499_v48, 4 }
 0x43c   : > { %v2512_v52 = vadd.f32 %v2511_v59, %v2466_v9 }
 0x43d   : > { %v2475_v60 = vadd.f32 %v2474_v53, %v2473_v30  ;;  %v2488_v62 = vadd.f32 %v2487_v18, %v2486_v42  ;;  %v2540_v14 = vrot.slane %v2539_v7, 2  ;;  %v2501_v50 = vadd.f32 %v2500_v3, %v2499_v48  ;;  %v5151_v48 = vld [vmem:[%s6033_s17 + $0x208] ss:$16 sps:$4 sm:$0xff]   ;;  %v5156_v3 = vld [vmem:[%s6033_s17 + $0x224] ss:$16 sps:$4 sm:$0xff]  }
 0x43e   : > { %v2513_v19 = vrot.slane %v2512_v52, 4  ;;  %v8398_v53 = vld [vmem:[#allocation27_spill] sm:$0xff] }
 0x43f   : > { %v2476_v58 = vrot.slane %v2475_v60, 2  ;;  %v2489_v57 = vrot.slane %v2488_v62, 2  ;;  %v2541_v34 = vadd.f32 %v2540_v14, %v2539_v7  ;;  %v2502_v22 = vrot.slane %v2501_v50, 2 }
 0x440   : > { %v2514_v8 = vadd.f32 %v2513_v19, %v2512_v52  ;;  %v2560_v52 = vrot.slane %v7700_v5, 1 }
 0x441   : > { %v2477_v24 = vadd.f32 %v2476_v58, %v2475_v60  ;;  %v2490_v12 = vadd.f32 %v2489_v57, %v2488_v62  ;;  %v2542_v43 = vrot.slane %v2541_v34, 1  ;;  %v2503_v35 = vadd.f32 %v2502_v22, %v2501_v50  ;;  %v5159_v60 = vld [vmem:[%s6033_s17 + $0x22c] ss:$16 sps:$4 sm:$0xff]   ;;  %v8400_v62 = vld [vmem:[#allocation31_spill] sm:$0xff]  ;;  %v8401_v57 = vld [vmem:[#allocation33_spill] sm:$0xff] }
 0x442   : > { %v2515_v29 = vrot.slane %v2514_v8, 2 }
 0x443   : > { %v2478_v38 = vrot.slane %v2477_v24, 1  ;;  %v2491_v2 = vrot.slane %v2490_v12, 1  ;;  %v7708_v27 = vadd.f32 %v2542_v43, %v2541_v34  ;;  %v2504_v63 = vrot.slane %v2503_v35, 1 }
 0x444   : > { %v7714_v56 = vadd.f32 %v2515_v29, %v2514_v8  ;;  %v5165_v29 = vld [vmem:[%s6033_s17 + $0x24c] ss:$16 sps:$4 sm:$0xff]  }
 0x445   : > { %v7712_v21 = vadd.f32 %v2478_v38, %v2477_v24  ;;  %v7721_v15 = vadd.f32 %v2491_v2, %v2490_v12  ;;  %v7724_v51 = vadd.f32 %v2504_v63, %v2503_v35  ;;  %v8402_v24 = vld [vmem:[#allocation34_spill] sm:$0xff]  ;;  %v8403_v35 = vld [vmem:[#allocation36_spill] sm:$0xff] }
 0x4bd   : > { %v2215_v44 = vpop.f32.mrb[24].mxu0 }
 0x4be   : > { %v2287_v1 = vsub.f32 %v2215_v44, %v8394_v20  ;;  %v2217_v47 = vpop.f32.mrb[25].mxu0  ;;  %v8404_v20 = vld [vmem:[#allocation51_spill] sm:$0xff] }
 0x4bf   : > { %v2288_v23 = vsub.f32 %v2217_v47, %v8395_v54  ;;  %v2219_v32 = vpop.f32.mrb[26].mxu0 }
 0x4c0   : > { %v2291_v40 = vsub.f32 %v2219_v32, %v8396_v39  ;;  %v3121_v45 = vpack.c.bf16 %v2219_v32, %v2215_v44  ;;  %v2221_v13 = vpop.f32.mrb[27].mxu0  ;;  %v2303_v42 = vmul.f32 %v2287_v1, %v2287_v1  ;;  %v7739_v1 = vmul.f32 11.313708, %v8404_v20  ;;  %v5177_v20 = vld [vmem:[%s6033_s17 + $0x28c] ss:$16 sps:$4 sm:$0xff]  }
 0x4c1   : > { %v2292_v33 = vsub.f32 %v2221_v13, %v8397_v4  ;;  %v3122_v30 = vpack.c.bf16 %v2221_v13, %v2217_v47  ;;  %v2304_v9 = vmul.f32 %v2288_v23, %v2288_v23  ;;  %v8405_v23 = vld [vmem:[#allocation38_spill] sm:$0xff]  ;;  %v8406_v13 = vld [vmem:[#allocation40_spill] sm:$0xff] }
 0x4c2   : > { %v2268_v17 = vpop.f32.mrb[24].mxu1  ;;  %v2307_v10 = vmul.f32 %v2291_v40, %v2291_v40 }
 0x4c3   : > { %v2289_v59 = vsub.f32 %v2268_v17, %v8398_v53  ;;  %v2270_v18 = vpop.f32.mrb[25].mxu1  ;;  %v2308_v7 = vmul.f32 %v2292_v33, %v2292_v33  ;;  %3929 = vmatprep.mubr.bf16.mxu0 %v3122_v30  ;;  %4035 = vmatprep.mubr.bf16.mxu1 %v3122_v30  ;;  %v5160_v33 = vld [vmem:[%s6033_s17 + $0x240] ss:$16 sps:$4 sm:$0xff]   ;;  %v2551_v30 = vrot.slane %v7702_v41, 1  ;;  %v5168_v53 = vld [vmem:[%s6033_s17 + $0x264] ss:$16 sps:$4 sm:$0xff]  }
 0x4c4   : > { %v2290_v49 = vsub.f32 %v2270_v18, %v8399_v6  ;;  %v2319_v46 = vadd.f32 %v2307_v10, %v2303_v42  ;;  %v2272_v37 = vpop.f32.mrb[26].mxu1  ;;  %3930 = vmatmul.mubr.bf16.vlgmr.msra.gmra.mrb[32].mxu0 %v3121_v45  ;;  %4036 = vmatmul.mubr.bf16.vlgmr.msra.gmra.mrb[32].mxu1 %v3121_v45  ;;  %v5171_v6 = vld [vmem:[%s6033_s17 + $0x26c] ss:$16 sps:$4 sm:$0xff]  }
 0x4c5   : > { %v2293_v14 = vsub.f32 %v2272_v37, %v8400_v62  ;;  %v7727_v50 = vpack.c.bf16 %v2272_v37, %v2268_v17  ;;  %v2328_v58 = vadd.f32 %v2308_v7, %v2304_v9  ;;  %v2274_v19 = vpop.f32.mrb[27].mxu1  ;;  %3951 = vmatpush1.bf16.msra.mxu0 %v5148_v61  ;;  %v2225_v55 = vpop.f32.mrb[28].mxu0  ;;  %v2305_v0 = vmul.f32 %v2289_v59, %v2289_v59  ;;  %v8407_v9 = vld [vmem:[#allocation35_spill] sm:$0xff] }
 0x4c6   : > { %v2294_v34 = vsub.f32 %v2274_v19, %v8401_v57  ;;  %v7731_v22 = vpack.c.bf16 %v2274_v19, %v2270_v18  ;;  %4057 = vmatpush1.bf16.msra.mxu1 %v5151_v48  ;;  %v2295_v8 = vsub.f32 %v2225_v55, %v8402_v24  ;;  %v2227_v11 = vpop.f32.mrb[29].mxu0  ;;  %v2306_v12 = vmul.f32 %v2290_v49, %v2290_v49  ;;  %v5163_v48 = vld [vmem:[%s6033_s17 + $0x248] ss:$16 sps:$4 sm:$0xff]  }
 0x4c7   : > { %v2309_v43 = vmul.f32 %v2293_v14, %v2293_v14  ;;  %v2296_v44 = vsub.f32 %v2227_v11, %v8403_v35  ;;  %v2229_v38 = vpop.f32.mrb[30].mxu0  ;;  %3952 = vmatprep.subr.bf16.mxu0 %v5156_v3  ;;  %4058 = vmatprep.subr.bf16.mxu1 %v5159_v60  ;;  %v2517_v59 = vrot.slane %v7714_v56, 1  ;;  %v8408_v49 = vld [vmem:[#allocation37_spill] sm:$0xff]  ;;  %v8409_v14 = vld [vmem:[#allocation83_spill] sm:$0xff] }
 0x4c8   : > { %v2310_v47 = vmul.f32 %v2294_v34, %v2294_v34  ;;  %v2311_v54 = vmul.f32 %v2295_v8, %v2295_v8  ;;  %v2299_v32 = vsub.f32 %v2229_v38, %v8405_v23  ;;  %v3125_v2 = vpack.c.bf16 %v2229_v38, %v2225_v55  ;;  %v2231_v39 = vpop.f32.mrb[31].mxu0  ;;  %v5166_v8 = vld [vmem:[%s6033_s17 + $0x260] ss:$16 sps:$4 sm:$0xff]   ;;  %v5174_v35 = vld [vmem:[%s6033_s17 + $0x284] ss:$16 sps:$4 sm:$0xff]  }
 0x4c9   : > { %v2337_v40 = vadd.f32 %v2309_v43, %v2305_v0  ;;  %v2312_v45 = vmul.f32 %v2296_v44, %v2296_v44  ;;  %v2300_v63 = vsub.f32 %v2231_v39, %v8406_v13  ;;  %v3126_v4 = vpack.c.bf16 %v2231_v39, %v2227_v11  ;;  %3953 = vmatpush1.bf16.msra.mxu0 %v5154_v36  ;;  %v8410_v36 = vld [vmem:[#allocation39_spill] sm:$0xff] }
 0x4ca   : > { %v2346_v61 = vadd.f32 %v2310_v47, %v2306_v12  ;;  %v2320_v42 = vadd.f32 %v2319_v46, %v2311_v54  ;;  %v2278_v17 = vpop.f32.mrb[28].mxu1  ;;  %v2315_v10 = vmul.f32 %v2299_v32, %v2299_v32  ;;  %4059 = vmatpush1.bf16.msra.mxu1 %v5157_v31  ;;  %3954 = vmatprep.subr.bf16.mxu0 %v5162_v16  ;;  %v2572_v19 = vmul.f32 11.313708, %v8409_v14  ;;  %v8411_v16 = vld [vmem:[#allocation41_spill] sm:$0xff]  ;;  %v8412_v13 = vld [vmem:[#allocation55_spill] sm:$0xff] }
 0x4cb   : > { %v2297_v18 = vsub.f32 %v2278_v17, %v8407_v9  ;;  %v2329_v7 = vadd.f32 %v2328_v58, %v2312_v45  ;;  %v2280_v3 = vpop.f32.mrb[29].mxu1  ;;  %v2316_v60 = vmul.f32 %v2300_v63, %v2300_v63  ;;  %4060 = vmatprep.subr.bf16.mxu1 %v5165_v29  ;;  %3939 = vmatprep.mubr.bf16.mxu0 %v3126_v4  ;;  %v2569_v47 = vrot.slane %v7705_v28, 1  ;;  %v5172_v45 = vld [vmem:[%s6033_s17 + $0x280] ss:$16 sps:$4 sm:$0xff]  }
 0x4cc   : > { %v2298_v37 = vsub.f32 %v2280_v3, %v8408_v49  ;;  %v2321_v46 = vadd.f32 %v2320_v42, %v2315_v10  ;;  %v2282_v62 = vpop.f32.mrb[30].mxu1  ;;  %v2575_v55 = vsub.f32 %v7712_v21, %v7739_v1  ;;  %4045 = vmatprep.mubr.bf16.mxu1 %v3126_v4  ;;  %3940 = vmatmul.mubr.bf16.gmra.mrb[36].mxu0 %v3125_v2  ;;  %v5169_v21 = vld [vmem:[%s6033_s17 + $0x268] ss:$16 sps:$4 sm:$0xff]   ;;  %v2573_v63 = vmul.f32 11.313708, %v8412_v13 }
 0x4cd   : > { %v2313_v58 = vmul.f32 %v2297_v18, %v2297_v18  ;;  %v2301_v0 = vsub.f32 %v2282_v62, %v8410_v36  ;;  %v7755_v57 = vpack.c.bf16 %v2282_v62, %v2278_v17  ;;  %v2330_v34 = vadd.f32 %v2329_v7, %v2316_v60  ;;  %v2284_v24 = vpop.f32.mrb[31].mxu1  ;;  %3955 = vmatpush1.bf16.msra.mxu0 %v5160_v33  ;;  %v5175_v42 = vld [vmem:[%s6033_s17 + $0x288] ss:$16 sps:$4 sm:$0xff]   ;;  %v5180_v17 = vld [vmem:[%s6033_s17 + $0x2a4] ss:$16 sps:$4 sm:$0xff]  }
 0x4ce   : > { %v2314_v11 = vmul.f32 %v2298_v37, %v2298_v37  ;;  %v2322_v31 = vrot.slane %v2321_v46, 4  ;;  %v2302_v12 = vsub.f32 %v2284_v24, %v8411_v16  ;;  %v7759_v43 = vpack.c.bf16 %v2284_v24, %v2280_v3  ;;  %4061 = vmatpush1.bf16.msra.mxu1 %v5163_v48  ;;  %3956 = vmatprep.subr.bf16.mxu0 %v5168_v53  ;;  %v5183_v53 = vld [vmem:[%s6033_s17 + $0x2ac] ss:$16 sps:$4 sm:$0xff]  }
 0x4cf   : > { %v2338_v44 = vadd.f32 %v2337_v40, %v2313_v58  ;;  %v2317_v38 = vmul.f32 %v2301_v0, %v2301_v0  ;;  %v2331_v29 = vrot.slane %v2330_v34, 4  ;;  %4062 = vmatprep.subr.bf16.mxu1 %v5171_v6  ;;  %v2576_v1 = vsub.f32 %v7721_v15, %v2572_v19  ;;  %4046 = vmatmul.mubr.bf16.gmra.mrb[36].mxu1 %v3125_v2  ;;  %v8413_v15 = vld [vmem:[#allocation108_spill] sm:$0xff] }
 0x4d0   : > { %v2347_v54 = vadd.f32 %v2346_v61, %v2314_v11  ;;  %v2323_v23 = vadd.f32 %v2322_v31, %v2321_v46  ;;  %v2318_v32 = vmul.f32 %v2302_v12, %v2302_v12  ;;  %3982 = vmatprep.mubr.bf16.mxu0 %v7731_v22  ;;  %4088 = vmatprep.mubr.bf16.mxu1 %v7731_v22  ;;  %v2574_v2 = vmul.f32 11.313708, %v8413_v15  ;;  %v5178_v6 = vld [vmem:[%s6033_s17 + $0x2a0] ss:$16 sps:$4 sm:$0xff]   ;;  %v5186_v46 = vld [vmem:[%s6033_s17 + $0x2c4] ss:$16 sps:$4 sm:$0xff]  }
 0x4d1   : > { %v2339_v39 = vadd.f32 %v2338_v44, %v2317_v38  ;;  %v2332_v40 = vadd.f32 %v2331_v29, %v2330_v34  ;;  %3957 = vmatpush1.bf16.msra.mxu0 %v5166_v8  ;;  %v2552_v4 = vadd.f32 %v2551_v30, %v7702_v41  ;;  %v2518_v22 = vadd.f32 %v2517_v59, %v7714_v56  ;;  %v5412_v24 = vld [vmem:[%s6041_s29] sm:$0xff]  ;;  %s4711_s29 = sshll.u32 %s5801_s13, 6 }
 0x4d2   : > { %v2324_v33 = vrot.slane %v2323_v23, 2  ;;  %v2348_v61 = vadd.f32 %v2347_v54, %v2318_v32  ;;  %4063 = vmatpush1.bf16.msra.mxu1 %v5169_v21  ;;  %3958 = vmatprep.subr.bf16.mxu0 %v5174_v35  ;;  %v2577_v9 = vsub.f32 %v7724_v51, %v2573_v63  ;;  %v2579_v18 = vadd.f32 %v2575_v55, %v7708_v27  ;;  %v5181_v27 = vld [vmem:[%s6033_s17 + $0x2a8] ss:$16 sps:$4 sm:$0xff]   ;;  %v5192_v44 = vld [vmem:[%s6033_s17 + $0x2e4] ss:$16 sps:$4 sm:$0xff]   ;;  %s7843_s3 = scalar_lea.hbm %s8415_s27, %s4711_s29 }
 0x4d3   : > { %v2340_v10 = vrot.slane %v2339_v39, 4  ;;  %v2333_v48 = vrot.slane %v2332_v40, 2  ;;  %4064 = vmatprep.subr.bf16.mxu1 %v5177_v20  ;;  %v2580_v7 = vadd.f32 %v2576_v1, %v2552_v4  ;;  %v3076_v3 = vsub.s32 1, %v8378_v25  ;;  %v5187_v35 = vld [vmem:[%s6033_s17 + $0x2c8] ss:$16 sps:$4 sm:$0xff]  }
 0x4d4   : > { %v2325_v41 = vadd.f32 %v2324_v33, %v2323_v23  ;;  %v2349_v30 = vrot.slane %v2348_v61, 4  ;;  %v2561_v60 = vadd.f32 %v2560_v52, %v7700_v5  ;;  %v3080_v51 = vsub.s32 3, %v8378_v25  ;;  %v5189_v52 = vld [vmem:[%s6033_s17 + $0x2cc] ss:$16 sps:$4 sm:$0xff]   ;;  %v5193_v15 = vld [vmem:[%s6033_s17 + $0x2e8] ss:$16 sps:$4 sm:$0xff]  }
 0x4d5   : > { %v2341_v56 = vadd.f32 %v2340_v10, %v2339_v39  ;;  %v2334_v59 = vadd.f32 %v2333_v48, %v2332_v40  ;;  %3959 = vmatpush1.bf16.msra.mxu0 %v5172_v45  ;;  %v2570_v62 = vadd.f32 %v2569_v47, %v7705_v28  ;;  %v2578_v14 = vsub.f32 %v2518_v22, %v2574_v2  ;;  %v5184_v28 = vld [vmem:[%s6033_s17 + $0x2c0] ss:$16 sps:$4 sm:$0xff]   ;;  %v5195_v47 = vld [vmem:[%s6033_s17 + $0x2ec] ss:$16 sps:$4 sm:$0xff]   ;;  %v5198_v2 = vld [vmem:[%s6033_s17 + $0x304] ss:$16 sps:$4 sm:$0xff]  }
 0x4d6   : > { %v2326_v49 = vrot.slane %v2325_v41, 1  ;;  %v2350_v37 = vadd.f32 %v2349_v30, %v2348_v61  ;;  %4065 = vmatpush1.bf16.msra.mxu1 %v5175_v42  ;;  %3960 = vmatprep.subr.bf16.mxu0 %v5180_v17  ;;  %v2581_v55 = vadd.f32 %v2577_v9, %v2561_v60  ;;  %v3066_v58 = vmul.f32 1.25, %v2579_v18  ;;  %v5190_v40 = vld [vmem:[%s6033_s17 + $0x2e0] ss:$16 sps:$4 sm:$0xff]   ;;  %v5201_v42 = vld [vmem:[%s6033_s17 + $0x30c] ss:$16 sps:$4 sm:$0xff]  }
 0x4d7   : > { %v2342_v19 = vrot.slane %v2341_v56, 2  ;;  %v2335_v5 = vrot.slane %v2334_v59, 1  ;;  %4066 = vmatprep.subr.bf16.mxu1 %v5183_v53  ;;  %v3067_v34 = vmul.f32 1.25, %v2580_v7  ;;  %v3077_v8 = vrot.slane %v5412_v24, %v3076_v3  ;;  %v5196_v53 = vld [vmem:[%s6033_s17 + $0x300] ss:$16 sps:$4 sm:$0xff]  }
 0x4d8   : > { %v2327_v36 = vadd.f32 %v2326_v49, %v2325_v41  ;;  %v2351_v0 = vrot.slane %v2350_v37, 2  ;;  %v3081_v16 = vrot.slane %v5412_v24, %v3080_v51  ;;  %v3084_v12 = vsub.s32 5, %v8378_v25  ;;  %v5199_v18 = vld [vmem:[%s6033_s17 + $0x308] ss:$16 sps:$4 sm:$0xff]   ;;  %v5204_v30 = vld [vmem:[%s6033_s17 + $0x324] ss:$16 sps:$4 sm:$0xff]  }
 0x4d9   : > { %v2343_v11 = vadd.f32 %v2342_v19, %v2341_v56  ;;  %v2336_v31 = vadd.f32 %v2335_v5, %v2334_v59  ;;  %3961 = vmatpush1.bf16.msra.mxu0 %v5178_v6  ;;  %v2582_v38 = vadd.f32 %v2578_v14, %v2570_v62  ;;  %v3088_v20 = vsub.s32 7, %v8378_v25  ;;  %v5207_v3 = vld [vmem:[%s6033_s17 + $0x32c] ss:$16 sps:$4 sm:$0xff]   ;;  %v5202_v59 = vld [vmem:[%s6033_s17 + $0x320] ss:$16 sps:$4 sm:$0xff]  }
 0x4da   : > { %v2352_v21 = vadd.f32 %v2351_v0, %v2350_v37  ;;  %4067 = vmatpush1.bf16.msra.mxu1 %v5181_v27  ;;  %3962 = vmatprep.subr.bf16.mxu0 %v5186_v46  ;;  %v3070_v29 = vadd.f32 %v3066_v58, %v2327_v36  ;;  %v3068_v45 = vmul.f32 1.25, %v2581_v55  ;;  %v3085_v13 = vrot.slane %v5412_v24, %v3084_v12  ;;  %v5205_v51 = vld [vmem:[%s6033_s17 + $0x328] ss:$16 sps:$4 sm:$0xff]   ;;  %v5210_v49 = vld [vmem:[%s6033_s17 + $0x344] ss:$16 sps:$4 sm:$0xff]  }
 0x4db   : > { %v2344_v1 = vrot.slane %v2343_v11, 1  ;;  %4068 = vmatprep.subr.bf16.mxu1 %v5189_v52  ;;  %v3071_v54 = vadd.f32 %v3067_v34, %v2336_v31  ;;  %v3069_v4 = vmul.f32 1.25, %v2582_v38  ;;  %v3089_v33 = vrot.slane %v5412_v24, %v3088_v20  ;;  %v5213_v37 = vld [vmem:[%s6033_s17 + $0x34c] ss:$16 sps:$4 sm:$0xff]   ;;  %v5208_v27 = vld [vmem:[%s6033_s17 + $0x340] ss:$16 sps:$4 sm:$0xff]   ;;  %v2983_v38 = vpop.xlane.xlu0 %2982  ;;  %v2988_v20 = vpop.xlane.xlu1 %2987 }
 0x4dc   : > { %v2353_v23 = vrot.slane %v2352_v21, 1  ;;  %v3094_v32 = vmul.f32 %v3077_v8, %v3070_v29  ;;  %v5211_v46 = vld [vmem:[%s6033_s17 + $0x348] ss:$16 sps:$4 sm:$0xff]   ;;  %v5216_v62 = vld [vmem:[%s6033_s17 + $0x364] ss:$16 sps:$4 sm:$0xff]  }
 0x4dd   : > { %v2345_v39 = vadd.f32 %v2344_v1, %v2343_v11  ;;  %3963 = vmatpush1.bf16.msra.mxu0 %v5184_v28  ;;  %v3095_v63 = vmul.f32 %v3081_v16, %v3071_v54  ;;  %v5219_v14 = vld [vmem:[%s6033_s17 + $0x36c] ss:$16 sps:$4 sm:$0xff]   ;;  %v5214_v19 = vld [vmem:[%s6033_s17 + $0x360] ss:$16 sps:$4 sm:$0xff]   ;;  %v5217_v5 = vld [vmem:[%s6033_s17 + $0x368] ss:$16 sps:$4 sm:$0xff]  }
 0x4de   : > { %4069 = vmatpush1.bf16.msra.mxu1 %v5187_v35  ;;  %3964 = vmatprep.subr.bf16.mxu0 %v5192_v44  ;;  %v2354_v25 = vadd.f32 %v2353_v23, %v2352_v21  ;;  %v3098_v61 = vsel %vm2921_vm2, %v3094_v32, 0.0  ;;  %v5222_v52 = vld [vmem:[%s6033_s17 + $0x384] ss:$16 sps:$4 sm:$0xff]   ;;  %v5225_v55 = vld [vmem:[%s6033_s17 + $0x38c] ss:$16 sps:$4 sm:$0xff]  }
 0x4df   : > { %4070 = vmatprep.subr.bf16.mxu1 %v5195_v47  ;;  %v3072_v17 = vadd.f32 %v3068_v45, %v2345_v39  ;;  %v3099_v22 = vsel %vm2921_vm2, %v3095_v63, 0.0  ;;  %v5220_v58 = vld [vmem:[%s6033_s17 + $0x380] ss:$16 sps:$4 sm:$0xff]   ;;  %v5223_v36 = vld [vmem:[%s6033_s17 + $0x388] ss:$16 sps:$4 sm:$0xff]   ;;  %v2993_v29 = vpop.xlane.xlu0 %2992 }
 0x4e0   : > { %v3073_v10 = vadd.f32 %v3069_v4, %v2354_v25  ;;  %v3100_v48 = vadd.f32 %v3099_v22, %v3098_v61  ;;  %v5228_v0 = vld [vmem:[%s6033_s17 + $0x3a4] ss:$16 sps:$4 sm:$0xff]   ;;  %v5231_v34 = vld [vmem:[%s6033_s17 + $0x3ac] ss:$16 sps:$4 sm:$0xff]   ;;  %v5226_v24 = vld [vmem:[%s6033_s17 + $0x3a0] ss:$16 sps:$4 sm:$0xff]  }
 0x4e1   : > { %3965 = vmatpush1.bf16.msra.mxu0 %v5190_v40  ;;  %v3096_v9 = vmul.f32 %v3085_v13, %v3072_v17  ;;  %v5229_v8 = vld [vmem:[%s6033_s17 + $0x3a8] ss:$16 sps:$4 sm:$0xff]   ;;  %v5234_v11 = vld [vmem:[%s6033_s17 + $0x3c4] ss:$16 sps:$4 sm:$0xff]   ;;  %v5237_v31 = vld [vmem:[%s6033_s17 + $0x3cc] ss:$16 sps:$4 sm:$0xff]  }
 0x4e2   : > { %4071 = vmatpush1.bf16.msra.mxu1 %v5193_v15  ;;  %3966 = vmatprep.subr.bf16.mxu0 %v5198_v2  ;;  %v3097_v41 = vmul.f32 %v3089_v33, %v3073_v10  ;;  %v5232_v28 = vld [vmem:[%s6033_s17 + $0x3c0] ss:$16 sps:$4 sm:$0xff]   ;;  %v5235_v16 = vld [vmem:[%s6033_s17 + $0x3c8] ss:$16 sps:$4 sm:$0xff]   ;;  %v5240_v12 = vld [vmem:[%s6033_s17 + $0x3e4] ss:$16 sps:$4 sm:$0xff]  }
 0x4e3   : > { %4072 = vmatprep.subr.bf16.mxu1 %v5201_v42  ;;  %v3101_v7 = vsel %vm2921_vm2, %v3096_v9, 0.0  ;;  %v5243_v21 = vld [vmem:[%s6033_s17 + $0x3ec] ss:$16 sps:$4 sm:$0xff]   ;;  %v5238_v35 = vld [vmem:[%s6033_s17 + $0x3e0] ss:$16 sps:$4 sm:$0xff]   ;;  %v2998_v54 = vpop.xlane.xlu0 %2997 }
 0x4e4   : > { %v3102_v60 = vadd.f32 %v3101_v7, %v3100_v48  ;;  %v3103_v56 = vsel %vm2921_vm2, %v3097_v41, 0.0  ;;  %v5241_v44 = vld [vmem:[%s6033_s17 + $0x3e8] ss:$16 sps:$4 sm:$0xff]   ;;  %v3020_v1 = vadd.f32 1e-05, %v2988_v20  ;;  %s8414_s17 = sld [smem:[#allocation25_spill]] }
 0x4e5   : > { %3967 = vmatpush1.bf16.msra.mxu0 %v5196_v53  ;;  %v3019_v47 = vadd.f32 1e-05, %v2983_v38  ;;  %v3021_v23 = vadd.f32 1e-05, %v2993_v29  ;;  %v3022_v32 = vadd.f32 1e-05, %v2998_v54 }
 0x4e6   : > { %4073 = vmatpush1.bf16.msra.mxu1 %v5199_v18  ;;  %v3104_v6 = vadd.f32 %v3103_v56, %v3102_v60  ;;  %3968 = vmatprep.subr.bf16.mxu0 %v5204_v30  ;;  %5396 = vlog2.f32 %v3020_v1 }
 0x4e7   : > { %4074 = vmatprep.subr.bf16.mxu1 %v5207_v3  ;;  %5398 = vlog2.f32 %v3019_v47  ;;  %v3008_v39 = vpop.xlane.xlu0 %3007 }
 0x4e8   : > { %3105 = vadd.xlane.f32.xlu0 %v3104_v6  ;;  %5400 = vlog2.f32 %v3021_v23 }
 0x4e9   : > { %3969 = vmatpush1.bf16.msra.mxu0 %v5202_v59  ;;  %5402 = vlog2.f32 %v3022_v32 }
 0x4ea   : > { %4075 = vmatpush1.bf16.msra.mxu1 %v5205_v51  ;;  %3970 = vmatprep.subr.bf16.mxu0 %v5210_v49  ;;  %p8416_p4 = scmp.ne.s32.totalorder %s8414_s17, 0 }
 0x4eb   : > { %4076 = vmatprep.subr.bf16.mxu1 %v5213_v37  ;;  %v3018_v25 = vpop.xlane.xlu0 %3017 }
 0x4ec   : > { %v3026_v42 = vadd.f32 1e-05, %v3018_v25  ;;  %p5577_p5 = pnand %p5576_p12, %p8416_p4 }
 0x4ed   : > { %3971 = vmatpush1.bf16.msra.mxu0 %v5208_v27 }
 0x4ee   : > { %4077 = vmatpush1.bf16.msra.mxu1 %v5211_v46  ;;  %3972 = vmatprep.subr.bf16.mxu0 %v5216_v62  ;;  %p5578_p6 = pneg %p5577_p5 }
 0x4ef   : > { %4078 = vmatprep.subr.bf16.mxu1 %v5219_v14 }
 0x4f0   : > { %v5397_v45 = vpop.eup %5396  ;;  %p5585_p9 = pnand %p5584_p7, %p5578_p6 }
 0x4f1   : > { %3973 = vmatpush1.bf16.msra.mxu0 %v5214_v19  ;;  %v5399_v13 = vpop.eup %5398  ;;  %v3030_v15 = vmul.f32 0.6931472, %v5397_v45 }
 0x4f2   : > { %4079 = vmatpush1.bf16.msra.mxu1 %v5217_v5  ;;  %3974 = vmatprep.subr.bf16.mxu0 %v5222_v52  ;;  %v5401_v63 = vpop.eup %5400  ;;  %v3028_v2 = vmul.f32 0.6931472, %v5399_v13 }
 0x4f3   : > { %4080 = vmatprep.subr.bf16.mxu1 %v5225_v55  ;;  %v5403_v4 = vpop.eup %5402  ;;  %v3032_v61 = vmul.f32 0.6931472, %v5401_v63  ;;  %v3044_v17 = vmul.f32 %v3030_v15, %v2988_v20 }
 0x4f4   : > { %v3043_v22 = vmul.f32 %v3028_v2, %v2983_v38  ;;  %v3034_v10 = vmul.f32 0.6931472, %v5403_v4 }
 0x4f5   : > { %3975 = vmatpush1.bf16.msra.mxu0 %v5220_v58  ;;  %v3045_v48 = vmul.f32 %v3032_v61, %v2993_v29 }
 0x4f6   : > { %4081 = vmatpush1.bf16.msra.mxu1 %v5223_v36  ;;  %3976 = vmatprep.subr.bf16.mxu0 %v5228_v0  ;;  %v3051_v9 = vadd.f32 %v3044_v17, %v3043_v22  ;;  %v3046_v18 = vmul.f32 %v3034_v10, %v2998_v54 }
 0x4f7   : > { %4082 = vmatprep.subr.bf16.mxu1 %v5231_v34 }
 0x4f8   : > { %v3052_v7 = vadd.f32 %v3051_v9, %v3045_v48 }
 0x4f9   : > { %3977 = vmatpush1.bf16.msra.mxu0 %v5226_v24 }
 0x4fa   : > { %4083 = vmatpush1.bf16.msra.mxu1 %v5229_v8  ;;  %3978 = vmatprep.subr.bf16.mxu0 %v5234_v11  ;;  %v3053_v3 = vadd.f32 %v3052_v7, %v3046_v18 }
 0x4fb   : > { %4084 = vmatprep.subr.bf16.mxu1 %v5237_v31 }
 0x4fd   : > { %3979 = vmatpush1.bf16.msra.mxu0 %v5232_v28 }
 0x4fe   : > { %4085 = vmatpush1.bf16.msra.mxu1 %v5235_v16  ;;  %3980 = vmatprep.subr.bf16.mxu0 %v5240_v12 }
 0x4ff   : > { %4086 = vmatprep.subr.bf16.mxu1 %v5243_v21 }
 0x501   : > { %3981 = vmatpush1.bf16.msra.mxu0 %v5238_v35 }
 0x502   : > { %4087 = vmatpush1.bf16.msra.mxu1 %v5241_v44 }
 0x504   : > { %3983 = vmatmul.mubr.bf16.vlgmr.msra.gmra.mrb[32].mxu0 %v7727_v50 }
 0x505   : > { %4089 = vmatmul.mubr.bf16.vlgmr.msra.gmra.mrb[32].mxu1 %v7727_v50  ;;  %3992 = vmatprep.mubr.bf16.mxu0 %v7759_v43  ;;  %v3003_v50 = vpop.xlane.xlu1 %3002 }
 0x506   : > { %4098 = vmatprep.mubr.bf16.mxu1 %v7759_v43  ;;  %v3023_v40 = vadd.f32 1e-05, %v3003_v50  ;;  %v3024_v43 = vadd.f32 1e-05, %v3008_v39 }
 0x508   : > { %5404 = vlog2.f32 %v3023_v40 }
 0x509   : > { %5406 = vlog2.f32 %v3024_v43 }
 0x50c   : > { %3993 = vmatmul.mubr.bf16.gmra.mrb[36].mxu0 %v7755_v57 }
 0x50d   : > { %4099 = vmatmul.mubr.bf16.gmra.mrb[36].mxu1 %v7755_v57  ;;  %v3013_v57 = vpop.xlane.xlu1 %3012 }
 0x50e   : > { %v3025_v33 = vadd.f32 1e-05, %v3013_v57 }
 0x510   : > { %5408 = vlog2.f32 %v3025_v33 }
 0x511   : > { %5410 = vlog2.f32 %v3026_v42 }
 0x512   : > { %v5405_v53 = vpop.eup %5404 }
 0x513   : > { %v5407_v41 = vpop.eup %5406  ;;  %v3036_v30 = vmul.f32 0.6931472, %v5405_v53 }
 0x514   : > { %v3038_v60 = vmul.f32 0.6931472, %v5407_v41 }
 0x515   : > { %v3047_v56 = vmul.f32 %v3036_v30, %v3003_v50 }
 0x516   : > { %v3048_v51 = vmul.f32 %v3038_v60, %v3008_v39 }
 0x517   : > { %v3054_v6 = vadd.f32 %v3053_v3, %v3047_v56 }
 0x519   : > { %v3055_v27 = vadd.f32 %v3054_v6, %v3048_v51 }
 0x51a   : > { %v5409_v59 = vpop.eup %5408 }
 0x51b   : > { %v5411_v49 = vpop.eup %5410  ;;  %v3040_v37 = vmul.f32 0.6931472, %v5409_v59 }
 0x51c   : > { %v3042_v46 = vmul.f32 0.6931472, %v5411_v49 }
 0x51d   : > { %v3049_v62 = vmul.f32 %v3040_v37, %v3013_v57 }
 0x51e   : > { %v3050_v19 = vmul.f32 %v3042_v46, %v3018_v25 }
 0x51f   : > { %v3056_v14 = vadd.f32 %v3055_v27, %v3049_v62 }
 0x521   : > { %v3057_v5 = vadd.f32 %v3056_v14, %v3050_v19 }
 0x523   : > { %v3058_v52 = vrot.slane %v3057_v5, 4 }
 0x525   : > { %v3059_v55 = vadd.f32 %v3058_v52, %v3057_v5 }
 0x527   : > { %v3060_v58 = vrot.slane %v3059_v55, 2 }
 0x529   : > { %v3061_v36 = vadd.f32 %v3060_v58, %v3059_v55 }
 0x52b   : > { %v3062_v0 = vrot.slane %v3061_v36, 1 }
 0x52c   : > { %5588 = shalt.err (!%p5585_p9)
}
 0x52d   : > { %s5589_s19 = scalar_lea.hbm %s7843_s3, 64  ;;  %s5593_s28 = scalar_lea.hbm %s8415_s27, 320 }
 0x52e   : > { %p5590_p13 = scmp.ne.s32.totalorder %s7843_s3, %s5589_s19  ;;  %p5594_p1 = scmp.lt.u32.totalorder %s7843_s3, %s8415_s27 }
 0x52f   : > { %p5595_p2 = scmp.lt.u32.totalorder %s5593_s28, %s5589_s19  ;;  %p5597_p12 = scmp.lt.u32.totalorder %s5589_s19, %s7843_s3 }
 0x530   : > { %p5591_p10 = pnand %p5590_p13, %p8416_p4 }
 0x531   : > { %p5596_p11 = por %p5595_p2, %p5594_p1 }
 0x532   : > { %p5592_p0 = pneg %p5591_p10 }
 0x533   : > { %p5598_p5 = por %p5597_p12, %p5596_p11 }
 0x535   : > { %p5599_p6 = pnand %p5598_p5, %p5592_p0 }
 0x537   : > { %5602 = shalt.err (!%p5599_p6)
}
 0x538   : > { %4768 = dma.vmem_to_hbm [thread:$0]  (%p8416_p4), %s4222_s5, 64, %s7843_s3, %s4190_s8   ;;  %v3063_v34 = vadd.f32 %v3062_v0, %v3061_v36  ;;  %v3108_v8 = vand.u32 127, %v8381_v26  ;;  %v2930_v11 = vpop.xlane.xlu1 %2929 }
 0x539   : > { %s4704_s20 = sshll.u32 %s5801_s13, 4  ;;  %s4234_s29 = sshll.u32 %s457_s24, 4  ;;  %s4235_s29 = int_to_ptr.vmem [resolvable:$true] %s4234_s29 }
 0x53a   : > { %v3064_v24 = vsub.f32 0.0, %v3063_v34  ;;  %vm3109_vm2 = vcmp.eq.s32.totalorder %v3108_v8, 0  ;;  %vm3111_vm6 = vcmp.eq.s32.totalorder %v3108_v8, 1  ;;  %vm3114_vm7 = vcmp.eq.s32.totalorder %v3108_v8, 2  ;;  %s8417_s3 = sld [smem:[#allocation143_spill]]  ;;  %s5603_s9 = scalar_lea.vmem %s4235_s29, 16 }
 0x53b   : > { %vm3117_vm8 = vcmp.eq.s32.totalorder %v3108_v8, 3  ;;  %v3115_v35 = vsel %vm3114_vm7, %v2930_v11, 0.0  ;;  %p5604_p8 = scmp.ne.s32.totalorder %s4235_s29, %s5603_s9  ;;  %s5728_s26 = smov [#allocation15]  }
 0x53c   : > { %v3065_v31 = vsub.f32 %v2930_v11, %v3064_v24  ;;  %v3118_v38 = vsel %vm3117_vm8, %v3064_v24, 0.0  ;;  %s5607_s15 = sshll.u32 %s5728_s26, 4  ;;  %s5608_s15 = int_to_ptr.vmem [resolvable:$false] %s5607_s15 }
 0x53d   : > { %p5605_p3 = pnand %p5604_p8, %p8416_p4  ;;  %s5609_s30 = scalar_lea.vmem %s5608_s15, 32 }
 0x53e   : > { %v3110_v16 = vsel %vm3109_vm2, %v3065_v31, 0.0  ;;  %p5610_p9 = scmp.lt.s32.totalorder %s4235_s29, %s5608_s15  ;;  %p5611_p13 = scmp.lt.s32.totalorder %s5609_s30, %s5603_s9 }
 0x53f   : > { %p5606_p7 = pneg %p5605_p3 }
 0x540   : > { %s7873_s5 = scalar_lea.hbm %s8417_s3, %s4704_s20  ;;  %p5612_p10 = por %p5611_p13, %p5610_p9 }
 0x542   : > { %p5613_p0 = pnand %p5612_p10, %p5606_p7 }
 0x575   : > { %v3106_v28 = vpop.xlane.xlu0 %3105 }
 0x576   : > { %v3112_v12 = vsel %vm3111_vm6, %v3106_v28, 0.0 }
 0x577   : > { %v3113_v21 = vadd.f32 %v3112_v12, %v3110_v16 }
 0x579   : > { %v3116_v44 = vadd.f32 %v3115_v35, %v3113_v21 }
 0x57b   : > { %v3119_v29 = vadd.f32 %v3118_v38, %v3116_v44 }
 0x57d   : > { %3120 = vst [vmem:[%s457_s24] sm:$0x1] %v3119_v29 }
 0x57e   : > { %5616 = shalt.err (!%p5613_p0)
}
 0x57f   : > { %s5617_s16 = scalar_lea.hbm %s7873_s5, 16  ;;  %s5621_s18 = scalar_lea.hbm %s8417_s3, 80 }
 0x580   : > { %p5618_p1 = scmp.ne.s32.totalorder %s7873_s5, %s5617_s16  ;;  %p5622_p12 = scmp.lt.u32.totalorder %s7873_s5, %s8417_s3 }
 0x581   : > { %p5623_p5 = scmp.lt.u32.totalorder %s5621_s18, %s5617_s16  ;;  %p5625_p8 = scmp.lt.u32.totalorder %s5617_s16, %s7873_s5 }
 0x582   : > { %p5619_p2 = pnand %p5618_p1, %p8416_p4 }
 0x583   : > { %p5624_p6 = por %p5623_p5, %p5622_p12 }
 0x584   : > { %p5620_p11 = pneg %p5619_p2 }
 0x585   : > { %p5626_p3 = por %p5625_p8, %p5624_p6 }
 0x587   : > { %p5627_p7 = pnand %p5626_p3, %p5620_p11 }
 0x589   : > { %5630 = shalt.err (!%p5627_p7)
}
 0x58a   : > { %4769 = dma.vmem_to_hbm [thread:$0]  (%p8416_p4), %s4235_s29, 16, %s7873_s5, %s4190_s8   ;;  %v4141_v26 = vld [vmem:[#allocation12] sm:$0xff]  ;;  %v4143_v20 = vld [vmem:[#allocation12 + $0x10] sm:$0xff]  ;;  %v4142_v1 = vld [vmem:[#allocation12 + $0x8] sm:$0xff] }
 0x58b   : > { %v4144_v54 = vld [vmem:[#allocation12 + $0x18] sm:$0xff]  ;;  %v4145_v23 = vld [vmem:[#allocation12 + $0x20] sm:$0xff]  ;;  %v4147_v45 = vld [vmem:[#allocation12 + $0x30] sm:$0xff]  ;;  %s5729_s23 = smov [#allocation12]   ;;  %p8418_p9 = scmp.eq.s32.totalorder %s5801_s13, 4 }
 0x58c   : > { %v5413_v32 = vld [vmem:[#allocation2] sm:$0xff]  ;;  %v4146_v13 = vld [vmem:[#allocation12 + $0x28] sm:$0xff]  ;;  %v5414_v57 = vld [vmem:[#allocation2 + $0x10] sm:$0xff]  ;;  %s4204_s17 = sshll.u32 %s5729_s23, 4  ;;  %s4205_s17 = int_to_ptr.vmem [resolvable:$true] %s4204_s17 }
 0x58d   : > { %v5415_v2 = vld [vmem:[#allocation2 + $0x8] sm:$0xff]  ;;  %v4148_v42 = vld [vmem:[#allocation12 + $0x38] sm:$0xff]  ;;  %v5417_v48 = vld [vmem:[#allocation2 + $0x20] sm:$0xff]  ;;  %s5631_s8 = scalar_lea.vmem %s4205_s17, 2048  ;;  %p5638_p0 = scmp.lt.s32.totalorder %s4205_s17, %s4205_s17 }
 0x58e   : > { %v5416_v17 = vld [vmem:[#allocation2 + $0x18] sm:$0xff]  ;;  %v5418_v30 = vld [vmem:[#allocation2 + $0x30] sm:$0xff]  ;;  %v5419_v60 = vld [vmem:[#allocation2 + $0x28] sm:$0xff]  ;;  %p5632_p4 = scmp.ne.s32.totalorder %s4205_s17, %s5631_s8  ;;  %p5639_p1 = scmp.lt.s32.totalorder %s5631_s8, %s5631_s8 }
 0x58f   : > { %v5420_v51 = vld [vmem:[#allocation2 + $0x38] sm:$0xff]  ;;  %v4149_v27 = vld [vmem:[#allocation12 + $0x40] sm:$0xff]  ;;  %v4151_v46 = vld [vmem:[#allocation12 + $0x50] sm:$0xff] }
 0x590   : > { %v4150_v62 = vld [vmem:[#allocation12 + $0x48] sm:$0xff]  ;;  %v4152_v19 = vld [vmem:[#allocation12 + $0x58] sm:$0xff]  ;;  %v4153_v5 = vld [vmem:[#allocation12 + $0x60] sm:$0xff]  ;;  %p5633_p13 = pnand %p5632_p4, %p8418_p9  ;;  %p5640_p2 = por %p5639_p1, %p5638_p0 }
 0x591   : > { %v5421_v52 = vld [vmem:[#allocation2 + $0x40] sm:$0xff]  ;;  %v4155_v34 = vld [vmem:[#allocation12 + $0x70] sm:$0xff]  ;;  %v4154_v24 = vld [vmem:[#allocation12 + $0x68] sm:$0xff] }
 0x592   : > { %v5422_v8 = vld [vmem:[#allocation2 + $0x50] sm:$0xff]  ;;  %v5423_v28 = vld [vmem:[#allocation2 + $0x48] sm:$0xff]  ;;  %v4156_v44 = vld [vmem:[#allocation12 + $0x78] sm:$0xff]  ;;  %p5634_p10 = pneg %p5633_p13 }
 0x593   : > { %v5424_v38 = vld [vmem:[#allocation2 + $0x58] sm:$0xff] }
 0x594   : > { %p5641_p11 = pnand %p5640_p2, %p5634_p10 }
 0x5d7   : > { %v3984_v47 = vpop.f32.mrb[32].mxu0 }
 0x5d8   : > { %v4109_v50 = vsub.f32 %v5413_v32, %v3984_v47  ;;  %v4157_v39 = vadd.f32 %v4141_v26, %v3984_v47  ;;  %v4090_v40 = vpop.f32.mrb[32].mxu1  ;;  %v3986_v43 = vpop.f32.mrb[33].mxu0  ;;  %v5426_v32 = vld [vmem:[#allocation2 + $0x70] sm:$0xff] }
 0x5d9   : > { %v4111_v63 = vsub.f32 %v5414_v57, %v4090_v40  ;;  %v4159_v15 = vadd.f32 %v4143_v20, %v4090_v40  ;;  %v4110_v25 = vsub.f32 %v5415_v2, %v3986_v43  ;;  %v4158_v4 = vadd.f32 %v4142_v1, %v3986_v43  ;;  %v4092_v33 = vpop.f32.mrb[33].mxu1  ;;  %v3988_v61 = vpop.f32.mrb[34].mxu0  ;;  %v5425_v20 = vld [vmem:[#allocation2 + $0x60] sm:$0xff]  ;;  %v5427_v40 = vld [vmem:[#allocation2 + $0x68] sm:$0xff]  ;;  %v5428_v57 = vld [vmem:[#allocation2 + $0x78] sm:$0xff] }
 0x5da   : > { %4125 = vst [vmem:[#allocation2] sm:$0xff] %v4109_v50  ;;  %4173 = vst [vmem:[#allocation12] sm:$0xff] %v4157_v39  ;;  %v4112_v22 = vsub.f32 %v5416_v17, %v4092_v33  ;;  %v4160_v10 = vadd.f32 %v4144_v54, %v4092_v33  ;;  %v4113_v53 = vsub.f32 %v5417_v48, %v3988_v61  ;;  %v4094_v18 = vpop.f32.mrb[34].mxu1  ;;  %v3990_v41 = vpop.f32.mrb[35].mxu0 }
 0x5db   : > { %v4161_v9 = vadd.f32 %v4145_v23, %v3988_v61  ;;  %4127 = vst [vmem:[#allocation2 + $0x10] sm:$0xff] %v4111_v63  ;;  %4175 = vst [vmem:[#allocation12 + $0x10] sm:$0xff] %v4159_v15  ;;  %v4115_v7 = vsub.f32 %v5418_v30, %v4094_v18  ;;  %v4163_v3 = vadd.f32 %v4147_v45, %v4094_v18  ;;  %v4096_v6 = vpop.f32.mrb[35].mxu1 }
 0x5dc   : > { %4126 = vst [vmem:[#allocation2 + $0x8] sm:$0xff] %v4110_v25  ;;  %4174 = vst [vmem:[#allocation12 + $0x8] sm:$0xff] %v4158_v4  ;;  %v4114_v56 = vsub.f32 %v5419_v60, %v3990_v41  ;;  %v4162_v59 = vadd.f32 %v4146_v13, %v3990_v41  ;;  %v4116_v49 = vsub.f32 %v5420_v51, %v4096_v6 }
 0x5dd   : > { %4128 = vst [vmem:[#allocation2 + $0x18] sm:$0xff] %v4112_v22  ;;  %4176 = vst [vmem:[#allocation12 + $0x18] sm:$0xff] %v4160_v10  ;;  %v4164_v37 = vadd.f32 %v4148_v42, %v4096_v6 }
 0x5de   : > { %4129 = vst [vmem:[#allocation2 + $0x20] sm:$0xff] %v4113_v53  ;;  %4177 = vst [vmem:[#allocation12 + $0x20] sm:$0xff] %v4161_v9 }
 0x5df   : > { %4131 = vst [vmem:[#allocation2 + $0x30] sm:$0xff] %v4115_v7  ;;  %4179 = vst [vmem:[#allocation12 + $0x30] sm:$0xff] %v4163_v3  ;;  %v3994_v14 = vpop.f32.mrb[36].mxu0 }
 0x5e0   : > { %4130 = vst [vmem:[#allocation2 + $0x28] sm:$0xff] %v4114_v56  ;;  %4178 = vst [vmem:[#allocation12 + $0x28] sm:$0xff] %v4162_v59  ;;  %v4117_v55 = vsub.f32 %v5421_v52, %v3994_v14  ;;  %v4165_v58 = vadd.f32 %v4149_v27, %v3994_v14  ;;  %v4100_v36 = vpop.f32.mrb[36].mxu1  ;;  %v3996_v0 = vpop.f32.mrb[37].mxu0 }
 0x5e1   : > { %4132 = vst [vmem:[#allocation2 + $0x38] sm:$0xff] %v4116_v49  ;;  %4180 = vst [vmem:[#allocation12 + $0x38] sm:$0xff] %v4164_v37  ;;  %v4119_v11 = vsub.f32 %v5422_v8, %v4100_v36  ;;  %v4167_v31 = vadd.f32 %v4151_v46, %v4100_v36  ;;  %v4118_v16 = vsub.f32 %v5423_v28, %v3996_v0  ;;  %v4102_v21 = vpop.f32.mrb[37].mxu1  ;;  %v3998_v35 = vpop.f32.mrb[38].mxu0 }
 0x5e2   : > { %v4166_v12 = vadd.f32 %v4150_v62, %v3996_v0  ;;  %4133 = vst [vmem:[#allocation2 + $0x40] sm:$0xff] %v4117_v55  ;;  %4181 = vst [vmem:[#allocation12 + $0x40] sm:$0xff] %v4165_v58  ;;  %v4120_v29 = vsub.f32 %v5424_v38, %v4102_v21  ;;  %v4168_v26 = vadd.f32 %v4152_v19, %v4102_v21  ;;  %v4104_v54 = vpop.f32.mrb[38].mxu1  ;;  %v4000_v23 = vpop.f32.mrb[39].mxu0 }
 0x5e3   : > { %v4121_v1 = vsub.f32 %v5425_v20, %v3998_v35  ;;  %v4169_v47 = vadd.f32 %v4153_v5, %v3998_v35  ;;  %4135 = vst [vmem:[#allocation2 + $0x50] sm:$0xff] %v4119_v11  ;;  %4183 = vst [vmem:[#allocation12 + $0x50] sm:$0xff] %v4167_v31  ;;  %v4123_v50 = vsub.f32 %v5426_v32, %v4104_v54  ;;  %v4106_v13 = vpop.f32.mrb[39].mxu1 }
 0x5e4   : > { %4134 = vst [vmem:[#allocation2 + $0x48] sm:$0xff] %v4118_v16  ;;  %4182 = vst [vmem:[#allocation12 + $0x48] sm:$0xff] %v4166_v12  ;;  %v4171_v39 = vadd.f32 %v4155_v34, %v4104_v54  ;;  %v4122_v43 = vsub.f32 %v5427_v40, %v4000_v23  ;;  %v4170_v45 = vadd.f32 %v4154_v24, %v4000_v23 }
 0x5e5   : > { %4136 = vst [vmem:[#allocation2 + $0x58] sm:$0xff] %v4120_v29  ;;  %4184 = vst [vmem:[#allocation12 + $0x58] sm:$0xff] %v4168_v26  ;;  %v4124_v63 = vsub.f32 %v5428_v57, %v4106_v13  ;;  %v4172_v15 = vadd.f32 %v4156_v44, %v4106_v13 }
 0x5e6   : > { %4137 = vst [vmem:[#allocation2 + $0x60] sm:$0xff] %v4121_v1  ;;  %4185 = vst [vmem:[#allocation12 + $0x60] sm:$0xff] %v4169_v47 }
 0x5e7   : > { %4139 = vst [vmem:[#allocation2 + $0x70] sm:$0xff] %v4123_v50  ;;  %4187 = vst [vmem:[#allocation12 + $0x70] sm:$0xff] %v4171_v39 }
 0x5e8   : > { %4138 = vst [vmem:[#allocation2 + $0x68] sm:$0xff] %v4122_v43  ;;  %4186 = vst [vmem:[#allocation12 + $0x68] sm:$0xff] %v4170_v45 }
 0x5e9   : > { %4140 = vst [vmem:[#allocation2 + $0x78] sm:$0xff] %v4124_v63  ;;  %4188 = vst [vmem:[#allocation12 + $0x78] sm:$0xff] %v4172_v15 }
 0x5ea   : > { %5644 = shalt.err (!%p5641_p11)
}
 0x5eb   : > { %s8419_s20 = sld [smem:[#allocation141_spill]]  ;;  %p8420_p5 = pmov %p8418_p9 }
 0x5f1   : > { %s5645_s29 = scalar_lea.hbm %s8419_s20, 2048 }
 0x5f2   : > { %p5646_p12 = scmp.ne.s32.totalorder %s8419_s20, %s5645_s29  ;;  %p5651_p3 = scmp.lt.u32.totalorder %s5645_s29, %s8419_s20 }
 0x5f4   : > { %p5647_p6 = pnand %p5646_p12, %p8420_p5 }
 0x5f6   : > { %p5648_p8 = pneg %p5647_p6 }
 0x5f8   : > { %p5653_p7 = pnand %p5651_p3, %p5648_p8 }
 0x5fa   : > { %5656 = shalt.err (!%p5653_p7)
}
 0x5fb   : > { %s5730_s26 = smov 512   ;;  %s5731_s15 = smov 32  }
 0x5fc   : > { %p8421_p4 = pmov %p8420_p5 }
 0x5fe   : > { %4767 = dma.vmem_to_hbm [thread:$0]  (%p8421_p4), %s4205_s17, 2048, %s8419_s20, [#allocation5], %s5730_s26, %s5730_s26, %s5731_s15  }
 0x5ff   : > { %p8422_p9 = pmov %p8421_p4 }
 0x600   : > { %p8423_p13 = pmov %p8421_p4 }
 0x601   : > { %5690 = dma.done.wait (%p8422_p9), [#allocation5], 2048  }
 0x602   : > { %5692 = vsyncadd (%p8423_p13), [#allocation5], 4294965248 }
 0x603 PF: > { %s8424_s24 = sld [smem:[#allocation22_spill]]  ;;  %p4805_p10 = scmp.ge.s32.totalorder %s5711_s12, 2 }
 0x604   : > { %s8425_s19 = sadd.s32 4294967294, %s5711_s12  }
 0x605   : > { %s4250_s18 = sand.u32 1, %s8425_s19  }
 0x606   : > { %s4251_s0 = scalar_lea.sflag [#allocation14], %s4250_s18 }
 0x609   : > { %p8426_p0 = scmp.ne.s32.totalorder %s8424_s24, 0 }
 0x60b   : > { %p4792_p1 = pnand %p4805_p10, %p8426_p0 }
 0x60d   : > { %5694 = dma.done.wait (!%p4792_p1), %s4251_s0, 80  }
 0x60e   : > { %5696 = vsyncadd (!%p4792_p1), %s4251_s0, 4294967216  ;;  %s8427_s12 = sld [smem:[#allocation23_spill]]  ;;  %s8428_s28 = sld [smem:[#allocation24_spill]] }
 0x60f   : > { %s8429_s30 = smov %s5703_s10  ;;  %s8430_s10 = smov %s5707_s11 }
 0x614   : > { %p26_p2 = scmp.ge.s32.totalorder %s8427_s12, 7   ;;  %s8431_s11 = smov %s8428_s28 }
 0x616   :  { %28 = sbr.rel (!%p26_p2) target bundleno = 16 (0x10), region = 152 }
 0x61d   :  { %4264 = vsyncpa [#allocation4], 1 }
 0x61e   :  { %4266 = vsyncpa [#allocation4 + $0x1], 1 }
 0x61f   :  { %4267 = vsyncpa [#allocation7], 1 }
 0x620   :  { %4269 = vsyncpa [#allocation7 + $0x1], 1 }
 0x621   :  { %4270 = vsyncpa [#allocation10], 1 }
 0x622   :  { %4271 = vsyncpa [#allocation5], 1 }
 0x623   :  { %4273 = vsyncpa [#allocation5 + $0x1], 1 }
 0x624   :  { %4274 = vsyncpa [#allocation14], 1 }
 0x625   :  { %4276 = vsyncpa [#allocation14 + $0x1], 1 }

</bundles_post_ra>
